<compile_context>
chip_gen: v6e
topology: v6e:2x2x1
jax: 0.10.0
libtpu: 0.0.40
codegen_flags: <defaults>
</compile_context>

<pallas_src>
import numpy as np
import jax
import jax.numpy as jnp
from jax.experimental import pallas as pl
from jax.experimental.pallas import tpu as pltpu

# ---------------- static config (mirrors DirectVoxGOVonMises.__init__) -------
XYZ_MIN = np.array([-1.0, -1.0, -1.0], np.float32)
XYZ_MAX = np.array([1.0, 1.0, 1.0], np.float32)
NUM_VOXELS = 16 ** 3
NUM_VOXELS_BASE = 16 ** 3
ALPHA_INIT = 1e-2
RGBNET_DIM = 12                      # k0_dim (rgbnet_direct=True)
RGBNET_WIDTH = 128
VIEWBASE_PE = 4
VIEW_DIM = 3 + 3 * VIEWBASE_PE * 2   # 27
DIM0 = RGBNET_DIM + VIEW_DIM         # 39
DIM0A = DIM0 + 1                     # +1 ones feature -> folds layer-1 bias

VOXEL_SIZE = float((np.prod(XYZ_MAX - XYZ_MIN) / NUM_VOXELS) ** (1.0 / 3.0))
VOXEL_SIZE_BASE = float((np.prod(XYZ_MAX - XYZ_MIN) / NUM_VOXELS_BASE) ** (1.0 / 3.0))
WORLD_SIZE = tuple(int(round(x)) for x in (XYZ_MAX - XYZ_MIN) / VOXEL_SIZE)  # (16,16,16)
VOXEL_SIZE_RATIO = VOXEL_SIZE / VOXEL_SIZE_BASE
ACT_SHIFT = float(np.log(1.0 / (1.0 - ALPHA_INIT) - 1.0))

# render kwargs
STEPSIZE = 0.5
NEAR = 0.05
BG = 1.0
INTERVAL = STEPSIZE * VOXEL_SIZE_RATIO
STEPDIST = STEPSIZE * VOXEL_SIZE

# static ray / sample geometry
N_RAYS = 128
S = 8            # samples per ray (fixed; torch version filters dynamically)
HW = RGBNET_WIDTH


def _mxu_is_256_wide():
    """v6e / v7x MXUs are 2x256x256; v2-v5 generations use 128-wide tiles."""
    try:
        kind = jax.devices()[0].device_kind.lower()
    except Exception:
        return True
    return not any(g in kind for g in ("v2", "v3", "v4", "v5"))


WIDE_MXU = _mxu_is_256_wide()


def _pick_tb(n_rays):
    """Rays per grid step: grow the block (overhead-bound otherwise) but keep
    >= 2 grid steps (v7x has 2 TensorCores) and TB a multiple of 16 so the
    block lane dim TB*S is a multiple of 128."""
    best = n_rays                      # fall back: single full-extent step
    cand = 16
    while cand <= min(256, n_rays // 2):
        if n_rays % cand == 0:
            best = cand
        cand *= 2
    return best


# ------------------------------- Pallas kernel -------------------------------
def _dvgo_vm_kernel(feat_ref, geo_ref, w1_ref, w2_ref, w3_ref, b_ref, out_ref):
    f32 = jnp.float32
    bf16 = jnp.bfloat16
    tbs = geo_ref.shape[1]             # TB * S lanes (multiple of 128)

    # --- Raw2Alpha on lane-dense (1, TBS) rows --------------------------------
    den = geo_ref[0:1, :]                                      # (1, TBS)
    inb = geo_ref[1:2, :] > 0.0
    x = den + ACT_SHIFT
    softp = jnp.maximum(x, 0.0) + jnp.log(1.0 + jnp.exp(-jnp.abs(x)))  # stable
    alpha = jnp.where(inb, 1.0 - jnp.exp(-INTERVAL * softp), 0.0)
    lom = jnp.where(inb, -INTERVAL * softp, 0.0)               # log(1 - alpha)

    # per-sample position within its ray (samples are ray-major, S per ray)
    lane = jax.lax.broadcasted_iota(jnp.int32, (1, tbs), 1)
    pos = lane % S

    # --- Alphas2Weights: segmented Hillis-Steele scan along lanes (3 rolls) ---
    csum = lom
    sh = 1
    while sh < S:
        csum = csum + jnp.where(pos >= sh,
                                pltpu.roll(csum, shift=sh, axis=1), 0.0)
        sh *= 2
    excl = csum - lom                  # exclusive prefix of log(1-alpha)
    wrow = alpha * jnp.exp(excl)       # per-sample weights (1, TBS)
    ainv = jnp.exp(csum)               # at pos == S-1: prod(1-alpha) per ray

    # --- fused rgbnet + kappanet, channel-major on the MXU (bf16 in, f32 acc) -
    b = b_ref[...]
    b2c = b[:, 0:1]                    # (256, 1)
    b3c = b[0:4, 1:2]                  # (4, 1)
    # layer-1 bias already folded into w1 via the ones feature row of feat
    h1 = jnp.maximum(jnp.dot(w1_ref[...], feat_ref[...],
                             preferred_element_type=f32), 0.0)
    h1b = h1.astype(bf16)              # (256, TBS) bf16 carried between layers
    if WIDE_MXU:
        # single 256-wide block-diagonal layers (fill the 2x256x256 MXU)
        h2 = jnp.maximum(jnp.dot(w2_ref[...], h1b,
                                 preferred_element_type=f32) + b2c, 0.0)
        o = jnp.dot(w3_ref[...], h2.astype(bf16),
                    preferred_element_type=f32) + b3c           # (4, TBS)
    else:
        # 128-wide MXU (v5e and older): two half-width matmuls sharing h1
        w2 = w2_ref[...]
        w3 = w3_ref[...]
        ha = jnp.maximum(jnp.dot(w2[:HW, :HW], h1b[:HW, :],
                                 preferred_element_type=f32) + b2c[:HW], 0.0)
        hb = jnp.maximum(jnp.dot(w2[HW:, HW:], h1b[HW:, :],
                                 preferred_element_type=f32) + b2c[HW:], 0.0)
        o = (jnp.dot(w3[:, :HW], ha.astype(bf16), preferred_element_type=f32)
             + jnp.dot(w3[:, HW:], hb.astype(bf16), preferred_element_type=f32)
             + b3c)                                             # (4, TBS)

    rowc = jax.lax.broadcasted_iota(jnp.int32, o.shape, 0)
    rgbk = jnp.where(rowc < 3, jax.nn.sigmoid(o),               # rgb channels
                     jnp.where(o >= 0.0, o, 0.01 * o))          # leaky_relu kappa

    # --- segment_coo (rgb/kappa) + depth: one more 3-roll segmented reduce ----
    pos_f = pos.astype(f32)
    v = jnp.concatenate([wrow * rgbk, wrow * pos_f], axis=0)    # (5, TBS)
    vsum = v
    sh = 1
    while sh < S:
        vsum = vsum + jnp.where(pos >= sh,
                                pltpu.roll(vsum, shift=sh, axis=1), 0.0)
        sh *= 2
    # at pos == S-1 the rows of vsum hold the per-ray totals
    marched = vsum[0:4, :] + ainv * BG                          # rgb+kappa + bg
    depth_row = vsum[4:5, :]

    # --- ONE fully lane-dense packed output (16, TBS) -------------------------
    z1 = jnp.zeros((1, tbs), f32)
    out_ref[...] = jnp.concatenate(
        [wrow,        # 0  weights              (per-sample)
         alpha,       # 1  raw_alpha            (per-sample)
         rgbk,        # 2-5 raw_rgb [r,g,b,k]   (per-sample)
         z1, z1,      # 6,7 padding
         marched,     # 8-11 rgb_marched+bg     (valid at pos == S-1)
         depth_row,   # 12 depth                (valid at pos == S-1)
         ainv,        # 13 alphainv_last        (valid at pos == S-1)
         z1, z1],     # 14,15 padding
        axis=0)


# ------------------------------ JAX glue --------------------------------------
def trilinear_sample(grid_vals, pts):
    """F.grid_sample(..., mode='bilinear', align_corners=True) equivalent.
    grid_vals: (Nx,Ny,Nz,C); pts: (M,3) world coords -> (M,C)."""
    # TODO(synk): trilinear grid_sample is a data-dependent gather with no clean
    # Pallas TPU equivalent; kept in plain JAX.
    sizes = jnp.asarray(grid_vals.shape[:3], jnp.float32)
    u = (pts - XYZ_MIN) / (XYZ_MAX - XYZ_MIN) * (sizes - 1.0)
    u = jnp.clip(u, 0.0, sizes - 1.0)
    i0 = jnp.clip(jnp.floor(u).astype(jnp.int32), 0,
                  (sizes - 2.0).astype(jnp.int32))
    f = u - i0.astype(jnp.float32)
    Nx, Ny, Nz, C = grid_vals.shape
    flat = grid_vals.reshape(-1, C)

    def corner(dx, dy, dz):
        idx = ((i0[:, 0] + dx) * Ny + (i0[:, 1] + dy)) * Nz + (i0[:, 2] + dz)
        return flat[idx]

    fx, fy, fz = f[:, 0:1], f[:, 1:2], f[:, 2:3]
    return (corner(0, 0, 0) * (1 - fx) * (1 - fy) * (1 - fz)
            + corner(0, 0, 1) * (1 - fx) * (1 - fy) * fz
            + corner(0, 1, 0) * (1 - fx) * fy * (1 - fz)
            + corner(0, 1, 1) * (1 - fx) * fy * fz
            + corner(1, 0, 0) * fx * (1 - fy) * (1 - fz)
            + corner(1, 0, 1) * fx * (1 - fy) * fz
            + corner(1, 1, 0) * fx * fy * (1 - fz)
            + corner(1, 1, 1) * fx * fy * fz)


@jax.jit
def dvgo_vm_forward(rays_o, rays_d, viewdirs, fused_params, density_grid, k0_grid):
    N = rays_o.shape[0]
    TB = _pick_tb(N)
    TBS = TB * S
    f32 = jnp.float32
    xyz_min = jnp.asarray(XYZ_MIN)
    xyz_max = jnp.asarray(XYZ_MAX)

    # --- sample_ray (fixed S steps from t_min; mirrors sample_pts_on_rays) ----
    # TODO(synk): the torch version dynamically drops out-of-bbox / mask_cache /
    # fast_color_thres samples; here a fixed S per ray with in-bbox masking.
    vec = jnp.where(rays_d == 0, 1e-6, rays_d)
    rate_a = (xyz_max - rays_o) / vec
    rate_b = (xyz_min - rays_o) / vec
    t_min = jnp.clip(jnp.minimum(rate_a, rate_b).max(-1), NEAR, 1e9)
    t = t_min[:, None] + STEPDIST * jnp.arange(S, dtype=f32)[None, :]
    pts = rays_o[:, None, :] + rays_d[:, None, :] * t[..., None]    # (N,S,3)
    inb = jnp.all((pts >= xyz_min) & (pts <= xyz_max), axis=-1)     # (N,S)
    pts_flat = pts.reshape(N * S, 3)
    inb_flat = inb.reshape(N * S, 1).astype(f32)

    # --- voxel grid queries (data-dependent gather; plain-JAX glue) -----------
    density_flat = trilinear_sample(density_grid, pts_flat)[:, 0:1]  # (N*S,1)
    k0_flat = trilinear_sample(k0_grid, pts_flat)                    # (N*S,12)
    geo = jnp.concatenate([density_flat, inb_flat], axis=-1).T       # (2, N*S)

    # --- view-direction positional embedding, expanded per sample (ray_id) ----
    vfreq = 2.0 ** jnp.arange(VIEWBASE_PE, dtype=f32)
    ve = (viewdirs[..., None] * vfreq).reshape(N, -1)                # (N,12)
    vemb = jnp.concatenate([viewdirs, jnp.sin(ve), jnp.cos(ve)], -1)  # (N,27)
    vemb_flat = jnp.repeat(vemb, S, axis=0)                          # (N*S,27)
    # channel-major merged layer-1 feature; trailing ones row folds layer-1 bias
    featT = jnp.concatenate(
        [k0_flat, vemb_flat, jnp.ones((N * S, 1), f32)], -1
    ).T.astype(jnp.bfloat16)                                         # (40, N*S)

    W1Ta, W2T, W3T, bias23 = fused_params

    full = lambda a: pl.BlockSpec(a.shape, lambda i: (0, 0))
    in_specs = [
        pl.BlockSpec((DIM0A, TBS), lambda i: (0, i)),  # featT (channel-major)
        pl.BlockSpec((2, TBS), lambda i: (0, i)),      # [density; in-bbox]
        full(W1Ta), full(W2T), full(W3T), full(bias23),
    ]
    out_specs = pl.BlockSpec((16, TBS), lambda i: (0, i))
    out_shape = jax.ShapeDtypeStruct((16, N * S), f32)

    out = pl.pallas_call(
        _dvgo_vm_kernel,
        out_shape=out_shape,
        grid_spec=pltpu.PrefetchScalarGridSpec(
            num_scalar_prefetch=0,
            grid=(N // TB,),
            in_specs=in_specs,
            out_specs=out_specs),
        compiler_params=pltpu.CompilerParams(
            dimension_semantics=("parallel",)),
    )(featT, geo, W1Ta, W2T, W3T, bias23)

    # cheap wrapper-side unpacking (plain XLA): rows / last-sample columns
    last = out[:, S - 1::S]                              # (16, N)
    ray_id = jnp.repeat(jnp.arange(N), S)
    ret = {
        'alphainv_last': last[13],
        'weights': out[0],
        'rgb_marched': last[8:12].T,                     # (N,4) = [rgb, kappa]
        'raw_alpha': out[1],
        'raw_rgb': out[2:6].T,                           # (N*S,4) = [rgb, kappa]
        'ray_id': ray_id,
        'depth': last[12],
    }
    return ret, (density_flat, inb_flat, k0_flat, vemb_flat)


# ----------------------- pure-JAX reference (for checking) -------------------
def reference_forward(density_flat, inb_flat, k0_flat, vemb_flat, params):
    """Structurally independent reference (unfused nets, cumprod transmittance,
    segment sums).  MLP matmuls use the same bf16-input / f32-accumulate
    precision that the kernel uses on the MXU."""
    (W1, b1, W2, b2, W3, b3, K1, kb1, K2, kb2, K3, kb3) = params
    f32 = jnp.float32

    def mm(a, b):
        return jnp.dot(a.astype(jnp.bfloat16), b.astype(jnp.bfloat16),
                       preferred_element_type=f32)

    den = density_flat[:, 0]
    m = inb_flat[:, 0] > 0
    softp = jnp.logaddexp(den + ACT_SHIFT, 0.0)
    alpha = jnp.where(m, 1.0 - jnp.exp(-INTERVAL * softp), 0.0)
    a = alpha.reshape(N_RAYS, S)
    om = 1.0 - a
    Texcl = jnp.concatenate([jnp.ones((N_RAYS, 1)), jnp.cumprod(om, 1)[:, :-1]], 1)
    weights = a * Texcl
    ainv = jnp.prod(om, 1)

    feat = jnp.concatenate([k0_flat, vemb_flat], -1)
    h = jax.nn.relu(mm(feat, W1) + b1)
    h = jax.nn.relu(mm(h, W2) + b2)
    rgb = jax.nn.sigmoid(mm(h, W3) + b3)
    g = jax.nn.relu(mm(feat, K1) + kb1)
    g = jax.nn.relu(mm(g, K2) + kb2)
    kl = mm(g, K3) + kb3
    kappa = jnp.where(kl >= 0.0, kl, 0.01 * kl)
    rgbk = jnp.concatenate([rgb, kappa], -1)

    src = weights.reshape(-1, 1) * rgbk
    rgb_marched = src.reshape(N_RAYS, S, 4).sum(1) + ainv[:, None] * BG
    depth = (weights * jnp.arange(S, dtype=f32)[None, :]).sum(1)
    return rgb_marched, weights.reshape(-1), alpha, rgbk, ainv, depth


# ----------------------------------- main -------------------------------------
if __name__ == "__main__":
    key = jax.random.PRNGKey(0)
    ks = jax.random.split(key, 16)

    def lin(kw, kb, fin, fout, zero_bias=False):
        w = (jax.random.normal(kw, (fin, fout), jnp.float32)
             / np.sqrt(fin)).astype(jnp.float32)
        if zero_bias:
            b = jnp.zeros((1, fout), jnp.float32)
        else:
            b = 0.01 * jax.random.normal(kb, (1, fout), jnp.float32)
        return w, b

    W1, b1 = lin(ks[0], ks[1], DIM0, RGBNET_WIDTH)
    W2, b2 = lin(ks[2], ks[3], RGBNET_WIDTH, RGBNET_WIDTH)
    W3, b3 = lin(ks[4], ks[5], RGBNET_WIDTH, 3, zero_bias=True)  # rgbnet[-1].bias=0
    K1, kb1 = lin(ks[6], ks[7], DIM0, RGBNET_WIDTH)
    K2, kb2 = lin(ks[8], ks[9], RGBNET_WIDTH, RGBNET_WIDTH)
    K3, kb3 = lin(ks[10], ks[11], RGBNET_WIDTH, 1)
    unfused = (W1, b1, W2, b2, W3, b3, K1, kb1, K2, kb2, K3, kb3)

    # fused / block-diagonal packing for the kernel, TRANSPOSED (channel-major)
    bf16 = jnp.bfloat16
    # layer 1: (256, 40) with layer-1 bias folded into the last (ones-feature) col
    W1Ta = jnp.concatenate(
        [jnp.concatenate([W1.T, b1.T], axis=1),
         jnp.concatenate([K1.T, kb1.T], axis=1)], axis=0).astype(bf16)  # (256,40)
    # layer 2: block-diagonal (256, 256)
    W2T = (jnp.zeros((2 * HW, 2 * HW), jnp.float32)
           .at[:HW, :HW].set(W2.T).at[HW:, HW:].set(K2.T)).astype(bf16)
    # layer 3: (4, 256), rows = [r, g, b, kappa]
    W3T = (jnp.zeros((4, 2 * HW), jnp.float32)
           .at[0:3, :HW].set(W3.T).at[3:4, HW:].set(K3.T)).astype(bf16)
    # packed remaining biases: col 0 = layer-2 (256,), col 1 rows 0-3 = layer-3
    bias23 = (jnp.zeros((2 * HW, 2), jnp.float32)
              .at[:, 0:1].set(jnp.concatenate([b2, kb2], axis=1).T)
              .at[0:4, 1:2].set(jnp.concatenate([b3, kb3], axis=1).T))
    fused = (W1Ta, W2T, W3T, bias23)

    density_grid = 0.5 * jax.random.normal(ks[12], (*WORLD_SIZE, 1), jnp.float32)
    k0_grid = 0.3 * jax.random.normal(ks[13], (*WORLD_SIZE, RGBNET_DIM), jnp.float32)

    rays_o = jax.random.uniform(ks[14], (N_RAYS, 3), jnp.float32, -0.5, 0.5)
    rays_d = jax.random.normal(ks[15], (N_RAYS, 3), jnp.float32)
    rays_d = rays_d / jnp.linalg.norm(rays_d, axis=-1, keepdims=True)
    viewdirs = rays_d

    ret, interm = dvgo_vm_forward(rays_o, rays_d, viewdirs, fused,
                                  density_grid, k0_grid)
    jax.block_until_ready(ret['rgb_marched'])

    rgbm_r, w_r, alpha_r, rgbk_r, ainv_r, dep_r = reference_forward(*interm, unfused)

    def close(a, b):
        return np.allclose(np.asarray(a), np.asarray(b), atol=2e-3, rtol=2e-3)

    ok = (close(ret['rgb_marched'], rgbm_r)
          and close(ret['weights'], w_r)
          and close(ret['raw_alpha'], alpha_r)
          and close(ret['raw_rgb'], rgbk_r)
          and close(ret['alphainv_last'], ainv_r)
          and close(ret['depth'], dep_r))
    assert ok, "Pallas kernel output mismatch vs JAX reference"
    print("KERNEL_OK")
</pallas_src>

<mosaic_0001>
module attributes {stable_mosaic.version = 11 : i64} {
  func.func @_dvgo_vm_kernel(%arg0: i32, %arg1: memref<40x512xbf16, #tpu.memory_space<vmem>>, %arg2: memref<2x512xf32, #tpu.memory_space<vmem>>, %arg3: memref<256x40xbf16, #tpu.memory_space<vmem>>, %arg4: memref<256x256xbf16, #tpu.memory_space<vmem>>, %arg5: memref<4x256xbf16, #tpu.memory_space<vmem>>, %arg6: memref<256x2xf32, #tpu.memory_space<vmem>>, %arg7: memref<16x512xf32, #tpu.memory_space<vmem>>) attributes {dimension_semantics = [#tpu.dimension_semantics<parallel>], iteration_bounds = array<i64: 2>, scalar_prefetch = 0 : i64, scratch_operands = 0 : i64, tpu.core_type = #tpu.core_type<tc>, window_params = [{transform_indices = @transform_0, window_bounds = array<i64: 40, 512>}, {transform_indices = @transform_1, window_bounds = array<i64: 2, 512>}, {pipeline_mode = #tpu.pipeline_mode<synchronous>, transform_indices = @transform_2, window_bounds = array<i64: 256, 40>}, {pipeline_mode = #tpu.pipeline_mode<synchronous>, transform_indices = @transform_3, window_bounds = array<i64: 256, 256>}, {pipeline_mode = #tpu.pipeline_mode<synchronous>, transform_indices = @transform_4, window_bounds = array<i64: 4, 256>}, {pipeline_mode = #tpu.pipeline_mode<synchronous>, transform_indices = @transform_5, window_bounds = array<i64: 256, 2>}, {transform_indices = @transform_6, window_bounds = array<i64: 16, 512>}]} {
    %c0 = arith.constant 0 : index
    %c0_0 = arith.constant 0 : index
    %0 = vector.load %arg2[%c0, %c0_0] : memref<2x512xf32, #tpu.memory_space<vmem>>, vector<1x512xf32>
    %c1 = arith.constant 1 : index
    %c0_1 = arith.constant 0 : index
    %1 = vector.load %arg2[%c1, %c0_1] : memref<2x512xf32, #tpu.memory_space<vmem>>, vector<1x512xf32>
    %cst = arith.constant 0.000000e+00 : f32
    %2 = vector.broadcast %cst : f32 to vector<1x512xf32>
    %3 = arith.cmpf ogt, %1, %2 : vector<1x512xf32>
    %cst_2 = arith.constant -4.595120e+00 : f32
    %4 = vector.broadcast %cst_2 : f32 to vector<1x512xf32>
    %5 = arith.addf %0, %4 : vector<1x512xf32>
    %cst_3 = arith.constant 0.000000e+00 : f32
    %6 = vector.broadcast %cst_3 : f32 to vector<1x512xf32>
    %7 = arith.maximumf %5, %6 : vector<1x512xf32>
    %8 = math.absf %5 : vector<1x512xf32>
    %cst_4 = arith.constant 0.000000e+00 : f32
    %9 = vector.broadcast %cst_4 : f32 to vector<1x512xf32>
    %10 = arith.subf %9, %8 : vector<1x512xf32>
    %11 = math.exp %10 : vector<1x512xf32>
    %cst_5 = arith.constant 1.000000e+00 : f32
    %12 = vector.broadcast %cst_5 : f32 to vector<1x512xf32>
    %13 = arith.addf %12, %11 : vector<1x512xf32>
    %14 = math.log %13 : vector<1x512xf32>
    %15 = arith.addf %7, %14 : vector<1x512xf32>
    %cst_6 = arith.constant -5.000000e-01 : f32
    %16 = vector.broadcast %cst_6 : f32 to vector<1x512xf32>
    %17 = arith.mulf %16, %15 : vector<1x512xf32>
    %18 = math.exp %17 : vector<1x512xf32>
    %cst_7 = arith.constant 1.000000e+00 : f32
    %19 = vector.broadcast %cst_7 : f32 to vector<1x512xf32>
    %20 = arith.subf %19, %18 : vector<1x512xf32>
    %cst_8 = arith.constant 0.000000e+00 : f32
    %21 = vector.broadcast %cst_8 : f32 to vector<1x512xf32>
    %22 = arith.select %3, %20, %21 : vector<1x512xi1>, vector<1x512xf32>
    %cst_9 = arith.constant -5.000000e-01 : f32
    %23 = vector.broadcast %cst_9 : f32 to vector<1x512xf32>
    %24 = arith.mulf %23, %15 : vector<1x512xf32>
    %cst_10 = arith.constant 0.000000e+00 : f32
    %25 = vector.broadcast %cst_10 : f32 to vector<1x512xf32>
    %26 = arith.select %3, %24, %25 : vector<1x512xi1>, vector<1x512xf32>
    %27 = tpu.iota {dimensions = array<i32: 1>} : vector<1x512xi32>
    %c8_i32 = arith.constant 8 : i32
    %c0_i32 = arith.constant 0 : i32
    %28 = arith.cmpi eq, %c8_i32, %c0_i32 : i32
    %c1_i32 = arith.constant 1 : i32
    %29 = arith.select %28, %c1_i32, %c8_i32 : i32
    %30 = vector.broadcast %29 : i32 to vector<1x512xi32>
    %31 = arith.remsi %27, %30 : vector<1x512xi32>
    %c0_i32_11 = arith.constant 0 : i32
    %32 = vector.broadcast %c0_i32_11 : i32 to vector<1x512xi32>
    %33 = arith.cmpi ne, %31, %32 : vector<1x512xi32>
    %c0_i32_12 = arith.constant 0 : i32
    %34 = vector.broadcast %c0_i32_12 : i32 to vector<1x512xi32>
    %35 = arith.cmpi slt, %31, %34 : vector<1x512xi32>
    %c0_i32_13 = arith.constant 0 : i32
    %36 = arith.cmpi slt, %29, %c0_i32_13 : i32
    %37 = vector.broadcast %36 : i1 to vector<1x512xi1>
    %38 = vector.broadcast %37 : vector<1x512xi1> to vector<1x512xi1>
    %39 = arith.xori %35, %38 : vector<1x512xi1>
    %40 = arith.andi %39, %33 : vector<1x512xi1>
    %41 = vector.broadcast %29 : i32 to vector<1x512xi32>
    %42 = arith.addi %31, %41 : vector<1x512xi32>
    %43 = arith.select %40, %42, %31 : vector<1x512xi1>, vector<1x512xi32>
    %c1_i32_14 = arith.constant 1 : i32
    %44 = vector.broadcast %c1_i32_14 : i32 to vector<1x512xi32>
    %45 = arith.cmpi sge, %43, %44 : vector<1x512xi32>
    %c1_i32_15 = arith.constant 1 : i32
    %46 = tpu.dynamic_rotate %26 by %c1_i32_15 dim 1 : vector<1x512xf32>, i32 -> vector<1x512xf32>
    %cst_16 = arith.constant 0.000000e+00 : f32
    %47 = vector.broadcast %cst_16 : f32 to vector<1x512xf32>
    %48 = arith.select %45, %46, %47 : vector<1x512xi1>, vector<1x512xf32>
    %49 = arith.addf %26, %48 : vector<1x512xf32>
    %c2_i32 = arith.constant 2 : i32
    %50 = vector.broadcast %c2_i32 : i32 to vector<1x512xi32>
    %51 = arith.cmpi sge, %43, %50 : vector<1x512xi32>
    %c2_i32_17 = arith.constant 2 : i32
    %52 = tpu.dynamic_rotate %49 by %c2_i32_17 dim 1 : vector<1x512xf32>, i32 -> vector<1x512xf32>
    %cst_18 = arith.constant 0.000000e+00 : f32
    %53 = vector.broadcast %cst_18 : f32 to vector<1x512xf32>
    %54 = arith.select %51, %52, %53 : vector<1x512xi1>, vector<1x512xf32>
    %55 = arith.addf %49, %54 : vector<1x512xf32>
    %c4_i32 = arith.constant 4 : i32
    %56 = vector.broadcast %c4_i32 : i32 to vector<1x512xi32>
    %57 = arith.cmpi sge, %43, %56 : vector<1x512xi32>
    %c4_i32_19 = arith.constant 4 : i32
    %58 = tpu.dynamic_rotate %55 by %c4_i32_19 dim 1 : vector<1x512xf32>, i32 -> vector<1x512xf32>
    %cst_20 = arith.constant 0.000000e+00 : f32
    %59 = vector.broadcast %cst_20 : f32 to vector<1x512xf32>
    %60 = arith.select %57, %58, %59 : vector<1x512xi1>, vector<1x512xf32>
    %61 = arith.addf %55, %60 : vector<1x512xf32>
    %62 = arith.subf %61, %26 : vector<1x512xf32>
    %63 = math.exp %62 : vector<1x512xf32>
    %64 = arith.mulf %22, %63 : vector<1x512xf32>
    %65 = math.exp %61 : vector<1x512xf32>
    %c0_21 = arith.constant 0 : index
    %c0_22 = arith.constant 0 : index
    %66 = vector.load %arg6[%c0_21, %c0_22] : memref<256x2xf32, #tpu.memory_space<vmem>>, vector<256x2xf32>
    %67 = vector.extract_strided_slice %66 {offsets = [0, 0], sizes = [256, 1], strides = [1, 1]} : vector<256x2xf32> to vector<256x1xf32>
    %68 = vector.extract_strided_slice %66 {offsets = [0, 1], sizes = [4, 1], strides = [1, 1]} : vector<256x2xf32> to vector<4x1xf32>
    %c0_23 = arith.constant 0 : index
    %c0_24 = arith.constant 0 : index
    %69 = vector.load %arg3[%c0_23, %c0_24] : memref<256x40xbf16, #tpu.memory_space<vmem>>, vector<256x40xbf16>
    %c0_25 = arith.constant 0 : index
    %c0_26 = arith.constant 0 : index
    %70 = vector.load %arg1[%c0_25, %c0_26] : memref<40x512xbf16, #tpu.memory_space<vmem>>, vector<40x512xbf16>
    %cst_27 = arith.constant dense<0.000000e+00> : vector<256x512xf32>
    %71 = tpu.matmul %69, %70, %cst_27 {dimension_numbers = #tpu.dot_dimension_numbers<[1], [0], [0], [1], [0, 0, 1, 1], [], []>} : vector<256x40xbf16>, vector<40x512xbf16>, vector<256x512xf32> -> vector<256x512xf32>
    %cst_28 = arith.constant 0.000000e+00 : f32
    %72 = vector.broadcast %cst_28 : f32 to vector<256x512xf32>
    %73 = arith.maximumf %71, %72 : vector<256x512xf32>
    %74 = arith.truncf %73 : vector<256x512xf32> to vector<256x512xbf16>
    %c0_29 = arith.constant 0 : index
    %c0_30 = arith.constant 0 : index
    %75 = vector.load %arg4[%c0_29, %c0_30] : memref<256x256xbf16, #tpu.memory_space<vmem>>, vector<256x256xbf16>
    %cst_31 = arith.constant dense<0.000000e+00> : vector<256x512xf32>
    %76 = tpu.matmul %75, %74, %cst_31 {dimension_numbers = #tpu.dot_dimension_numbers<[1], [0], [0], [1], [0, 0, 1, 1], [], []>} : vector<256x256xbf16>, vector<256x512xbf16>, vector<256x512xf32> -> vector<256x512xf32>
    %77 = vector.broadcast %67 : vector<256x1xf32> to vector<256x512xf32>
    %78 = arith.addf %76, %77 : vector<256x512xf32>
    %cst_32 = arith.constant 0.000000e+00 : f32
    %79 = vector.broadcast %cst_32 : f32 to vector<256x512xf32>
    %80 = arith.maximumf %78, %79 : vector<256x512xf32>
    %c0_33 = arith.constant 0 : index
    %c0_34 = arith.constant 0 : index
    %81 = vector.load %arg5[%c0_33, %c0_34] : memref<4x256xbf16, #tpu.memory_space<vmem>>, vector<4x256xbf16>
    %82 = arith.truncf %80 : vector<256x512xf32> to vector<256x512xbf16>
    %cst_35 = arith.constant dense<0.000000e+00> : vector<4x512xf32>
    %83 = tpu.matmul %81, %82, %cst_35 {dimension_numbers = #tpu.dot_dimension_numbers<[1], [0], [0], [1], [0, 0, 1, 1], [], []>} : vector<4x256xbf16>, vector<256x512xbf16>, vector<4x512xf32> -> vector<4x512xf32>
    %84 = vector.broadcast %68 : vector<4x1xf32> to vector<4x512xf32>
    %85 = arith.addf %83, %84 : vector<4x512xf32>
    %86 = tpu.iota {dimensions = array<i32: 0>} : vector<4x512xi32>
    %c3_i32 = arith.constant 3 : i32
    %87 = vector.broadcast %c3_i32 : i32 to vector<4x512xi32>
    %88 = arith.cmpi slt, %86, %87 : vector<4x512xi32>
    %89 = arith.negf %85 : vector<4x512xf32>
    %90 = math.exp %89 : vector<4x512xf32>
    %cst_36 = arith.constant 1.000000e+00 : f32
    %91 = vector.broadcast %cst_36 : f32 to vector<4x512xf32>
    %92 = arith.addf %91, %90 : vector<4x512xf32>
    %93 = arith.divf %91, %92 : vector<4x512xf32>
    %cst_37 = arith.constant 0.000000e+00 : f32
    %94 = vector.broadcast %cst_37 : f32 to vector<4x512xf32>
    %95 = arith.cmpf oge, %85, %94 : vector<4x512xf32>
    %cst_38 = arith.constant 0.00999999977 : f32
    %96 = vector.broadcast %cst_38 : f32 to vector<4x512xf32>
    %97 = arith.mulf %96, %85 : vector<4x512xf32>
    %98 = arith.select %95, %85, %97 : vector<4x512xi1>, vector<4x512xf32>
    %99 = arith.select %88, %93, %98 : vector<4x512xi1>, vector<4x512xf32>
    %100 = arith.sitofp %43 : vector<1x512xi32> to vector<1x512xf32>
    %101 = vector.broadcast %64 : vector<1x512xf32> to vector<4x512xf32>
    %102 = arith.mulf %101, %99 : vector<4x512xf32>
    %103 = arith.mulf %64, %100 : vector<1x512xf32>
    %104 = tpu.concatenate %102, %103 in 0 : vector<4x512xf32>, vector<1x512xf32> -> vector<5x512xf32>
    %c1_i32_39 = arith.constant 1 : i32
    %105 = vector.broadcast %c1_i32_39 : i32 to vector<1x512xi32>
    %106 = arith.cmpi sge, %43, %105 : vector<1x512xi32>
    %c1_i32_40 = arith.constant 1 : i32
    %107 = tpu.dynamic_rotate %104 by %c1_i32_40 dim 1 : vector<5x512xf32>, i32 -> vector<5x512xf32>
    %cst_41 = arith.constant 0.000000e+00 : f32
    %108 = vector.shape_cast %106 : vector<1x512xi1> to vector<1x512xi1>
    %109 = vector.broadcast %108 : vector<1x512xi1> to vector<5x512xi1>
    %110 = vector.broadcast %cst_41 : f32 to vector<5x512xf32>
    %111 = arith.select %109, %107, %110 : vector<5x512xi1>, vector<5x512xf32>
    %112 = arith.addf %104, %111 : vector<5x512xf32>
    %c2_i32_42 = arith.constant 2 : i32
    %113 = vector.broadcast %c2_i32_42 : i32 to vector<1x512xi32>
    %114 = arith.cmpi sge, %43, %113 : vector<1x512xi32>
    %c2_i32_43 = arith.constant 2 : i32
    %115 = tpu.dynamic_rotate %112 by %c2_i32_43 dim 1 : vector<5x512xf32>, i32 -> vector<5x512xf32>
    %cst_44 = arith.constant 0.000000e+00 : f32
    %116 = vector.shape_cast %114 : vector<1x512xi1> to vector<1x512xi1>
    %117 = vector.broadcast %116 : vector<1x512xi1> to vector<5x512xi1>
    %118 = vector.broadcast %cst_44 : f32 to vector<5x512xf32>
    %119 = arith.select %117, %115, %118 : vector<5x512xi1>, vector<5x512xf32>
    %120 = arith.addf %112, %119 : vector<5x512xf32>
    %c4_i32_45 = arith.constant 4 : i32
    %121 = vector.broadcast %c4_i32_45 : i32 to vector<1x512xi32>
    %122 = arith.cmpi sge, %43, %121 : vector<1x512xi32>
    %c4_i32_46 = arith.constant 4 : i32
    %123 = tpu.dynamic_rotate %120 by %c4_i32_46 dim 1 : vector<5x512xf32>, i32 -> vector<5x512xf32>
    %cst_47 = arith.constant 0.000000e+00 : f32
    %124 = vector.shape_cast %122 : vector<1x512xi1> to vector<1x512xi1>
    %125 = vector.broadcast %124 : vector<1x512xi1> to vector<5x512xi1>
    %126 = vector.broadcast %cst_47 : f32 to vector<5x512xf32>
    %127 = arith.select %125, %123, %126 : vector<5x512xi1>, vector<5x512xf32>
    %128 = arith.addf %120, %127 : vector<5x512xf32>
    %129 = vector.extract_strided_slice %128 {offsets = [0, 0], sizes = [4, 512], strides = [1, 1]} : vector<5x512xf32> to vector<4x512xf32>
    %cst_48 = arith.constant 1.000000e+00 : f32
    %130 = vector.broadcast %cst_48 : f32 to vector<1x512xf32>
    %131 = arith.mulf %65, %130 : vector<1x512xf32>
    %132 = vector.broadcast %131 : vector<1x512xf32> to vector<4x512xf32>
    %133 = arith.addf %129, %132 : vector<4x512xf32>
    %134 = vector.extract_strided_slice %128 {offsets = [4, 0], sizes = [1, 512], strides = [1, 1]} : vector<5x512xf32> to vector<1x512xf32>
    %cst_49 = arith.constant 0.000000e+00 : f32
    %135 = vector.broadcast %cst_49 : f32 to vector<1x512xf32>
    %136 = tpu.concatenate %64, %22, %99, %135, %135, %133, %134, %65, %135, %135 in 0 : vector<1x512xf32>, vector<1x512xf32>, vector<4x512xf32>, vector<1x512xf32>, vector<1x512xf32>, vector<4x512xf32>, vector<1x512xf32>, vector<1x512xf32>, vector<1x512xf32>, vector<1x512xf32> -> vector<16x512xf32>
    %c0_50 = arith.constant 0 : index
    %c0_51 = arith.constant 0 : index
    %137 = vector.load %arg7[%c0_50, %c0_51] : memref<16x512xf32, #tpu.memory_space<vmem>>, vector<16x512xf32>
    tpu.vector_store %arg7[%c0_50, %c0_51], %136 {strides = array<i32>} : memref<16x512xf32, #tpu.memory_space<vmem>>, vector<16x512xf32>,
    return
  }
  func.func @transform_0(%arg0: i32) -> (i32, i32) {
    %c0_i32 = arith.constant 0 : i32
    %c0_i32_0 = arith.constant 0 : i32
    return %c0_i32, %arg0 : i32, i32
  }
  func.func @transform_1(%arg0: i32) -> (i32, i32) {
    %c0_i32 = arith.constant 0 : i32
    %c0_i32_0 = arith.constant 0 : i32
    return %c0_i32, %arg0 : i32, i32
  }
  func.func @transform_2(%arg0: i32) -> (i32, i32) {
    %c0_i32 = arith.constant 0 : i32
    %c0_i32_0 = arith.constant 0 : i32
    %c0_i32_1 = arith.constant 0 : i32
    return %c0_i32, %c0_i32_0 : i32, i32
  }
  func.func @transform_3(%arg0: i32) -> (i32, i32) {
    %c0_i32 = arith.constant 0 : i32
    %c0_i32_0 = arith.constant 0 : i32
    %c0_i32_1 = arith.constant 0 : i32
    return %c0_i32, %c0_i32_0 : i32, i32
  }
  func.func @transform_4(%arg0: i32) -> (i32, i32) {
    %c0_i32 = arith.constant 0 : i32
    %c0_i32_0 = arith.constant 0 : i32
    %c0_i32_1 = arith.constant 0 : i32
    return %c0_i32, %c0_i32_0 : i32, i32
  }
  func.func @transform_5(%arg0: i32) -> (i32, i32) {
    %c0_i32 = arith.constant 0 : i32
    %c0_i32_0 = arith.constant 0 : i32
    %c0_i32_1 = arith.constant 0 : i32
    return %c0_i32, %c0_i32_0 : i32, i32
  }
  func.func @transform_6(%arg0: i32) -> (i32, i32) {
    %c0_i32 = arith.constant 0 : i32
    %c0_i32_0 = arith.constant 0 : i32
    return %c0_i32, %arg0 : i32, i32
  }
}

</mosaic_0001>

<bundles_post_ra>
// kernel: dvgo_vm_forward.1
= control target key start
LH: loop header
LB: loop body
LE: loop exit
PB: predicated region body
PF: predicated region fallthrough
CT: control target
= control target key end

     0   :  { %s3223_s21 = smov 0   ;;  %s3225_s22 = smov 0   ;;  %s4702_s0 = inlined_call_operand.vmem [shape: bf16[40,1024], index: 0, kind: input, shape index: {}]   ;;  %s4703_s1 = inlined_call_operand.vmem [shape: f32[2,1024], index: 1, kind: input, shape index: {}]   ;;  %s4704_s2 = inlined_call_operand.vmem [shape: bf16[256,40], index: 2, kind: input, shape index: {}]   ;;  %s4705_s3 = inlined_call_operand.vmem [shape: bf16[256,256], index: 3, kind: input, shape index: {}]   ;;  %s4706_s4 = inlined_call_operand.vmem [shape: bf16[4,256], index: 4, kind: input, shape index: {}]   ;;  %s4707_s5 = inlined_call_operand.vmem [shape: f32[256,2], index: 5, kind: input, shape index: {}]   ;;  %s4708_s6 = inlined_call_operand.vmem [shape: f32[16,1024], index: 6, kind: output, shape index: {}]  }
   0x1   :  { %s3227_s23 = smov 0  }
   0x2 LB: > { %s3239_s24 = sadd.s32 4294967295, %s3180_s23   ;;  %s3242_s25 = sadd.s32 1, %s3180_s23   ;;  %s3180_s23 = sphi %s3227_s23, %s5042_s23   ;;  %s3176_s22 = sphi %s3225_s22, %s5041_s22   ;;  %s3172_s21 = sphi %s3223_s21, %s5040_s21  }
   0x3   : > { %s20_s26 = ssub.s32 %s3180_s23, %s3242_s25  ;;  %s23_s27 = sadd.s32 1, %s3176_s22 }
   0x4   : > { %p21_p0 = scmp.eq.s32.totalorder %s20_s26, 0  ;;  %p30_p1 = scmp.ne.s32.totalorder %s3176_s22, %s3172_s21 }
   0x5   : > { %p31_p2 = scmp.eq.s32.totalorder %s3180_s23, 0  ;;  %p170_p3 = scmp.eq.s32.totalorder %s3239_s24, 1 }
   0x6   : > { %s3252_s28 = scalar_select %p21_p0, %s3176_s22, %s23_s27  }
   0x7   : > { %p32_p4 = por %p31_p2, %p30_p1  ;;  %p3254_p5 = por %p170_p3, %p30_p1 }
   0x8   : > { %p2902_p6 = scmp.ge.s32.totalorder %s3180_s23, 2 }
   0xa   : > { %204 = sbr.rel (%p2902_p6) target bundleno = 24 (0x18), region = 32 }
   0xf   : > { %207 = sbr.rel (!%p32_p4) target bundleno = 24 (0x18), region = 36  ;;  %s209_s30 = sand.u32 (%p32_p4), 1, %s3176_s22  }
  0x10   : > { %s3014_s7 = sshll.u32 (%p32_p4), %s3180_s23, 4  ;;  %s3016_s8 = smul.u32 (%p32_p4), 80, %s209_s30 }
  0x11   : > { %s214_s11 = scalar_lea.vmem (%p32_p4), %s4702_s0, %s3014_s7 }
  0x12   : > { %v227_v0 = vld [vmem:[%s214_s11] sm:$0xff] (%p32_p4)  ;;  %v229_v1 = vld [vmem:[%s214_s11 + $0x8] sm:$0xff] (%p32_p4)  ;;  %s211_s12 = scalar_lea.vmem (%p32_p4), [#allocation2], %s3016_s8 }
  0x13   : > { %v231_v2 = vld [vmem:[%s214_s11 + $0x20] sm:$0xff] (%p32_p4)  ;;  %v233_v3 = vld [vmem:[%s214_s11 + $0x28] sm:$0xff] (%p32_p4)  ;;  %228 = vst [vmem:[%s211_s12] sm:$0xff] (%p32_p4), %v227_v0  ;;  %230 = vst [vmem:[%s211_s12 + $0x8] sm:$0xff] (%p32_p4), %v229_v1 }
  0x14   : > { %v235_v4 = vld [vmem:[%s214_s11 + $0x40] sm:$0xff]  ;;  %v237_v5 = vld [vmem:[%s214_s11 + $0x48] sm:$0xff]  ;;  %232 = vst [vmem:[%s211_s12 + $0x10] sm:$0xff] %v231_v2  ;;  %234 = vst [vmem:[%s211_s12 + $0x18] sm:$0xff] %v233_v3 }
  0x15   : > { %236 = vst [vmem:[%s211_s12 + $0x20] sm:$0xff] %v235_v4  ;;  %238 = vst [vmem:[%s211_s12 + $0x28] sm:$0xff] %v237_v5  ;;  %v239_v6 = vld [vmem:[%s214_s11 + $0x60] sm:$0xff]  ;;  %v241_v7 = vld [vmem:[%s214_s11 + $0x68] sm:$0xff] }
  0x16   : > { %v243_v8 = vld [vmem:[%s214_s11 + $0x80] sm:$0xff]  ;;  %240 = vst [vmem:[%s211_s12 + $0x30] sm:$0xff] %v239_v6  ;;  %242 = vst [vmem:[%s211_s12 + $0x38] sm:$0xff] %v241_v7  ;;  %v245_v9 = vld [vmem:[%s214_s11 + $0x88] sm:$0xff] }
  0x17   : > { %244 = vst [vmem:[%s211_s12 + $0x40] sm:$0xff] %v243_v8  ;;  %246 = vst [vmem:[%s211_s12 + $0x48] sm:$0xff] %v245_v9 }
  0x18 PF: > { %p2905_p7 = scmp.ge.s32.totalorder %s3180_s23, 1  ;;  %p260_p8 = scmp.lt.s32.totalorder %s3180_s23, 3 }
  0x1a   : > { %p261_p9 = pnand %p2905_p7, %p260_p8 }
  0x1c   : > { %264 = sbr.rel (%p261_p9) target bundleno = 1379 (0x563), region = 63 }
  0x21   : > { %s267_s13 = sand.u32 1, %s3172_s21   ;;  %v3182_v10 = vmov 0   ;;  %vm857_vm0 = vcmask 1043456   ;;  %v3067_v27 = vld [vmem:[%s4704_s2] sm:$0xff]   ;;  %vm808_vm1 = vcmask 326656   ;;  %v3068_v28 = vld [vmem:[%s4704_s2 + $0x8] sm:$0xff]  }
  0x22   : > { %s3017_s14 = smul.u32 80, %s267_s13  ;;  %902 = vmatprep.mubr.bf16.mxu0 %v3182_v10  ;;  %1095 = vmatprep.mubr.bf16.mxu1 %v3182_v10  ;;  %v3069_v29 = vld [vmem:[%s4704_s2 + $0x10] sm:$0xff]   ;;  %v3070_v30 = vld [vmem:[%s4704_s2 + $0x18] sm:$0xff]   ;;  %v3071_v31 = vld [vmem:[%s4704_s2 + $0x20] sm:$0xff]   ;;  %s2907_s20 = sshll.u32 %s3239_s24, 2 }
  0x23   : > { %3049 = vset.pattern.permute.xlu1 %v3182_v10  ;;  %3048 = vset.pattern.permute.xlu0 %v3182_v10  ;;  %v3072_v32 = vld [vmem:[%s4704_s2 + $0x28] sm:$0xff]   ;;  %v3073_v33 = vld [vmem:[%s4704_s2 + $0x30] sm:$0xff]   ;;  %v616_v35 = vld [vmem:[%s4707_s5 + $0x60] sm:$0xff]  ;;  %p302_p10 = scmp.lt.s32.totalorder %s2907_s20, 7  ;;  %s3187_s12 = smov 4  }
  0x24   : > { %s269_s15 = scalar_lea.vmem [#allocation2], %s3017_s14  ;;  %v618_v34 = vld [vmem:[%s4707_s5 + $0x70] sm:$0xff]  ;;  %1542 = vperm.xlu1 %3049, %v616_v35   ;;  %v619_v36 = vld [vmem:[%s4707_s5 + $0x78] sm:$0xff]  ;;  %v617_v37 = vld [vmem:[%s4707_s5 + $0x68] sm:$0xff] }
  0x25   : > { %v676_v11 = vld [vmem:[%s269_s15 + $0x40] sm:$0xff]  ;;  %v677_v12 = vld [vmem:[%s269_s15 + $0x48] sm:$0xff]  ;;  %1552 = vperm.xlu0 %3048, %v618_v34   ;;  %s5044_s20 = smov (!%p302_p10, %s2907_s20), 7 }
  0x26   : > { %v2935_v13 = vcombine.high %v676_v11, %v676_v11  ;;  %v2937_v14 = vcombine.high %v677_v12, %v677_v12  ;;  %v2934_v15 = vcombine.low %v676_v11, %v676_v11  ;;  %v2936_v16 = vcombine.low %v677_v12, %v677_v12  ;;  %v3055_v17 = vld [vmem:[%s269_s15 + $0x24] ss:$16 sps:$4 sm:$0xff]   ;;  %v3057_v18 = vld [vmem:[%s269_s15 + $0x2c] ss:$16 sps:$4 sm:$0xff]   ;;  %v3059_v21 = vld [vmem:[%s269_s15 + $0x20] ss:$16 sps:$4 sm:$0xff]  }
  0x27   : > { %v3060_v22 = vld [vmem:[%s269_s15 + $0x28] ss:$16 sps:$4 sm:$0xff]   ;;  %v3061_v23 = vld [vmem:[%s269_s15 + $0x4] ss:$16 sps:$4 sm:$0xff]   ;;  %v3063_v24 = vld [vmem:[%s269_s15 + $0xc] ss:$16 sps:$4 sm:$0xff]  }
  0x28   : > { %2938 = vmatprep.subr.msk.bf16.mxu0 %vm857_vm0, %v2935_v13  ;;  %2955 = vmatprep.subr.msk.bf16.mxu1 %vm857_vm0, %v2937_v14  ;;  %v859_v19 = vsel %vm857_vm0, %v2934_v15, 0  ;;  %v865_v20 = vsel %vm857_vm0, %v2936_v16, 0  ;;  %v3065_v25 = vld [vmem:[%s269_s15] ss:$16 sps:$4 sm:$0xff]   ;;  %v3066_v26 = vld [vmem:[%s269_s15 + $0x8] ss:$16 sps:$4 sm:$0xff]  }
  0x29   : > { %881 = vmatpush1.bf16.msra.mxu0 %v859_v19  ;;  %1074 = vmatpush1.bf16.msra.mxu1 %v865_v20  ;;  %v3074_v38 = vld [vmem:[%s4704_s2 + $0x38] sm:$0xff]   ;;  %v614_v40 = vld [vmem:[%s4707_s5 + $0x50] sm:$0xff]  ;;  %v613_v41 = vld [vmem:[%s4707_s5 + $0x48] sm:$0xff]  ;;  %s2908_s14 = sshll.u32 %s5044_s20, 1  ;;  %s3185_s20 = smov 2  }
  0x2a   : > { %882 = vmatprep.subr.bf16.mxu0 %v3055_v17  ;;  %1075 = vmatprep.subr.bf16.mxu1 %v3057_v18  ;;  %v615_v39 = vld [vmem:[%s4707_s5 + $0x58] sm:$0xff]  ;;  %v612_v42 = vld [vmem:[%s4707_s5 + $0x40] sm:$0xff]  ;;  %v610_v45 = vld [vmem:[%s4707_s5 + $0x30] sm:$0xff]  ;;  %s3391_s17 = scalar_lea.vmem %s4703_s1, %s2908_s14  ;;  %s2906_s14 = sshll.u32 %s267_s13, 6 }
  0x2b   : > { %1557 = vperm.xlu0 %3048, %v619_v36   ;;  %1547 = vperm.xlu1 %3049, %v617_v37   ;;  %v3075_v43 = vld [vmem:[%s4704_s2 + $0x40] sm:$0xff]   ;;  %v611_v44 = vld [vmem:[%s4707_s5 + $0x38] sm:$0xff]  ;;  %v609_v46 = vld [vmem:[%s4707_s5 + $0x28] sm:$0xff]  ;;  %s4574_s21 = scalar_lea.vmem [#allocation3], %s2906_s14  ;;  %s3015_s13 = sshll.u32 (%p3254_p5), %s3239_s24, 5 }
  0x2c   : > { %v608_v47 = vld [vmem:[%s4707_s5 + $0x20] sm:$0xff]  ;;  %v3076_v48 = vld [vmem:[%s4704_s2 + $0x48] sm:$0xff]   ;;  %v607_v49 = vld [vmem:[%s4707_s5 + $0x18] sm:$0xff] }
  0x2d   : > { %883 = vmatpush1.bf16.msra.mxu0 %v3059_v21  ;;  %1076 = vmatpush1.bf16.msra.mxu1 %v3060_v22  ;;  %v606_v50 = vld [vmem:[%s4707_s5 + $0x10] sm:$0xff]  ;;  %v309_v51 = vld [vmem:[%s3391_s17] ss:$2 sm:$0xf]  ;;  %v605_v53 = vld [vmem:[%s4707_s5 + $0x8] sm:$0xff]  ;;  %v4709_v21 = vlaneseq }
  0x2e   : > { %884 = vmatprep.subr.bf16.mxu0 %v3061_v23  ;;  %1077 = vmatprep.subr.bf16.mxu1 %v3063_v24  ;;  %v3396_v52 = vadd.f32 -4.59512, %v309_v51  ;;  %v604_v54 = vld [vmem:[%s4707_s5] sm:$0xff]  ;;  %v3077_v55 = vld [vmem:[%s4704_s2 + $0x50] sm:$0xff]   ;;  %v635_v58 = vld [vmem:[%s4707_s5 + $0xf8] sm:$0xff] }
  0x2f   : > { %1537 = vperm.xlu1 %3049, %v615_v39   ;;  %1532 = vperm.xlu0 %3048, %v614_v40   ;;  %v634_v59 = vld [vmem:[%s4707_s5 + $0xf0] sm:$0xff]  ;;  %v633_v61 = vld [vmem:[%s4707_s5 + $0xe8] sm:$0xff]  ;;  %v632_v62 = vld [vmem:[%s4707_s5 + $0xe0] sm:$0xff]  ;;  %v3490_v23 = vshrl.u32 %v4709_v21, 7 }
  0x30   : > { %v315_v56 = vand.u32 2147483647, %v3396_v52  ;;  %v3078_v63 = vld [vmem:[%s4704_s2 + $0x58] sm:$0xff]   ;;  %v630_v1 = vld [vmem:[%s4707_s5 + $0xd0] sm:$0xff]  ;;  %v629_v2 = vld [vmem:[%s4707_s5 + $0xc8] sm:$0xff]  ;;  %v314_v19 = vmax.f32 %v3396_v52, 0.0 }
  0x31   : > { %885 = vmatpush1.bf16.msra.mxu0 %v3065_v25  ;;  %1078 = vmatpush1.bf16.msra.mxu1 %v3066_v26  ;;  %v631_v0 = vld [vmem:[%s4707_s5 + $0xd8] sm:$0xff]  ;;  %v628_v3 = vld [vmem:[%s4707_s5 + $0xc0] sm:$0xff]  ;;  %v626_v7 = vld [vmem:[%s4707_s5 + $0xb0] sm:$0xff]  ;;  %4790 = vst [vmem:[#allocation4_spill] sm:$0xff] %v3490_v23 }
  0x32   : > { %v316_v57 = vsub.f32 0.0, %v315_v56  ;;  %v3079_v4 = vld [vmem:[%s4704_s2 + $0x60] sm:$0xff]   ;;  %v627_v6 = vld [vmem:[%s4707_s5 + $0xb8] sm:$0xff]  ;;  %v625_v9 = vld [vmem:[%s4707_s5 + $0xa8] sm:$0xff] }
  0x33   : > { %1527 = vperm.xlu1 %3049, %v613_v41   ;;  %1522 = vperm.xlu0 %3048, %v612_v42   ;;  %v624_v11 = vld [vmem:[%s4707_s5 + $0xa0] sm:$0xff]  ;;  %v3080_v12 = vld [vmem:[%s4704_s2 + $0x68] sm:$0xff]   ;;  %v623_v13 = vld [vmem:[%s4707_s5 + $0x98] sm:$0xff] }
  0x34   : > { %2939 = vmatmul.mubr.msk.bf16.vlgmr.msra.gmra.mxu0 %vm808_vm1, %v3067_v27  ;;  %2956 = vmatmul.mubr.msk.bf16.vlgmr.msra.gmra.mxu1 %vm808_vm1, %v3067_v27  ;;  %v317_v60 = vmul.f32 1.442695, %v316_v57  ;;  %v622_v14 = vld [vmem:[%s4707_s5 + $0x90] sm:$0xff]  ;;  %v621_v15 = vld [vmem:[%s4707_s5 + $0x88] sm:$0xff]  ;;  %v620_v16 = vld [vmem:[%s4707_s5 + $0x80] sm:$0xff]  ;;  %v3497_v27 = vsub.s32 1, %v3490_v23 }
  0x35   : > { %912 = vmatprep.mubr.bf16.mxu0 %v3182_v10  ;;  %1105 = vmatprep.mubr.bf16.mxu1 %v3182_v10  ;;  %v3081_v17 = vld [vmem:[%s4704_s2 + $0x70] sm:$0xff]   ;;  %v3082_v24 = vld [vmem:[%s4704_s2 + $0x78] sm:$0xff]   ;;  %v2909_v25 = vld [vmem:[%s3391_s17 + $0x1] ss:$2 sm:$0xf]  ;;  %s3183_s17 = smov 1  }
  0x36   : > { %3131 = vpow2.f32 %v317_v60  ;;  %vm312_vm2 = vcmp.gt.f32.partialorder %v2909_v25, 0.0  ;;  %4791 = vst [vmem:[#allocation5_spill] sm:$0xff] %v3497_v27  ;;  %v3085_v21 = vld [vmem:[%s4705_s3 + $0x4] ss:$8 sps:$4 sm:$0xff]  }
  0x37   : > { %1517 = vperm.xlu1 %3049, %v611_v44   ;;  %1512 = vperm.xlu0 %3048, %v610_v45  }
  0x3b   : > { %1507 = vperm.xlu1 %3049, %v609_v46   ;;  %1502 = vperm.xlu0 %3048, %v608_v47  }
  0x3c   : > { %2940 = vmatmul.mubr.msk.bf16.gmra.mxu0 %vm808_vm1, %v3068_v28  ;;  %2957 = vmatmul.mubr.msk.bf16.gmra.mxu1 %vm808_vm1, %v3068_v28  ;;  %v3500_v28 = vsub.s32 0, %v3490_v23 }
  0x3d   : > { %922 = vmatprep.mubr.bf16.mxu0 %v3182_v10  ;;  %1115 = vmatprep.mubr.bf16.mxu1 %v3182_v10 }
  0x3e   : > { %4792 = vst [vmem:[#allocation6_spill] sm:$0xff] %v3500_v28 }
  0x3f   : > { %1497 = vperm.xlu1 %3049, %v607_v49   ;;  %1492 = vperm.xlu0 %3048, %v606_v50  }
  0x43   : > { %1487 = vperm.xlu1 %3049, %v605_v53   ;;  %1482 = vperm.xlu0 %3048, %v604_v54   ;;  %v3132_v5 = vpop.eup %3131 }
  0x44   : > { %2941 = vmatmul.mubr.msk.bf16.gmra.mxu0 %vm808_vm1, %v3069_v29  ;;  %2958 = vmatmul.mubr.msk.bf16.gmra.mxu1 %vm808_vm1, %v3069_v29  ;;  %v319_v8 = vadd.f32 1.0, %v3132_v5 }
  0x45   : > { %932 = vmatprep.mubr.bf16.mxu0 %v3182_v10  ;;  %1125 = vmatprep.mubr.bf16.mxu1 %v3182_v10 }
  0x46   : > { %3133 = vlog2.f32 %v319_v8 }
  0x47   : > { %1637 = vperm.xlu1 %3049, %v635_v58   ;;  %1632 = vperm.xlu0 %3048, %v634_v59  }
  0x4b   : > { %1627 = vperm.xlu1 %3049, %v633_v61   ;;  %1622 = vperm.xlu0 %3048, %v632_v62  }
  0x4c   : > { %2942 = vmatmul.mubr.msk.bf16.gmra.mxu0 %vm808_vm1, %v3070_v30  ;;  %2959 = vmatmul.mubr.msk.bf16.gmra.mxu1 %vm808_vm1, %v3070_v30 }
  0x4d   : > { %942 = vmatprep.mubr.bf16.mxu0 %v3182_v10  ;;  %1135 = vmatprep.mubr.bf16.mxu1 %v3182_v10 }
  0x4f   : > { %1617 = vperm.xlu1 %3049, %v631_v0   ;;  %1612 = vperm.xlu0 %3048, %v630_v1  }
  0x53   : > { %1607 = vperm.xlu1 %3049, %v629_v2   ;;  %1602 = vperm.xlu0 %3048, %v628_v3   ;;  %v3134_v18 = vpop.eup %3133 }
  0x54   : > { %2943 = vmatmul.mubr.msk.bf16.gmra.mxu0 %vm808_vm1, %v3071_v31  ;;  %2960 = vmatmul.mubr.msk.bf16.gmra.mxu1 %vm808_vm1, %v3071_v31  ;;  %v321_v20 = vmul.f32 0.6931472, %v3134_v18  ;;  %v3514_v31 = vsub.s32 3, %v3490_v23 }
  0x55   : > { %952 = vmatprep.mubr.bf16.mxu0 %v3182_v10  ;;  %1145 = vmatprep.mubr.bf16.mxu1 %v3182_v10 }
  0x56   : > { %v322_v22 = vadd.f32 %v321_v20, %v314_v19  ;;  %4794 = vst [vmem:[#allocation8_spill] sm:$0xff] %v3514_v31 }
  0x57   : > { %1597 = vperm.xlu1 %3049, %v627_v6   ;;  %1592 = vperm.xlu0 %3048, %v626_v7  }
  0x58   : > { %v323_v26 = vmul.f32 -0.5, %v322_v22 }
  0x5a   : > { %v324_v35 = vmul.f32 1.442695, %v323_v26 }
  0x5b   : > { %1587 = vperm.xlu1 %3049, %v625_v9   ;;  %1582 = vperm.xlu0 %3048, %v624_v11  }
  0x5c   : > { %2944 = vmatmul.mubr.msk.bf16.gmra.mxu0 %vm808_vm1, %v3072_v32  ;;  %2961 = vmatmul.mubr.msk.bf16.gmra.mxu1 %vm808_vm1, %v3072_v32  ;;  %v3517_v32 = vsub.s32 2, %v3490_v23  ;;  %3135 = vpow2.f32 %v324_v35 }
  0x5d   : > { %962 = vmatprep.mubr.bf16.mxu0 %v3182_v10  ;;  %1155 = vmatprep.mubr.bf16.mxu1 %v3182_v10 }
  0x5e   : > { %4795 = vst [vmem:[#allocation9_spill] sm:$0xff] %v3517_v32 }
  0x5f   : > { %1577 = vperm.xlu1 %3049, %v623_v13   ;;  %1572 = vperm.xlu0 %3048, %v622_v14  }
  0x63   : > { %1567 = vperm.xlu1 %3049, %v621_v15   ;;  %1562 = vperm.xlu0 %3048, %v620_v16  }
  0x64   : > { %2945 = vmatmul.mubr.msk.bf16.gmra.mxu0 %vm808_vm1, %v3073_v33  ;;  %2962 = vmatmul.mubr.msk.bf16.gmra.mxu1 %vm808_vm1, %v3073_v33 }
  0x65   : > { %972 = vmatprep.mubr.bf16.mxu0 %v3182_v10  ;;  %1165 = vmatprep.mubr.bf16.mxu1 %v3182_v10 }
  0x69   : > { %v3136_v36 = vpop.eup %3135 }
  0x6a   : > { %v326_v37 = vsub.f32 1.0, %v3136_v36 }
  0x6c   : > { %2946 = vmatmul.mubr.msk.bf16.gmra.mxu0 %vm808_vm1, %v3074_v38  ;;  %2963 = vmatmul.mubr.msk.bf16.gmra.mxu1 %vm808_vm1, %v3074_v38  ;;  %v3526_v38 = vsel %vm312_vm2, %v326_v37, 0.0 }
  0x6d   : > { %982 = vmatprep.mubr.bf16.mxu0 %v3182_v10  ;;  %1175 = vmatprep.mubr.bf16.mxu1 %v3182_v10  ;;  %4796 = vst [vmem:[#allocation10_spill] sm:$0xff] %v3526_v38 }
  0x74   : > { %2947 = vmatmul.mubr.msk.bf16.gmra.mxu0 %vm808_vm1, %v3075_v43  ;;  %2964 = vmatmul.mubr.msk.bf16.gmra.mxu1 %vm808_vm1, %v3075_v43 }
  0x75   : > { %992 = vmatprep.mubr.bf16.mxu0 %v3182_v10  ;;  %1185 = vmatprep.mubr.bf16.mxu1 %v3182_v10 }
  0x7c   : > { %2948 = vmatmul.mubr.msk.bf16.gmra.mxu0 %vm808_vm1, %v3076_v48  ;;  %2965 = vmatmul.mubr.msk.bf16.gmra.mxu1 %vm808_vm1, %v3076_v48 }
  0x7d   : > { %1002 = vmatprep.mubr.bf16.mxu0 %v3182_v10  ;;  %1195 = vmatprep.mubr.bf16.mxu1 %v3182_v10 }
  0x84   : > { %2949 = vmatmul.mubr.msk.bf16.gmra.mxu0 %vm808_vm1, %v3077_v55  ;;  %2966 = vmatmul.mubr.msk.bf16.gmra.mxu1 %vm808_vm1, %v3077_v55 }
  0x85   : > { %1012 = vmatprep.mubr.bf16.mxu0 %v3182_v10  ;;  %1205 = vmatprep.mubr.bf16.mxu1 %v3182_v10 }
  0x8c   : > { %2950 = vmatmul.mubr.msk.bf16.gmra.mxu0 %vm808_vm1, %v3078_v63  ;;  %2967 = vmatmul.mubr.msk.bf16.gmra.mxu1 %vm808_vm1, %v3078_v63 }
  0x8d   : > { %1022 = vmatprep.mubr.bf16.mxu0 %v3182_v10  ;;  %1215 = vmatprep.mubr.bf16.mxu1 %v3182_v10 }
  0x94   : > { %2951 = vmatmul.mubr.msk.bf16.gmra.mxu0 %vm808_vm1, %v3079_v4  ;;  %2968 = vmatmul.mubr.msk.bf16.gmra.mxu1 %vm808_vm1, %v3079_v4 }
  0x95   : > { %1032 = vmatprep.mubr.bf16.mxu0 %v3182_v10  ;;  %1225 = vmatprep.mubr.bf16.mxu1 %v3182_v10 }
  0x9c   : > { %2952 = vmatmul.mubr.msk.bf16.gmra.mxu0 %vm808_vm1, %v3080_v12  ;;  %2969 = vmatmul.mubr.msk.bf16.gmra.mxu1 %vm808_vm1, %v3080_v12 }
  0x9d   : > { %1042 = vmatprep.mubr.bf16.mxu0 %v3182_v10  ;;  %1235 = vmatprep.mubr.bf16.mxu1 %v3182_v10 }
  0x9f   : > { %v3530_v40 = vpop.permute.xlu1 %1542 }
  0xa0   : > { %v3528_v39 = vpop.permute.xlu0 %1552  ;;  %4798 = vst [vmem:[#allocation12_spill] sm:$0xff] %v3530_v40 }
  0xa1   : > { %4797 = vst [vmem:[#allocation11_spill] sm:$0xff] %v3528_v39 }
  0xa4   : > { %2953 = vmatmul.mubr.msk.bf16.gmra.mxu0 %vm808_vm1, %v3081_v17  ;;  %2970 = vmatmul.mubr.msk.bf16.gmra.mxu1 %vm808_vm1, %v3081_v17 }
  0xa5   : > { %1052 = vmatprep.mubr.bf16.mxu0 %v3182_v10  ;;  %1245 = vmatprep.mubr.bf16.mxu1 %v3182_v10  ;;  %v3503_v10 = vsel %vm312_vm2, %v323_v26, 0.0 }
  0xa6   : > { %4793 = vst [vmem:[#allocation7_spill] sm:$0xff] %v3503_v10  ;;  %v394_v29 = vrot.slane %v3503_v10, %v3497_v27  ;;  %v390_v30 = vrot.slane %v3503_v10, %v3500_v28  ;;  %v402_v33 = vrot.slane %v3503_v10, %v3514_v31  ;;  %v398_v34 = vrot.slane %v3503_v10, %v3517_v32  ;;  %v3532_v41 = vpop.permute.xlu0 %1557  ;;  %v3534_v42 = vpop.permute.xlu1 %1547 }
  0xa7   : > { %4799 = vst [vmem:[#allocation13_spill] sm:$0xff] %v3532_v41  ;;  %4800 = vst [vmem:[#allocation14_spill] sm:$0xff] %v3534_v42 }
  0xa8   : > { %409 = vrot.lane.b32.xlu1 %v394_v29, %s3183_s17  ;;  %407 = vrot.lane.b32.xlu0 %v390_v30, %s3183_s17 }
  0xaa   : > { %v3536_v43 = vpop.permute.xlu1 %1537  ;;  %v3538_v44 = vpop.permute.xlu0 %1532 }
  0xab   : > { %4801 = vst [vmem:[#allocation15_spill] sm:$0xff] %v3536_v43  ;;  %4802 = vst [vmem:[#allocation16_spill] sm:$0xff] %v3538_v44 }
  0xac   : > { %2954 = vmatmul.mubr.msk.bf16.gmra.mxu0 %vm808_vm1, %v3082_v24  ;;  %2971 = vmatmul.mubr.msk.bf16.gmra.mxu1 %vm808_vm1, %v3082_v24 }
  0xad   : > { %413 = vrot.lane.b32.xlu1 %v402_v33, %s3183_s17  ;;  %411 = vrot.lane.b32.xlu0 %v398_v34, %s3183_s17 }
  0xae   : > { %v3540_v45 = vpop.permute.xlu1 %1527  ;;  %v3542_v46 = vpop.permute.xlu0 %1522  ;;  %1832 = vmatprep.mubr.bf16.mxu0 %v3085_v21  ;;  %2025 = vmatprep.mubr.bf16.mxu1 %v3085_v21 }
  0xaf   : > { %4803 = vst [vmem:[#allocation17_spill] sm:$0xff] %v3540_v45  ;;  %4804 = vst [vmem:[#allocation18_spill] sm:$0xff] %v3542_v46 }
  0xb2   : > { %v3544_v47 = vpop.permute.xlu1 %1517  ;;  %v3546_v48 = vpop.permute.xlu0 %1512 }
  0xb3   : > { %4805 = vst [vmem:[#allocation19_spill] sm:$0xff] %v3544_v47  ;;  %4806 = vst [vmem:[#allocation20_spill] sm:$0xff] %v3546_v48 }
  0xb6   : > { %v3548_v51 = vpop.permute.xlu1 %1507  ;;  %v3550_v52 = vpop.permute.xlu0 %1502 }
  0xb7   : > { %4807 = vst [vmem:[#allocation21_spill] sm:$0xff] %v3548_v51  ;;  %4808 = vst [vmem:[#allocation22_spill] sm:$0xff] %v3550_v52 }
  0xba   : > { %v3556_v61 = vpop.permute.xlu1 %1497  ;;  %v3558_v62 = vpop.permute.xlu0 %1492 }
  0xbb   : > { %4811 = vst [vmem:[#allocation25_spill] sm:$0xff] %v3556_v61  ;;  %4812 = vst [vmem:[#allocation26_spill] sm:$0xff] %v3558_v62 }
  0xbe   : > { %v3568_v5 = vpop.permute.xlu1 %1487  ;;  %v3570_v6 = vpop.permute.xlu0 %1482 }
  0xbf   : > { %4817 = vst [vmem:[#allocation31_spill] sm:$0xff] %v3568_v5  ;;  %4818 = vst [vmem:[#allocation32_spill] sm:$0xff] %v3570_v6 }
  0xc2   : > { %v3576_v16 = vpop.permute.xlu1 %1637  ;;  %v3578_v17 = vpop.permute.xlu0 %1632 }
  0xc3   : > { %4821 = vst [vmem:[#allocation35_spill] sm:$0xff] %v3576_v16  ;;  %4822 = vst [vmem:[#allocation36_spill] sm:$0xff] %v3578_v17 }
  0xc6   : > { %v3592_v26 = vpop.permute.xlu1 %1627  ;;  %v3594_v29 = vpop.permute.xlu0 %1622 }
  0xc7   : > { %4828 = vst [vmem:[#allocation42_spill] sm:$0xff] %v3592_v26  ;;  %4829 = vst [vmem:[#allocation43_spill] sm:$0xff] %v3594_v29 }
  0xca   : > { %v3604_v36 = vpop.permute.xlu1 %1617  ;;  %v3606_v37 = vpop.permute.xlu0 %1612 }
  0xcb   : > { %4831 = vst [vmem:[#allocation45_spill] sm:$0xff] %v3604_v36  ;;  %4832 = vst [vmem:[#allocation46_spill] sm:$0xff] %v3606_v37 }
  0xf4   : > { %v904_v49 = vpop.f32.mrf.mxu0  ;;  %v1097_v50 = vpop.f32.mrf.mxu1 }
  0xf5   : > { %v1258_v55 = vmax.f32 %v1097_v50, 0.0  ;;  %v1256_v58 = vmax.f32 %v904_v49, 0.0 }
  0xf6   : > { %v3552_v53 = vpop.f32.mrf.mxu0  ;;  %v3554_v54 = vpop.f32.mrf.mxu1 }
  0xf7   : > { %4809 = vst [vmem:[#allocation23_spill] sm:$0xff] %v3552_v53  ;;  %4810 = vst [vmem:[#allocation24_spill] sm:$0xff] %v3554_v54 }
  0xf8   : > { %v908_v56 = vpop.f32.mrf.mxu0  ;;  %v1101_v57 = vpop.f32.mrf.mxu1 }
  0xf9   : > { %v1260_v59 = vmax.f32 %v908_v56, 0.0  ;;  %v1262_v60 = vmax.f32 %v1101_v57, 0.0  ;;  %v3616_v57 = vpop.permute.xlu1 %1607 }
  0xfa   : > { %v3560_v63 = vpop.f32.mrf.mxu0  ;;  %v3562_v0 = vpop.f32.mrf.mxu1  ;;  %4836 = vst [vmem:[#allocation50_spill] sm:$0xff] %v3616_v57 }
  0xfb   : > { %4813 = vst [vmem:[#allocation27_spill] sm:$0xff] %v3560_v63  ;;  %4814 = vst [vmem:[#allocation28_spill] sm:$0xff] %v3562_v0  ;;  %v3564_v1 = vpack.c.bf16 %v1260_v59, %v1256_v58  ;;  %v3566_v2 = vpack.c.bf16 %v1262_v60, %v1258_v55  ;;  %v3618_v58 = vpop.permute.xlu0 %1602 }
  0xfc   : > { %v914_v3 = vpop.f32.mrf.mxu0  ;;  %v1107_v4 = vpop.f32.mrf.mxu1  ;;  %4837 = vst [vmem:[#allocation51_spill] sm:$0xff] %v3618_v58 }
  0xfd   : > { %4815 = vst [vmem:[#allocation29_spill] sm:$0xff] %v3564_v1  ;;  %4816 = vst [vmem:[#allocation30_spill] sm:$0xff] %v3566_v2  ;;  %v1266_v9 = vmax.f32 %v1107_v4, 0.0  ;;  %v1264_v13 = vmax.f32 %v914_v3, 0.0 }
  0xfe   : > { %v3572_v7 = vpop.f32.mrf.mxu0  ;;  %v3574_v8 = vpop.f32.mrf.mxu1 }
  0xff   : > { %4819 = vst [vmem:[#allocation33_spill] sm:$0xff] %v3572_v7  ;;  %4820 = vst [vmem:[#allocation34_spill] sm:$0xff] %v3574_v8 }
 0x100   : > { %v918_v11 = vpop.f32.mrf.mxu0  ;;  %v1111_v12 = vpop.f32.mrf.mxu1 }
 0x101   : > { %v1268_v14 = vmax.f32 %v918_v11, 0.0  ;;  %v1270_v15 = vmax.f32 %v1111_v12, 0.0  ;;  %v3630_v11 = vpop.permute.xlu0 %1592 }
 0x102   : > { %v3580_v18 = vpop.f32.mrf.mxu0  ;;  %v3582_v19 = vpop.f32.mrf.mxu1  ;;  %4839 = vst [vmem:[#allocation53_spill] sm:$0xff] %v3630_v11 }
 0x103   : > { %4823 = vst [vmem:[#allocation37_spill] sm:$0xff] %v3580_v18  ;;  %4824 = vst [vmem:[#allocation38_spill] sm:$0xff] %v3582_v19  ;;  %v3584_v20 = vpack.c.bf16 %v1268_v14, %v1264_v13  ;;  %v3586_v22 = vpack.c.bf16 %v1270_v15, %v1266_v9  ;;  %v3628_v9 = vpop.permute.xlu1 %1597 }
 0x104   : > { %v3588_v24 = vpop.f32.mrf.mxu0  ;;  %v3590_v25 = vpop.f32.mrf.mxu1  ;;  %4838 = vst [vmem:[#allocation52_spill] sm:$0xff] %v3628_v9 }
 0x105   : > { %4825 = vst [vmem:[#allocation39_spill] sm:$0xff] %v3584_v20  ;;  %4826 = vst [vmem:[#allocation40_spill] sm:$0xff] %v3586_v22  ;;  %v3645_v29 = vpop.permute.xlu0 %1582 }
 0x106   : > { %4827 = vst [vmem:[#allocation41_spill] sm:$0xff] %v3588_v24  ;;  %v3596_v30 = vpop.f32.mrf.mxu0  ;;  %v3598_v33 = vpop.f32.mrf.mxu1  ;;  %4841 = vst [vmem:[#allocation55_spill] sm:$0xff] %v3645_v29  ;;  %v3184_v29 = vmov 1966171168  }
 0x107   : > { %v3643_v38 = vpop.permute.xlu1 %1587  ;;  %v431_v41 = vunpack.c.l.s4 %v3184_v29 }
 0x108   : > { %v3600_v34 = vpop.f32.mrf.mxu0  ;;  %v3602_v35 = vpop.f32.mrf.mxu1  ;;  %4840 = vst [vmem:[#allocation54_spill] sm:$0xff] %v3643_v38 }
 0x109   : > { %4830 = vst [vmem:[#allocation44_spill] sm:$0xff] %v3602_v35  ;;  %v3657_v57 = vpop.permute.xlu0 %1572 }
 0x10a   : > { %v3608_v49 = vpop.f32.mrf.mxu0  ;;  %v3610_v50 = vpop.f32.mrf.mxu1  ;;  %4843 = vst [vmem:[#allocation57_spill] sm:$0xff] %v3657_v57 }
 0x10b   : > { %4833 = vst [vmem:[#allocation47_spill] sm:$0xff] %v3608_v49  ;;  %4834 = vst [vmem:[#allocation48_spill] sm:$0xff] %v3610_v50  ;;  %v3655_v37 = vpop.permute.xlu1 %1577 }
 0x10c   : > { %v3612_v55 = vpop.f32.mrf.mxu0  ;;  %v3614_v56 = vpop.f32.mrf.mxu1  ;;  %4842 = vst [vmem:[#allocation56_spill] sm:$0xff] %v3655_v37  ;;  %v4846_v37 = vlaneseq }
 0x10d   : > { %4835 = vst [vmem:[#allocation49_spill] sm:$0xff] %v3614_v56  ;;  %v3669_v21 = vpop.permute.xlu0 %1562 }
 0x10e   : > { %v3620_v59 = vpop.f32.mrf.mxu0  ;;  %v3622_v60 = vpop.f32.mrf.mxu1  ;;  %4845 = vst [vmem:[#allocation59_spill] sm:$0xff] %v3669_v21  ;;  %v3676_v57 = vand.u32 127, %v4846_v37 }
 0x10f   : > { %v3667_v39 = vpop.permute.xlu1 %1567 }
 0x110   : > { %v3624_v3 = vpop.f32.mrf.mxu0  ;;  %v3626_v4 = vpop.f32.mrf.mxu1  ;;  %4844 = vst [vmem:[#allocation58_spill] sm:$0xff] %v3667_v39  ;;  %4847 = vst [vmem:[#allocation60_spill] sm:$0xff] %v3676_v57  ;;  %v331_v45 = vadd.s32 128, %v3676_v57  ;;  %v332_v46 = vadd.s32 256, %v3676_v57  ;;  %v333_v29 = vadd.s32 384, %v3676_v57  ;;  %v432_v39 = vunpack.c.0.s8 %v431_v41 }
 0x111   : > { %v3692_v37 = vand.u32 7, %v3676_v57  ;;  %vm415_vm4 = vcmp.lt.s32.totalorder %v3676_v57, 1 }
 0x112   : > { %v3632_v12 = vpop.f32.mrf.mxu0  ;;  %v3634_v13 = vpop.f32.mrf.mxu1  ;;  %v3689_v51 = vand.u32 7, %v331_v45  ;;  %v3694_v61 = vand.u32 7, %v332_v46  ;;  %v3696_v62 = vand.u32 7, %v333_v29  ;;  %v3706_v41 = vsub.s32 %v432_v39, %v3490_v23 }
 0x113   : > { %4849 = vst [vmem:[#allocation62_spill] sm:$0xff] %v3692_v37  ;;  %vm382_vm5 = vcmp.ge.s32.totalorder %v3692_v37, 1 }
 0x114   : > { %v3636_v14 = vpop.f32.mrf.mxu0  ;;  %v3638_v15 = vpop.f32.mrf.mxu1  ;;  %4848 = vst [vmem:[#allocation61_spill] sm:$0xff] %v3689_v51  ;;  %4850 = vst [vmem:[#allocation63_spill] sm:$0xff] %v3694_v61  ;;  %vm383_vm3 = vcmp.ge.s32.totalorder %v3689_v51, 1  ;;  %vm384_vm6 = vcmp.ge.s32.totalorder %v3694_v61, 1  ;;  %vm385_vm7 = vcmp.ge.s32.totalorder %v3696_v62, 1 }
 0x115   : > { %4851 = vst [vmem:[#allocation64_spill] sm:$0xff] %v3696_v62  ;;  %4852 = vst [vmem:[#allocation65_spill] sm:$0xff] %v3706_v41 }
 0x116   : > { %v3647_v16 = vpop.f32.mrf.mxu0  ;;  %v3649_v17 = vpop.f32.mrf.mxu1 }
 0x118   : > { %v3651_v26 = vpop.f32.mrf.mxu0  ;;  %v3653_v36 = vpop.f32.mrf.mxu1 }
 0x11a   : > { %v3659_v58 = vpop.f32.mrf.mxu0  ;;  %v3661_v9 = vpop.f32.mrf.mxu1 }
 0x11b   : > { %v410_v47 = vpop.permute.xlu1 %409  ;;  %v408_v21 = vpop.permute.xlu0 %407 }
 0x11c   : > { %v3663_v11 = vpop.f32.mrf.mxu0  ;;  %v3665_v38 = vpop.f32.mrf.mxu1  ;;  %v418_v1 = vsel %vm415_vm4, %v408_v21, %v410_v47 }
 0x11d   : > { %v421_v23 = vsel %vm383_vm3, %v418_v1, 0.0 }
 0x11e   : > { %v3671_v42 = vpop.f32.mrf.mxu0  ;;  %v3673_v40 = vpop.f32.mrf.mxu1 }
 0x11f   : > { %v414_v45 = vpop.permute.xlu1 %413  ;;  %v412_v46 = vpop.permute.xlu0 %411 }
 0x120   : > { %v3678_v44 = vpop.f32.mrf.mxu0  ;;  %v3680_v43 = vpop.f32.mrf.mxu1  ;;  %v419_v22 = vsel %vm415_vm4, %v414_v45, %v408_v21  ;;  %v416_v39 = vsel %vm415_vm4, %v412_v46, %v414_v45  ;;  %v417_v63 = vsel %vm415_vm4, %v410_v47, %v412_v46 }
 0x121   : > { %v420_v20 = vsel %vm382_vm5, %v419_v22, 0.0  ;;  %v423_v21 = vsel %vm385_vm7, %v416_v39, 0.0  ;;  %v422_v45 = vsel %vm384_vm6, %v417_v63, 0.0 }
 0x122   : > { %v3685_v52 = vpop.f32.mrf.mxu0  ;;  %v3687_v48 = vpop.f32.mrf.mxu1  ;;  %v428_v0 = vcombine.low %v420_v20, %v421_v23  ;;  %v429_v37 = vcombine.low %v422_v45, %v423_v21  ;;  %v1297_v45 = vmax.f32 %v3671_v42, 0.0 }
 0x123   : > { %v1303_v23 = vmax.f32 %v3687_v48, 0.0 }
 0x124   : > { %v3698_v5 = vpop.f32.mrf.mxu0  ;;  %v3700_v6 = vpop.f32.mrf.mxu1  ;;  %v436_v1 = vrot.slane %v428_v0, %v3706_v41  ;;  %v443_v24 = vrot.slane %v429_v37, %v3706_v41  ;;  %v1301_v37 = vmax.f32 %v3685_v52, 0.0 }
 0x126   : > { %v3709_v2 = vpop.f32.mrf.mxu0  ;;  %v3711_v29 = vpop.f32.mrf.mxu1  ;;  %v444_v62 = vcombine.low %v436_v1, %v443_v24  ;;  %v1306_v24 = vmax.f32 %v3700_v6, 0.0 }
 0x127   : > { %v1305_v35 = vmax.f32 %v3709_v2, 0.0 }
 0x128   : > { %v3724_v54 = vpop.f32.mrf.mxu0  ;;  %v3726_v53 = vpop.f32.mrf.mxu1  ;;  %v451_v47 = vrot.slane %v444_v62, %v3706_v41  ;;  %v1307_v62 = vmax.f32 %v3711_v29, 0.0 }
 0x12a   : > { %v970_v8 = vpop.f32.mrf.mxu0  ;;  %v1163_v51 = vpop.f32.mrf.mxu1  ;;  %v3749_v42 = vadd.f32 %v451_v47, %v3503_v10 }
 0x12b   : > { %v1309_v1 = vmax.f32 %v970_v8, 0.0  ;;  %v1311_v63 = vmax.f32 %v1163_v51, 0.0 }
 0x12c   : > { %v974_v22 = vpop.f32.mrf.mxu0  ;;  %v1167_v7 = vpop.f32.mrf.mxu1  ;;  %4853 = vst [vmem:[#allocation66_spill] sm:$0xff] %v3749_v42  ;;  %v466_v51 = vrot.slane %v3749_v42, %v3497_v27  ;;  %v474_v29 = vrot.slane %v3749_v42, %v3514_v31 }
 0x12d   : > { %v1312_v61 = vmax.f32 %v974_v22, 0.0  ;;  %v1314_v49 = vmax.f32 %v1167_v7, 0.0  ;;  %v462_v7 = vrot.slane %v3749_v42, %v3500_v28 }
 0x12e   : > { %v976_v46 = vpop.f32.mrf.mxu0  ;;  %v1169_v39 = vpop.f32.mrf.mxu1  ;;  %481 = vrot.lane.b32.xlu1 %v466_v51, %s3185_s20 }
 0x12f   : > { %v1313_v52 = vmax.f32 %v976_v46, 0.0  ;;  %v1315_v18 = vmax.f32 %v1169_v39, 0.0  ;;  %479 = vrot.lane.b32.xlu0 %v462_v7, %s3185_s20 }
 0x130   : > { %v978_v20 = vpop.f32.mrf.mxu0  ;;  %v1171_v57 = vpop.f32.mrf.mxu1 }
 0x131   : > { %v1316_v50 = vmax.f32 %v978_v20, 0.0  ;;  %v1318_v0 = vmax.f32 %v1171_v57, 0.0  ;;  %v1308_v57 = vmax.f32 %v3724_v54, 0.0  ;;  %v1299_v54 = vmax.f32 %v3673_v40, 0.0 }
 0x132   : > { %v980_v19 = vpop.f32.mrf.mxu0  ;;  %v1173_v21 = vpop.f32.mrf.mxu1  ;;  %485 = vrot.lane.b32.xlu1 %v474_v29, %s3185_s20 }
 0x133   : > { %v1317_v48 = vmax.f32 %v980_v19, 0.0  ;;  %v1319_v56 = vmax.f32 %v1173_v21, 0.0  ;;  %v1412_v22 = vpack.c.bf16 %v1316_v50, %v1312_v61  ;;  %v1310_v19 = vmax.f32 %v3726_v53, 0.0 }
 0x134   : > { %v984_v6 = vpop.f32.mrf.mxu0  ;;  %v1177_v8 = vpop.f32.mrf.mxu1  ;;  %v1414_v46 = vpack.c.bf16 %v1318_v0, %v1314_v49  ;;  %v470_v21 = vrot.slane %v3749_v42, %v3517_v32  ;;  %v1409_v61 = vpack.c.bf16 %v1309_v1, %v1305_v35  ;;  %v1300_v53 = vmax.f32 %v3678_v44, 0.0 }
 0x135   : > { %v1413_v20 = vpack.c.bf16 %v1317_v48, %v1313_v52  ;;  %v1415_v47 = vpack.c.bf16 %v1319_v56, %v1315_v18  ;;  %v1411_v18 = vpack.c.bf16 %v1311_v63, %v1307_v62  ;;  %v1322_v50 = vmax.f32 %v1177_v8, 0.0 }
 0x136   : > { %v986_v39 = vpop.f32.mrf.mxu0  ;;  %v1179_v2 = vpop.f32.mrf.mxu1  ;;  %v1302_v49 = vmax.f32 %v3680_v43, 0.0  ;;  %v1405_v56 = vpack.c.bf16 %v1301_v37, %v1297_v45  ;;  %v1304_v0 = vmax.f32 %v3698_v5, 0.0  ;;  %v1407_v51 = vpack.c.bf16 %v1303_v23, %v1299_v54  ;;  %483 = vrot.lane.b32.xlu0 %v470_v21, %s3185_s20 }
 0x137   : > { %1800 = vmatprep.subr.bf16.mxu0 %v1413_v20  ;;  %1993 = vmatprep.subr.bf16.mxu1 %v1415_v47  ;;  %v1320_v7 = vmax.f32 %v984_v6, 0.0  ;;  %v1410_v63 = vpack.c.bf16 %v1310_v19, %v1306_v24  ;;  %v1321_v1 = vmax.f32 %v986_v39, 0.0  ;;  %v1323_v62 = vmax.f32 %v1179_v2, 0.0 }
 0x138   : > { %v988_v52 = vpop.f32.mrf.mxu0  ;;  %v1181_v48 = vpop.f32.mrf.mxu1  ;;  %1801 = vmatpush1.bf16.msra.mxu0 %v1412_v22  ;;  %1994 = vmatpush1.bf16.msra.mxu1 %v1414_v46  ;;  %v1408_v35 = vpack.c.bf16 %v1308_v57, %v1304_v0  ;;  %v1285_v37 = vmax.f32 %v3632_v12, 0.0  ;;  %v1287_v6 = vmax.f32 %v3634_v13, 0.0  ;;  %v1290_v24 = vmax.f32 %v3638_v15, 0.0 }
 0x139   : > { %v1324_v10 = vmax.f32 %v988_v52, 0.0  ;;  %v1326_v40 = vmax.f32 %v1181_v48, 0.0  ;;  %1802 = vmatprep.subr.bf16.mxu0 %v1409_v61  ;;  %1995 = vmatprep.subr.bf16.mxu1 %v1411_v18  ;;  %v1296_v57 = vmax.f32 %v3663_v11, 0.0  ;;  %v1289_v47 = vmax.f32 %v3647_v16, 0.0 }
 0x13a   : > { %v990_v44 = vpop.f32.mrf.mxu0  ;;  %v1183_v8 = vpop.f32.mrf.mxu1  ;;  %v1292_v12 = vmax.f32 %v3651_v26, 0.0  ;;  %v1294_v13 = vmax.f32 %v3653_v36, 0.0  ;;  %v4858_v11 = vmax.f32 %v3665_v38, 0.0  ;;  %v1283_v16 = vmax.f32 %v3622_v60, 0.0 }
 0x13b   : > { %v3771_v43 = vpack.c.bf16 %v1324_v10, %v1320_v7  ;;  %v3773_v5 = vpack.c.bf16 %v1326_v40, %v1322_v50  ;;  %v1325_v23 = vmax.f32 %v990_v44, 0.0  ;;  %v1327_v45 = vmax.f32 %v1183_v8, 0.0 }
 0x13c   : > { %v994_v22 = vpop.f32.mrf.mxu0  ;;  %v1187_v20 = vpop.f32.mrf.mxu1  ;;  %1803 = vmatpush1.bf16.msra.mxu0 %v1408_v35  ;;  %1996 = vmatpush1.bf16.msra.mxu1 %v1410_v63  ;;  %v1291_v10 = vmax.f32 %v3649_v17, 0.0  ;;  %v1404_v15 = vpack.c.bf16 %v1300_v53, %v1296_v57  ;;  %v1406_v39 = vpack.c.bf16 %v1302_v49, %v4858_v11  ;;  %v4859_v17 = vmax.f32 %v3659_v58, 0.0  ;;  %v4868_v57 = vld [vmem:[#allocation49_spill] sm:$0xff] }
 0x13d   : > { %4854 = vst [vmem:[#allocation67_spill] sm:$0xff] %v3771_v43  ;;  %4855 = vst [vmem:[#allocation68_spill] sm:$0xff] %v3773_v5  ;;  %v3781_v19 = vpack.c.bf16 %v1325_v23, %v1321_v1  ;;  %v3783_v46 = vpack.c.bf16 %v1327_v45, %v1323_v62  ;;  %1804 = vmatprep.subr.bf16.mxu0 %v1405_v56  ;;  %1997 = vmatprep.subr.bf16.mxu1 %v1407_v51  ;;  %v4860_v54 = vmax.f32 %v3661_v9, 0.0 }
 0x13e   : > { %v996_v2 = vpop.f32.mrf.mxu0  ;;  %v1189_v29 = vpop.f32.mrf.mxu1  ;;  %v1401_v21 = vpack.c.bf16 %v4859_v17, %v1289_v47  ;;  %v1330_v18 = vmax.f32 %v1187_v20, 0.0  ;;  %v1284_v50 = vmax.f32 %v3624_v3, 0.0  ;;  %v1286_v26 = vmax.f32 %v3626_v4, 0.0 }
 0x13f   : > { %4856 = vst [vmem:[#allocation69_spill] sm:$0xff] %v3781_v19  ;;  %4857 = vst [vmem:[#allocation70_spill] sm:$0xff] %v3783_v46  ;;  %v1403_v61 = vpack.c.bf16 %v4860_v54, %v1291_v10  ;;  %v4861_v36 = vmax.f32 %v3620_v59, 0.0  ;;  %v1288_v38 = vmax.f32 %v3636_v14, 0.0  ;;  %v1399_v60 = vpack.c.bf16 %v1287_v6, %v1283_v16  ;;  %v4867_v6 = vld [vmem:[#allocation44_spill] sm:$0xff]  ;;  %v4876_v16 = vld [vmem:[#allocation41_spill] sm:$0xff] }
 0x140   : > { %v998_v49 = vpop.f32.mrf.mxu0  ;;  %v1191_v56 = vpop.f32.mrf.mxu1  ;;  %1805 = vmatpush1.bf16.msra.mxu0 %v1404_v15  ;;  %1998 = vmatpush1.bf16.msra.mxu1 %v1406_v39  ;;  %v1328_v58 = vmax.f32 %v994_v22, 0.0  ;;  %v1402_v48 = vpack.c.bf16 %v1294_v13, %v1290_v24  ;;  %v1329_v3 = vmax.f32 %v996_v2, 0.0  ;;  %v1331_v51 = vmax.f32 %v1189_v29, 0.0  ;;  %v4872_v15 = vld [vmem:[#allocation47_spill] sm:$0xff]  ;;  %v4874_v2 = vld [vmem:[#allocation48_spill] sm:$0xff] }
 0x141   : > { %v1397_v53 = vpack.c.bf16 %v1285_v37, %v4861_v36  ;;  %v1332_v0 = vmax.f32 %v998_v49, 0.0  ;;  %v1334_v52 = vmax.f32 %v1191_v56, 0.0  ;;  %1806 = vmatprep.subr.bf16.mxu0 %v1401_v21  ;;  %1999 = vmatprep.subr.bf16.mxu1 %v1403_v61  ;;  %v1400_v9 = vpack.c.bf16 %v1292_v12, %v1288_v38  ;;  %v4871_v12 = vld [vmem:[#allocation38_spill] sm:$0xff]  ;;  %v4878_v61 = vld [vmem:[#allocation33_spill] sm:$0xff]  ;;  %v4880_v56 = vld [vmem:[#allocation27_spill] sm:$0xff] }
 0x142   : > { %v1000_v4 = vpop.f32.mrf.mxu0  ;;  %v1193_v7 = vpop.f32.mrf.mxu1  ;;  %v1274_v63 = vmax.f32 %v3590_v25, 0.0  ;;  %v1280_v1 = vmax.f32 %v3612_v55, 0.0  ;;  %v1273_v8 = vmax.f32 %v3596_v30, 0.0  ;;  %v1275_v23 = vmax.f32 %v3598_v33, 0.0  ;;  %v4870_v30 = vld [vmem:[#allocation37_spill] sm:$0xff] }
 0x143   : > { %v3799_v59 = vpack.c.bf16 %v1332_v0, %v1328_v58  ;;  %v3801_v40 = vpack.c.bf16 %v1334_v52, %v1330_v18  ;;  %v1333_v14 = vmax.f32 %v1000_v4, 0.0  ;;  %v1335_v35 = vmax.f32 %v1193_v7, 0.0  ;;  %v4881_v58 = vld [vmem:[#allocation28_spill] sm:$0xff] }
 0x144   : > { %v3805_v62 = vpop.f32.mrf.mxu0  ;;  %v3807_v44 = vpop.f32.mrf.mxu1  ;;  %1807 = vmatpush1.bf16.msra.mxu0 %v1400_v9  ;;  %2000 = vmatpush1.bf16.msra.mxu1 %v1402_v48  ;;  %v1276_v25 = vmax.f32 %v3600_v34, 0.0  ;;  %v1278_v55 = vmax.f32 %v4867_v6, 0.0  ;;  %v1396_v24 = vpack.c.bf16 %v1284_v50, %v1280_v1  ;;  %v4869_v22 = vmax.f32 %v4868_v57, 0.0  ;;  %v4879_v50 = vld [vmem:[#allocation34_spill] sm:$0xff]  ;;  %v4883_v7 = vld [vmem:[#allocation24_spill] sm:$0xff]  ;;  %v4884_v6 = vld [vmem:[#allocation39_spill] sm:$0xff] }
 0x145   : > { %4862 = vst [vmem:[#allocation71_spill] sm:$0xff] %v3799_v59  ;;  %4863 = vst [vmem:[#allocation72_spill] sm:$0xff] %v3801_v40  ;;  %v3811_v45 = vpack.c.bf16 %v1333_v14, %v1329_v3  ;;  %v3813_v37 = vpack.c.bf16 %v1335_v35, %v1331_v51  ;;  %1808 = vmatprep.subr.bf16.mxu0 %v1397_v53  ;;  %2001 = vmatprep.subr.bf16.mxu1 %v1399_v60  ;;  %v1269_v33 = vmax.f32 %v4870_v30, 0.0  ;;  %v4882_v51 = vld [vmem:[#allocation23_spill] sm:$0xff]  ;;  %v4886_v30 = vld [vmem:[#allocation29_spill] sm:$0xff] }
 0x146   : > { %4864 = vst [vmem:[#allocation73_spill] sm:$0xff] %v3805_v62  ;;  %v1398_v20 = vpack.c.bf16 %v1286_v26, %v4869_v22  ;;  %v3819_v47 = vpop.f32.mrf.mxu0  ;;  %v3821_v10 = vpop.f32.mrf.mxu1  ;;  %v1271_v13 = vmax.f32 %v4871_v12, 0.0  ;;  %v4873_v11 = vmax.f32 %v4872_v15, 0.0  ;;  %v4875_v29 = vmax.f32 %v4874_v2, 0.0 }
 0x147   : > { %4865 = vst [vmem:[#allocation74_spill] sm:$0xff] %v3811_v45  ;;  %4866 = vst [vmem:[#allocation75_spill] sm:$0xff] %v3813_v37  ;;  %v1272_v17 = vmax.f32 %v4876_v16, 0.0  ;;  %v1265_v18 = vmax.f32 %v4878_v61, 0.0  ;;  %v1267_v26 = vmax.f32 %v4879_v50, 0.0  ;;  %v1394_v53 = vpack.c.bf16 %v1278_v55, %v1274_v63  ;;  %v4885_v55 = vld [vmem:[#allocation40_spill] sm:$0xff] }
 0x148   : > { %v1393_v39 = vpack.c.bf16 %v4873_v11, %v1273_v8  ;;  %v1395_v34 = vpack.c.bf16 %v4875_v29, %v1275_v23  ;;  %v3830_v21 = vpop.f32.mrf.mxu0  ;;  %v3832_v54 = vpop.f32.mrf.mxu1  ;;  %1809 = vmatpush1.bf16.msra.mxu0 %v1396_v24  ;;  %2002 = vmatpush1.bf16.msra.mxu1 %v1398_v20  ;;  %v1261_v60 = vmax.f32 %v4880_v56, 0.0  ;;  %v1263_v0 = vmax.f32 %v4881_v58, 0.0 }
 0x149   : > { %4877 = vst [vmem:[#allocation44_spill] sm:$0xff] %v3832_v54  ;;  %v1392_v36 = vpack.c.bf16 %v1276_v25, %v1272_v17  ;;  %v1389_v52 = vpack.c.bf16 %v1269_v33, %v1265_v18  ;;  %v1391_v9 = vpack.c.bf16 %v1271_v13, %v1267_v26  ;;  %v1257_v4 = vmax.f32 %v4882_v51, 0.0  ;;  %v4887_v33 = vld [vmem:[#allocation30_spill] sm:$0xff] }
 0x14a   : > { %1810 = vmatprep.subr.bf16.mxu0 %v1393_v39  ;;  %2003 = vmatprep.subr.bf16.mxu1 %v1395_v34  ;;  %v3836_v38 = vpop.f32.mrf.mxu0  ;;  %v3838_v49 = vpop.f32.mrf.mxu1  ;;  %v1259_v14 = vmax.f32 %v4883_v7, 0.0 }
 0x14b   : > { %v1385_v1 = vpack.c.bf16 %v1261_v60, %v1257_v4 }
 0x14c   : > { %v3842_v48 = vpop.f32.mrf.mxu0  ;;  %v3844_v3 = vpop.f32.mrf.mxu1  ;;  %1811 = vmatpush1.bf16.msra.mxu0 %v1392_v36  ;;  %2004 = vmatpush1.bf16.msra.mxu1 %v1394_v53  ;;  %v1387_v8 = vpack.c.bf16 %v1263_v0, %v1259_v14 }
 0x14d   : > { %1812 = vmatprep.subr.bf16.mxu0 %v1389_v52  ;;  %2005 = vmatprep.subr.bf16.mxu1 %v1391_v9 }
 0x14e   : > { %v3848_v35 = vpop.f32.mrf.mxu0  ;;  %v3850_v63 = vpop.f32.mrf.mxu1 }
 0x150   : > { %v3852_v23 = vpop.f32.mrf.mxu0  ;;  %v3854_v25 = vpop.f32.mrf.mxu1  ;;  %1813 = vmatpush1.bf16.msra.mxu0 %v4884_v6  ;;  %2006 = vmatpush1.bf16.msra.mxu1 %v4885_v55 }
 0x151   : > { %1814 = vmatprep.subr.bf16.mxu0 %v1385_v1  ;;  %2007 = vmatprep.subr.bf16.mxu1 %v1387_v8 }
 0x152   : > { %v3858_v24 = vpop.f32.mrf.mxu0  ;;  %v3860_v57 = vpop.f32.mrf.mxu1 }
 0x154   : > { %v3862_v22 = vpop.f32.mrf.mxu0  ;;  %v3864_v20 = vpop.f32.mrf.mxu1  ;;  %1815 = vmatpush1.bf16.msra.mxu0 %v4886_v30  ;;  %2008 = vmatpush1.bf16.msra.mxu1 %v4887_v33 }
 0x156   : > { %v3868_v12 = vpop.f32.mrf.mxu0  ;;  %v3870_v13 = vpop.f32.mrf.mxu1 }
 0x158   : > { %v3872_v15 = vpop.f32.mrf.mxu0  ;;  %v3874_v11 = vpop.f32.mrf.mxu1 }
 0x15a   : > { %v3876_v39 = vpop.f32.mrf.mxu0  ;;  %v3878_v2 = vpop.f32.mrf.mxu1 }
 0x15c   : > { %v3880_v29 = vpop.f32.mrf.mxu0  ;;  %v3882_v34 = vpop.f32.mrf.mxu1 }
 0x15e   : > { %v1036_v16 = vpop.f32.mrf.mxu0  ;;  %v1229_v17 = vpop.f32.mrf.mxu1 }
 0x160   : > { %v3884_v61 = vpop.f32.mrf.mxu0  ;;  %v3886_v18 = vpop.f32.mrf.mxu1 }
 0x162   : > { %v1040_v50 = vpop.f32.mrf.mxu0  ;;  %v1233_v26 = vpop.f32.mrf.mxu1 }
 0x164   : > { %v1044_v36 = vpop.f32.mrf.mxu0  ;;  %v1237_v53 = vpop.f32.mrf.mxu1 }
 0x165   : > { %v1370_v43 = vmax.f32 %v1237_v53, 0.0  ;;  %v1363_v53 = vmax.f32 %v1229_v17, 0.0 }
 0x166   : > { %v1046_v56 = vpop.f32.mrf.mxu0  ;;  %v1239_v60 = vpop.f32.mrf.mxu1 }
 0x167   : > { %v1369_v19 = vmax.f32 %v1046_v56, 0.0  ;;  %v1371_v40 = vmax.f32 %v1239_v60, 0.0 }
 0x168   : > { %v1048_v58 = vpop.f32.mrf.mxu0  ;;  %v1241_v0 = vpop.f32.mrf.mxu1 }
 0x169   : > { %v1372_v45 = vmax.f32 %v1048_v58, 0.0  ;;  %v1374_v62 = vmax.f32 %v1241_v0, 0.0  ;;  %v4889_v0 = vld [vmem:[#allocation73_spill] sm:$0xff] }
 0x16a   : > { %v1050_v52 = vpop.f32.mrf.mxu0  ;;  %v1243_v9 = vpop.f32.mrf.mxu1 }
 0x16b   : > { %v1373_v6 = vmax.f32 %v1050_v52, 0.0  ;;  %v1375_v55 = vmax.f32 %v1243_v9, 0.0  ;;  %v1365_v9 = vmax.f32 %v1040_v50, 0.0 }
 0x16c   : > { %v1054_v51 = vpop.f32.mrf.mxu0  ;;  %v1247_v4 = vpop.f32.mrf.mxu1 }
 0x16d   : > { %v1378_v30 = vmax.f32 %v1247_v4, 0.0  ;;  %v1376_v46 = vmax.f32 %v1054_v51, 0.0  ;;  %v1367_v4 = vmax.f32 %v1233_v26, 0.0  ;;  %v4891_v51 = vld [vmem:[#allocation75_spill] sm:$0xff] }
 0x16e   : > { %v1056_v7 = vpop.f32.mrf.mxu0  ;;  %v1249_v14 = vpop.f32.mrf.mxu1 }
 0x16f   : > { %v1377_v28 = vmax.f32 %v1056_v7, 0.0  ;;  %v1379_v42 = vmax.f32 %v1249_v14, 0.0  ;;  %v1368_v7 = vmax.f32 %v1044_v36, 0.0  ;;  %v4888_v36 = vld [vmem:[#allocation44_spill] sm:$0xff] }
 0x170   : > { %v1058_v1 = vpop.f32.mrf.mxu0  ;;  %v1251_v8 = vpop.f32.mrf.mxu1  ;;  %v4893_v14 = vld [vmem:[#allocation72_spill] sm:$0xff] }
 0x171   : > { %v1380_v33 = vmax.f32 %v1058_v1, 0.0  ;;  %v1382_v31 = vmax.f32 %v1251_v8, 0.0  ;;  %v1441_v1 = vpack.c.bf16 %v1373_v6, %v1369_v19  ;;  %v1443_v8 = vpack.c.bf16 %v1375_v55, %v1371_v40  ;;  %v4894_v6 = vld [vmem:[#allocation69_spill] sm:$0xff]  ;;  %v4895_v55 = vld [vmem:[#allocation70_spill] sm:$0xff] }
 0x172   : > { %v1060_v32 = vpop.f32.mrf.mxu0  ;;  %v1253_v27 = vpop.f32.mrf.mxu1  ;;  %v1359_v19 = vmax.f32 %v3878_v2, 0.0  ;;  %v1360_v40 = vmax.f32 %v3880_v29, 0.0  ;;  %v1349_v2 = vmax.f32 %v3858_v24, 0.0  ;;  %v1351_v29 = vmax.f32 %v3860_v57, 0.0 }
 0x173   : > { %v1381_v41 = vmax.f32 %v1060_v32, 0.0  ;;  %v1383_v5 = vmax.f32 %v1253_v27, 0.0  ;;  %v1444_v54 = vpack.c.bf16 %v1380_v33, %v1376_v46  ;;  %v1446_v52 = vpack.c.bf16 %v1382_v31, %v1378_v30  ;;  %v3083_v33 = vld [vmem:[%s4705_s3] ss:$8 sps:$4 sm:$0xff]  }
 0x174   : > { %v1362_v27 = vmax.f32 %v3882_v34, 0.0  ;;  %v1361_v32 = vmax.f32 %v1036_v16, 0.0  ;;  %v1440_v31 = vpack.c.bf16 %v1372_v45, %v1368_v7  ;;  %v1355_v34 = vmax.f32 %v3870_v13, 0.0  ;;  %v3089_v7 = vld [vmem:[%s4705_s3 + $0x24] ss:$8 sps:$4 sm:$0xff]  }
 0x175   : > { %v1445_v59 = vpack.c.bf16 %v1381_v41, %v1377_v28  ;;  %v1447_v37 = vpack.c.bf16 %v1383_v5, %v1379_v42  ;;  %v1364_v28 = vmax.f32 %v3884_v61, 0.0  ;;  %v1366_v41 = vmax.f32 %v3886_v18, 0.0 }
 0x176   : > { %v1442_v42 = vpack.c.bf16 %v1374_v62, %v1370_v43  ;;  %v1357_v5 = vmax.f32 %v3876_v39, 0.0  ;;  %v1437_v46 = vpack.c.bf16 %v1365_v9, %v1361_v32  ;;  %v1356_v43 = vmax.f32 %v3872_v15, 0.0  ;;  %v4896_v9 = vld [vmem:[#allocation67_spill] sm:$0xff] }
 0x177   : > { %1816 = vmatprep.subr.bf16.mxu0 %v1445_v59  ;;  %2009 = vmatprep.subr.bf16.mxu1 %v1447_v37  ;;  %v1439_v59 = vpack.c.bf16 %v1367_v4, %v1363_v53  ;;  %v1354_v37 = vmax.f32 %v3864_v20, 0.0  ;;  %v1358_v62 = vmax.f32 %v3874_v11, 0.0  ;;  %v1436_v45 = vpack.c.bf16 %v1364_v28, %v1360_v40  ;;  %v4897_v4 = vld [vmem:[#allocation68_spill] sm:$0xff]  ;;  %v3092_v32 = vld [vmem:[%s4705_s3 + $0x34] ss:$8 sps:$4 sm:$0xff]  }
 0x178   : > { %1817 = vmatpush2.bf16.msra.mxu0 %v1444_v54  ;;  %2010 = vmatpush2.bf16.msra.mxu1 %v1446_v52  ;;  %v1353_v54 = vmax.f32 %v3868_v12, 0.0  ;;  %v1438_v39 = vpack.c.bf16 %v1366_v41, %v1362_v27  ;;  %v1435_v17 = vpack.c.bf16 %v1359_v19, %v1355_v34  ;;  %v1352_v20 = vmax.f32 %v3862_v22, 0.0  ;;  %v3157_v52 = vld [vmem:[%s4707_s5] sm:$0xff]  ;;  %v4900_v19 = vld [vmem:[#allocation62_spill] sm:$0xff] }
 0x179   : > { %1818 = vmatprep.subr.bf16.mxu0 %v1441_v1  ;;  %2011 = vmatprep.subr.bf16.mxu1 %v1443_v8  ;;  %v1346_v12 = vmax.f32 %v3844_v3, 0.0  ;;  %v1345_v13 = vmax.f32 %v3848_v35, 0.0  ;;  %v1347_v15 = vmax.f32 %v3850_v63, 0.0  ;;  %v1348_v11 = vmax.f32 %v3852_v23, 0.0  ;;  %v3086_v1 = vld [vmem:[%s4705_s3 + $0x14] ss:$8 sps:$4 sm:$0xff]  }
 0x17a   : > { %v1433_v16 = vpack.c.bf16 %v1357_v5, %v1353_v54  ;;  %v1350_v24 = vmax.f32 %v3854_v25, 0.0  ;;  %v1432_v61 = vpack.c.bf16 %v1356_v43, %v1352_v20  ;;  %v1434_v57 = vpack.c.bf16 %v1358_v62, %v1354_v37  ;;  %v3088_v8 = vld [vmem:[%s4705_s3 + $0x10] ss:$8 sps:$4 sm:$0xff]   ;;  %v3091_v27 = vld [vmem:[%s4705_s3 + $0x20] ss:$8 sps:$4 sm:$0xff]  }
 0x17b   : > { %v1341_v18 = vmax.f32 %v3836_v38, 0.0  ;;  %v1343_v22 = vmax.f32 %v3838_v49, 0.0  ;;  %v1429_v50 = vpack.c.bf16 %v1349_v2, %v1345_v13  ;;  %v1431_v26 = vpack.c.bf16 %v1351_v29, %v1347_v15  ;;  %v4898_v53 = vld [vmem:[#allocation60_spill] sm:$0xff]  ;;  %v3094_v5 = vld [vmem:[%s4705_s3 + $0x30] ss:$8 sps:$4 sm:$0xff]   ;;  %v4903_v20 = vld [vmem:[#allocation65_spill] sm:$0xff] }
 0x17c   : > { %1819 = vmatpush2.bf16.msra.mxu0 %v1440_v31  ;;  %2012 = vmatpush2.bf16.msra.mxu1 %v1442_v42  ;;  %v1344_v3 = vmax.f32 %v3842_v48, 0.0  ;;  %v1338_v35 = vmax.f32 %v3807_v44, 0.0  ;;  %v1337_v63 = vmax.f32 %v3819_v47, 0.0  ;;  %v1339_v23 = vmax.f32 %v3821_v10, 0.0  ;;  %v4890_v10 = vld [vmem:[#allocation74_spill] sm:$0xff]  ;;  %v4899_v31 = vld [vmem:[#allocation61_spill] sm:$0xff] }
 0x17d   : > { %1820 = vmatprep.subr.bf16.mxu0 %v1437_v46  ;;  %2013 = vmatprep.subr.bf16.mxu1 %v1439_v59  ;;  %v1340_v25 = vmax.f32 %v3830_v21, 0.0  ;;  %v1342_v38 = vmax.f32 %v4888_v36, 0.0  ;;  %v1430_v49 = vpack.c.bf16 %v1350_v24, %v1346_v12  ;;  %v1336_v48 = vmax.f32 %v4889_v0, 0.0  ;;  %v4892_v21 = vld [vmem:[#allocation71_spill] sm:$0xff]  ;;  %v4902_v59 = vld [vmem:[#allocation64_spill] sm:$0xff] }
 0x17e   : > { %v1428_v56 = vpack.c.bf16 %v1348_v11, %v1344_v3  ;;  %v1425_v60 = vpack.c.bf16 %v1341_v18, %v1337_v63  ;;  %v1427_v58 = vpack.c.bf16 %v1343_v22, %v1339_v23  ;;  %v3186_v30 = vmov 1   ;;  %v4901_v46 = vld [vmem:[#allocation63_spill] sm:$0xff]  ;;  %v3095_v40 = vld [vmem:[%s4705_s3 + $0x44] ss:$8 sps:$4 sm:$0xff]   ;;  %v3097_v15 = vld [vmem:[%s4705_s3 + $0x40] ss:$8 sps:$4 sm:$0xff]  }
 0x17f   : > { %v1424_v44 = vpack.c.bf16 %v1340_v25, %v1336_v48  ;;  %v1426_v47 = vpack.c.bf16 %v1342_v38, %v1338_v35  ;;  %3050 = vset.pattern.permute.xlu0 %v3186_v30  ;;  %vm487_vm8 = vcmp.lt.s32.totalorder %v4898_v53, 2  ;;  %vm4788_vm9 = vcmp.ge.s32.totalorder %v4899_v31, 2  ;;  %v3098_v24 = vld [vmem:[%s4705_s3 + $0x54] ss:$8 sps:$4 sm:$0xff]   ;;  %v3101_v3 = vld [vmem:[%s4705_s3 + $0x64] ss:$8 sps:$4 sm:$0xff]  }
 0x180   : > { %1821 = vmatpush2.bf16.msra.mxu0 %v1436_v45  ;;  %2014 = vmatpush2.bf16.msra.mxu1 %v1438_v39  ;;  %vm454_vm10 = vcmp.ge.s32.totalorder %v4900_v19, 2  ;;  %vm4787_vm11 = vcmp.ge.s32.totalorder %v4901_v46, 2  ;;  %vm4786_vm12 = vcmp.ge.s32.totalorder %v4902_v59, 2  ;;  %v4906_v22 = vld [vmem:[#allocation6_spill] sm:$0xff]  ;;  %v4907_v35 = vld [vmem:[#allocation5_spill] sm:$0xff]  ;;  %v4909_v36 = vld [vmem:[#allocation8_spill] sm:$0xff] }
 0x181   : > { %1822 = vmatprep.subr.bf16.mxu0 %v1433_v16  ;;  %2015 = vmatprep.subr.bf16.mxu1 %v1435_v17  ;;  %v4908_v23 = vld [vmem:[#allocation9_spill] sm:$0xff]  ;;  %v3110_v48 = vld [vmem:[%s4705_s3 + $0x94] ss:$8 sps:$4 sm:$0xff]   ;;  %v3122_v30 = vld [vmem:[%s4705_s3 + $0xd0] ss:$8 sps:$4 sm:$0xff]  }
 0x182   : > { %2380 = vperm.xlu0 %3050, %v3157_v52   ;;  %v3109_v0 = vld [vmem:[%s4705_s3 + $0x80] ss:$8 sps:$4 sm:$0xff]  }
 0x183   : > { %v3125_v52 = vld [vmem:[%s4705_s3 + $0xe0] ss:$8 sps:$4 sm:$0xff]  }
 0x184   : > { %1823 = vmatpush2.bf16.msra.mxu0 %v1432_v61  ;;  %2016 = vmatpush2.bf16.msra.mxu1 %v1434_v57  ;;  %v4904_v57 = vld [vmem:[#allocation66_spill] sm:$0xff]  ;;  %v4933_v31 = vld [vmem:[#allocation12_spill] sm:$0xff] }
 0x185   : > { %1824 = vmatprep.subr.bf16.mxu0 %v1429_v50  ;;  %2017 = vmatprep.subr.bf16.mxu1 %v1431_v26  ;;  %v3100_v26 = vld [vmem:[%s4705_s3 + $0x50] ss:$8 sps:$4 sm:$0xff]  }
 0x188   : > { %1825 = vmatpush2.bf16.msra.mxu0 %v1428_v56  ;;  %2018 = vmatpush2.bf16.msra.mxu1 %v1430_v49  ;;  %v3103_v56 = vld [vmem:[%s4705_s3 + $0x60] ss:$8 sps:$4 sm:$0xff]   ;;  %v3104_v49 = vld [vmem:[%s4705_s3 + $0x74] ss:$8 sps:$4 sm:$0xff]  }
 0x189   : > { %1826 = vmatprep.subr.bf16.mxu0 %v1425_v60  ;;  %2019 = vmatprep.subr.bf16.mxu1 %v1427_v58  ;;  %v3106_v60 = vld [vmem:[%s4705_s3 + $0x70] ss:$8 sps:$4 sm:$0xff]   ;;  %v3107_v58 = vld [vmem:[%s4705_s3 + $0x84] ss:$8 sps:$4 sm:$0xff]  }
 0x18c   : > { %1827 = vmatpush2.bf16.msra.mxu0 %v1424_v44  ;;  %2020 = vmatpush2.bf16.msra.mxu1 %v1426_v47  ;;  %v3112_v44 = vld [vmem:[%s4705_s3 + $0x90] ss:$8 sps:$4 sm:$0xff]   ;;  %v3113_v47 = vld [vmem:[%s4705_s3 + $0xa4] ss:$8 sps:$4 sm:$0xff]  }
 0x18d   : > { %1828 = vmatprep.subr.bf16.mxu0 %v4890_v10  ;;  %2021 = vmatprep.subr.bf16.mxu1 %v4891_v51  ;;  %v3115_v10 = vld [vmem:[%s4705_s3 + $0xa0] ss:$8 sps:$4 sm:$0xff]   ;;  %v3116_v51 = vld [vmem:[%s4705_s3 + $0xb4] ss:$8 sps:$4 sm:$0xff]  }
 0x190   : > { %1829 = vmatpush2.bf16.msra.mxu0 %v4892_v21  ;;  %2022 = vmatpush2.bf16.msra.mxu1 %v4893_v14  ;;  %v3118_v21 = vld [vmem:[%s4705_s3 + $0xb0] ss:$8 sps:$4 sm:$0xff]   ;;  %v3121_v14 = vld [vmem:[%s4705_s3 + $0xc4] ss:$8 sps:$4 sm:$0xff]  }
 0x191   : > { %1830 = vmatprep.subr.bf16.mxu0 %v4894_v6  ;;  %2023 = vmatprep.subr.bf16.mxu1 %v4895_v55  ;;  %v3119_v6 = vld [vmem:[%s4705_s3 + $0xc0] ss:$8 sps:$4 sm:$0xff]   ;;  %v3124_v55 = vld [vmem:[%s4705_s3 + $0xd4] ss:$8 sps:$4 sm:$0xff]  }
 0x194   : > { %1831 = vmatpush2.bf16.msra.mxu0 %v4896_v9  ;;  %2024 = vmatpush2.bf16.msra.mxu1 %v4897_v4  ;;  %v3130_v9 = vld [vmem:[%s4705_s3 + $0xf4] ss:$8 sps:$4 sm:$0xff]   ;;  %v3128_v4 = vld [vmem:[%s4705_s3 + $0xf0] ss:$8 sps:$4 sm:$0xff]  }
 0x197   : > { %1833 = vmatmul.mubr.bf16.vlgmr.msra.gmra.mxu0 %v3083_v33  ;;  %2026 = vmatmul.mubr.bf16.vlgmr.msra.gmra.mxu1 %v3083_v33  ;;  %v3127_v33 = vld [vmem:[%s4705_s3 + $0xe4] ss:$8 sps:$4 sm:$0xff]  }
 0x198   : > { %1842 = vmatprep.mubr.bf16.mxu0 %v3086_v1  ;;  %2035 = vmatprep.mubr.bf16.mxu1 %v3086_v1 }
 0x19f   : > { %1843 = vmatmul.mubr.bf16.gmra.mxu0 %v3088_v8  ;;  %2036 = vmatmul.mubr.bf16.gmra.mxu1 %v3088_v8 }
 0x1a0   : > { %1852 = vmatprep.mubr.bf16.mxu0 %v3089_v7  ;;  %2045 = vmatprep.mubr.bf16.mxu1 %v3089_v7  ;;  %v482_v28 = vpop.permute.xlu1 %481  ;;  %v4910_v7 = vld [vmem:[#allocation32_spill] sm:$0xff] }
 0x1a1   : > { %v480_v41 = vpop.permute.xlu0 %479 }
 0x1a2   : > { %v490_v42 = vsel %vm487_vm8, %v480_v41, %v482_v28 }
 0x1a3   : > { %v493_v37 = vsel %vm4788_vm9, %v490_v42, 0.0 }
 0x1a4   : > { %v486_v54 = vpop.permute.xlu1 %485 }
 0x1a5   : > { %v491_v43 = vsel %vm487_vm8, %v486_v54, %v480_v41 }
 0x1a6   : > { %v492_v39 = vsel %vm454_vm10, %v491_v43, 0.0 }
 0x1a7   : > { %1853 = vmatmul.mubr.bf16.gmra.mxu0 %v3091_v27  ;;  %2046 = vmatmul.mubr.bf16.gmra.mxu1 %v3091_v27  ;;  %v500_v16 = vcombine.low %v492_v39, %v493_v37 }
 0x1a8   : > { %1862 = vmatprep.mubr.bf16.mxu0 %v3092_v32  ;;  %2055 = vmatprep.mubr.bf16.mxu1 %v3092_v32  ;;  %v484_v34 = vpop.permute.xlu0 %483 }
 0x1a9   : > { %v488_v62 = vsel %vm487_vm8, %v484_v34, %v486_v54  ;;  %v489_v45 = vsel %vm487_vm8, %v482_v28, %v484_v34  ;;  %v508_v12 = vrot.slane %v500_v16, %v4903_v20  ;;  %v4911_v34 = vld [vmem:[#allocation31_spill] sm:$0xff] }
 0x1aa   : > { %v494_v2 = vsel %vm4787_vm11, %v489_v45, 0.0  ;;  %v495_v29 = vsel %vm4786_vm12, %v488_v62, 0.0  ;;  %vm2750_vm12 = vcmask 1041408   ;;  %vm2755_vm11 = vcmask 1045504  }
 0x1ab   : > { %v501_v17 = vcombine.low %v494_v2, %v495_v29 }
 0x1ad   : > { %v515_v13 = vrot.slane %v501_v17, %v4903_v20 }
 0x1af   : > { %1863 = vmatmul.mubr.bf16.gmra.mxu0 %v3094_v5  ;;  %2056 = vmatmul.mubr.bf16.gmra.mxu1 %v3094_v5  ;;  %v516_v11 = vcombine.low %v508_v12, %v515_v13 }
 0x1b0   : > { %1872 = vmatprep.mubr.bf16.mxu0 %v3095_v40  ;;  %2065 = vmatprep.mubr.bf16.mxu1 %v3095_v40 }
 0x1b1   : > { %v523_v61 = vrot.slane %v516_v11, %v4903_v20 }
 0x1b3   : > { %v3982_v18 = vadd.f32 %v523_v61, %v4904_v57 }
 0x1b5   : > { %4905 = vst [vmem:[#allocation49_spill] sm:$0xff] %v3982_v18  ;;  %v534_v50 = vrot.slane %v3982_v18, %v4906_v22  ;;  %v538_v63 = vrot.slane %v3982_v18, %v4907_v35  ;;  %v542_v25 = vrot.slane %v3982_v18, %v4908_v23  ;;  %v546_v38 = vrot.slane %v3982_v18, %v4909_v36 }
 0x1b7   : > { %1873 = vmatmul.mubr.bf16.gmra.mxu0 %v3097_v15  ;;  %2066 = vmatmul.mubr.bf16.gmra.mxu1 %v3097_v15 }
 0x1b8   : > { %1882 = vmatprep.mubr.bf16.mxu0 %v3098_v24  ;;  %2075 = vmatprep.mubr.bf16.mxu1 %v3098_v24 }
 0x1b9   : > { %551 = vrot.lane.b32.xlu1 %v534_v50, %s3187_s12  ;;  %555 = vrot.lane.b32.xlu0 %v542_v25, %s3187_s12 }
 0x1bd   : > { %553 = vrot.lane.b32.xlu1 %v538_v63, %s3187_s12 }
 0x1bf   : > { %1883 = vmatmul.mubr.bf16.gmra.mxu0 %v3100_v26  ;;  %2076 = vmatmul.mubr.bf16.gmra.mxu1 %v3100_v26 }
 0x1c0   : > { %1892 = vmatprep.mubr.bf16.mxu0 %v3101_v3  ;;  %2085 = vmatprep.mubr.bf16.mxu1 %v3101_v3  ;;  %v4914_v3 = vld [vmem:[#allocation26_spill] sm:$0xff] }
 0x1c1   : > { %557 = vrot.lane.b32.xlu1 %v546_v38, %s3187_s12 }
 0x1c7   : > { %1893 = vmatmul.mubr.bf16.gmra.mxu0 %v3103_v56  ;;  %2086 = vmatmul.mubr.bf16.gmra.mxu1 %v3103_v56 }
 0x1c8   : > { %1902 = vmatprep.mubr.bf16.mxu0 %v3104_v49  ;;  %2095 = vmatprep.mubr.bf16.mxu1 %v3104_v49 }
 0x1cf   : > { %1903 = vmatmul.mubr.bf16.gmra.mxu0 %v3106_v60  ;;  %2096 = vmatmul.mubr.bf16.gmra.mxu1 %v3106_v60 }
 0x1d0   : > { %1912 = vmatprep.mubr.bf16.mxu0 %v3107_v58  ;;  %2105 = vmatprep.mubr.bf16.mxu1 %v3107_v58 }
 0x1d7   : > { %1913 = vmatmul.mubr.bf16.gmra.mxu0 %v3109_v0  ;;  %2106 = vmatmul.mubr.bf16.gmra.mxu1 %v3109_v0 }
 0x1d8   : > { %1922 = vmatprep.mubr.bf16.mxu0 %v3110_v48  ;;  %2115 = vmatprep.mubr.bf16.mxu1 %v3110_v48 }
 0x1df   : > { %1923 = vmatmul.mubr.bf16.gmra.mxu0 %v3112_v44  ;;  %2116 = vmatmul.mubr.bf16.gmra.mxu1 %v3112_v44 }
 0x1e0   : > { %1932 = vmatprep.mubr.bf16.mxu0 %v3113_v47  ;;  %2125 = vmatprep.mubr.bf16.mxu1 %v3113_v47 }
 0x1e7   : > { %1933 = vmatmul.mubr.bf16.gmra.mxu0 %v3115_v10  ;;  %2126 = vmatmul.mubr.bf16.gmra.mxu1 %v3115_v10  ;;  %v4917_v10 = vld [vmem:[#allocation25_spill] sm:$0xff] }
 0x1e8   : > { %1942 = vmatprep.mubr.bf16.mxu0 %v3116_v51  ;;  %2135 = vmatprep.mubr.bf16.mxu1 %v3116_v51 }
 0x1ef   : > { %1943 = vmatmul.mubr.bf16.gmra.mxu0 %v3118_v21  ;;  %2136 = vmatmul.mubr.bf16.gmra.mxu1 %v3118_v21 }
 0x1f0   : > { %1952 = vmatprep.mubr.bf16.mxu0 %v3121_v14  ;;  %2145 = vmatprep.mubr.bf16.mxu1 %v3121_v14 }
 0x1f7   : > { %1953 = vmatmul.mubr.bf16.gmra.mxu0 %v3119_v6  ;;  %2146 = vmatmul.mubr.bf16.gmra.mxu1 %v3119_v6 }
 0x1f8   : > { %1962 = vmatprep.mubr.bf16.mxu0 %v3124_v55  ;;  %2155 = vmatprep.mubr.bf16.mxu1 %v3124_v55 }
 0x1ff   : > { %1963 = vmatmul.mubr.bf16.gmra.mxu0 %v3122_v30  ;;  %2156 = vmatmul.mubr.bf16.gmra.mxu1 %v3122_v30 }
 0x200   : > { %1972 = vmatprep.mubr.bf16.mxu0 %v3127_v33  ;;  %2165 = vmatprep.mubr.bf16.mxu1 %v3127_v33 }
 0x207   : > { %1973 = vmatmul.mubr.bf16.gmra.mxu0 %v3125_v52  ;;  %2166 = vmatmul.mubr.bf16.gmra.mxu1 %v3125_v52 }
 0x208   : > { %1982 = vmatprep.mubr.bf16.mxu0 %v3130_v9  ;;  %2175 = vmatprep.mubr.bf16.mxu1 %v3130_v9 }
 0x20f   : > { %1983 = vmatmul.mubr.bf16.gmra.mxu0 %v3128_v4  ;;  %2176 = vmatmul.mubr.bf16.gmra.mxu1 %v3128_v4 }
 0x257   : > { %v1834_v1 = vpop.f32.mrf.mxu0  ;;  %v2027_v8 = vpop.f32.mrf.mxu1 }
 0x258   : > { %v2028_v27 = vadd.f32 %v2027_v8, %v4910_v7  ;;  %v1835_v32 = vadd.f32 %v1834_v1, %v4910_v7 }
 0x259   : > { %v1836_v28 = vpop.f32.mrf.mxu0  ;;  %v2029_v41 = vpop.f32.mrf.mxu1 }
 0x25a   : > { %v1837_v42 = vadd.f32 %v1836_v28, %v4910_v7  ;;  %v2030_v5 = vadd.f32 %v2029_v41, %v4910_v7  ;;  %v2188_v54 = vmax.f32 %v2028_v27, 0.0  ;;  %v2186_v45 = vmax.f32 %v1835_v32, 0.0 }
 0x25b   : > { %v1838_v40 = vpop.f32.mrf.mxu0  ;;  %v2031_v37 = vpop.f32.mrf.mxu1 }
 0x25c   : > { %v1839_v43 = vadd.f32 %v1838_v40, %v4911_v34  ;;  %v2032_v62 = vadd.f32 %v2031_v37, %v4911_v34  ;;  %v2187_v13 = vmax.f32 %v1837_v42, 0.0  ;;  %v2189_v15 = vmax.f32 %v2030_v5, 0.0 }
 0x25d   : > { %v1840_v39 = vpop.f32.mrf.mxu0  ;;  %v2033_v2 = vpop.f32.mrf.mxu1 }
 0x25e   : > { %v2190_v29 = vmax.f32 %v1839_v43, 0.0  ;;  %v2192_v16 = vmax.f32 %v2032_v62, 0.0  ;;  %v1841_v17 = vadd.f32 %v1840_v39, %v4911_v34  ;;  %v2034_v12 = vadd.f32 %v2033_v2, %v4911_v34 }
 0x25f   : > { %v1844_v11 = vpop.f32.mrf.mxu0  ;;  %v2037_v24 = vpop.f32.mrf.mxu1 }
 0x260   : > { %v4067_v61 = vpack.c.bf16 %v2190_v29, %v2186_v45  ;;  %v4069_v57 = vpack.c.bf16 %v2192_v16, %v2188_v54  ;;  %v2191_v50 = vmax.f32 %v1841_v17, 0.0  ;;  %v2193_v26 = vmax.f32 %v2034_v12, 0.0 }
 0x261   : > { %v1845_v63 = vadd.f32 %v1844_v11, %v4914_v3  ;;  %v2038_v25 = vadd.f32 %v2037_v24, %v4914_v3  ;;  %v1846_v38 = vpop.f32.mrf.mxu0  ;;  %v2039_v56 = vpop.f32.mrf.mxu1 }
 0x262   : > { %4912 = vst [vmem:[#allocation37_spill] sm:$0xff] %v4067_v61  ;;  %4913 = vst [vmem:[#allocation38_spill] sm:$0xff] %v4069_v57  ;;  %v4073_v49 = vpack.c.bf16 %v2191_v50, %v2187_v13  ;;  %v4075_v60 = vpack.c.bf16 %v2193_v26, %v2189_v15  ;;  %v1847_v58 = vadd.f32 %v1846_v38, %v4914_v3  ;;  %v4094_v26 = vld.sshfl [vmem:[%s4706_s4] sm:$0x33 pattern:$0x76325410] }
 0x263   : > { %v2040_v0 = vadd.f32 %v2039_v56, %v4914_v3  ;;  %v1848_v48 = vpop.f32.mrf.mxu0  ;;  %v2041_v44 = vpop.f32.mrf.mxu1  ;;  %v2196_v47 = vmax.f32 %v2038_v25, 0.0  ;;  %v2194_v14 = vmax.f32 %v1845_v63, 0.0  ;;  %4922 = vst [vmem:[#allocation28_spill] sm:$0xff] %v4094_v26  ;;  %v2391_v25 = vcombine.high %v4094_v26, %v4094_v26  ;;  %v4935_v26 = vld [vmem:[#allocation11_spill] sm:$0xff] }
 0x264   : > { %4915 = vst [vmem:[#allocation47_spill] sm:$0xff] %v4073_v49  ;;  %4916 = vst [vmem:[#allocation48_spill] sm:$0xff] %v4075_v60  ;;  %v1849_v51 = vadd.f32 %v1848_v48, %v4917_v10  ;;  %v2042_v21 = vadd.f32 %v2041_v44, %v4917_v10  ;;  %v2195_v4 = vmax.f32 %v1847_v58, 0.0 }
 0x265   : > { %v1850_v6 = vpop.f32.mrf.mxu0  ;;  %v2043_v55 = vpop.f32.mrf.mxu1  ;;  %v2197_v1 = vmax.f32 %v2040_v0, 0.0  ;;  %2426 = vmatprep.mubr.bf16.mxu0 %v2391_v25  ;;  %2467 = vmatprep.mubr.bf16.mxu1 %v2391_v25 }
 0x266   : > { %v2198_v30 = vmax.f32 %v1849_v51, 0.0  ;;  %v2200_v33 = vmax.f32 %v2042_v21, 0.0  ;;  %v1851_v52 = vadd.f32 %v1850_v6, %v4917_v10  ;;  %v2044_v9 = vadd.f32 %v2043_v55, %v4917_v10  ;;  %v4923_v51 = vld [vmem:[#allocation21_spill] sm:$0xff]  ;;  %v4925_v6 = vld [vmem:[#allocation20_spill] sm:$0xff] }
 0x267   : > { %v1854_v8 = vpop.f32.mrf.mxu0  ;;  %v2047_v7 = vpop.f32.mrf.mxu1 }
 0x268   : > { %v4083_v27 = vpack.c.bf16 %v2198_v30, %v2194_v14  ;;  %v4085_v32 = vpack.c.bf16 %v2200_v33, %v2196_v47  ;;  %v2199_v28 = vmax.f32 %v1851_v52, 0.0  ;;  %v2201_v41 = vmax.f32 %v2044_v9, 0.0  ;;  %v4926_v52 = vld [vmem:[#allocation22_spill] sm:$0xff] }
 0x269   : > { %v1856_v42 = vpop.f32.mrf.mxu0  ;;  %v2049_v5 = vpop.f32.mrf.mxu1  ;;  %v4106_v9 = vadd.f32 %v1854_v8, %v4926_v52 }
 0x26a   : > { %4918 = vst [vmem:[#allocation41_spill] sm:$0xff] %v4083_v27  ;;  %4919 = vst [vmem:[#allocation33_spill] sm:$0xff] %v4085_v32  ;;  %v4087_v40 = vpack.c.bf16 %v2199_v28, %v2195_v4  ;;  %v4089_v37 = vpack.c.bf16 %v2201_v41, %v2197_v1  ;;  %v4109_v4 = vadd.f32 %v2047_v7, %v4926_v52  ;;  %v4928_v28 = vld [vmem:[#allocation19_spill] sm:$0xff] }
 0x26b   : > { %v1858_v54 = vpop.f32.mrf.mxu0  ;;  %v2051_v34 = vpop.f32.mrf.mxu1  ;;  %4927 = vst [vmem:[#allocation24_spill] sm:$0xff] %v4106_v9  ;;  %v4937_v9 = vld [vmem:[#allocation59_spill] sm:$0xff] }
 0x26c   : > { %4920 = vst [vmem:[#allocation34_spill] sm:$0xff] %v4087_v40  ;;  %4921 = vst [vmem:[#allocation27_spill] sm:$0xff] %v4089_v37  ;;  %v4128_v36 = vadd.f32 %v1858_v54, %v4923_v51 }
 0x26d   : > { %v1860_v43 = vpop.f32.mrf.mxu0  ;;  %v2053_v62 = vpop.f32.mrf.mxu1 }
 0x26e   : > { %v4099_v21 = vadd.f32 %v1860_v43, %v4923_v51  ;;  %v4102_v14 = vadd.f32 %v2053_v62, %v4923_v51  ;;  %v4116_v43 = vadd.f32 %v1856_v42, %v4926_v52  ;;  %v4119_v62 = vadd.f32 %v2049_v5, %v4926_v52  ;;  %v4930_v5 = vld [vmem:[#allocation17_spill] sm:$0xff] }
 0x26f   : > { %v1864_v45 = vpop.f32.mrf.mxu0  ;;  %v2057_v39 = vpop.f32.mrf.mxu1 }
 0x270   : > { %4924 = vst [vmem:[#allocation23_spill] sm:$0xff] %v4102_v14 }
 0x271   : > { %v1866_v2 = vpop.f32.mrf.mxu0  ;;  %v2059_v29 = vpop.f32.mrf.mxu1 }
 0x272   : > { %v1867_v55 = vadd.f32 %v1866_v2, %v4925_v6  ;;  %v4112_v1 = vadd.f32 %v2059_v29, %v4925_v6  ;;  %v4131_v29 = vadd.f32 %v2051_v34, %v4923_v51  ;;  %v4929_v51 = vld [vmem:[#allocation18_spill] sm:$0xff] }
 0x273   : > { %v1868_v16 = vpop.f32.mrf.mxu0  ;;  %v2061_v17 = vpop.f32.mrf.mxu1 }
 0x274   : > { %v4122_v2 = vadd.f32 %v1868_v16, %v4928_v28  ;;  %v4125_v8 = vadd.f32 %v2061_v17, %v4928_v28  ;;  %v4139_v16 = vadd.f32 %v1864_v45, %v4925_v6  ;;  %v4142_v17 = vadd.f32 %v2057_v39, %v4925_v6  ;;  %v4931_v39 = vld [vmem:[#allocation15_spill] sm:$0xff] }
 0x275   : > { %v1870_v12 = vpop.f32.mrf.mxu0  ;;  %v2063_v13 = vpop.f32.mrf.mxu1  ;;  %v2211_v52 = vmax.f32 %v1867_v55, 0.0 }
 0x276   : > { %v1871_v41 = vadd.f32 %v1870_v12, %v4928_v28  ;;  %v4135_v12 = vadd.f32 %v2063_v13, %v4928_v28 }
 0x277   : > { %v1874_v15 = vpop.f32.mrf.mxu0  ;;  %v2067_v11 = vpop.f32.mrf.mxu1 }
 0x278   : > { %v2215_v34 = vmax.f32 %v1871_v41, 0.0  ;;  %v4166_v28 = vadd.f32 %v1874_v15, %v4929_v51 }
 0x279   : > { %v1876_v24 = vpop.f32.mrf.mxu0  ;;  %v2069_v50 = vpop.f32.mrf.mxu1 }
 0x27a   : > { %v4146_v22 = vadd.f32 %v1876_v24, %v4929_v51  ;;  %v4149_v13 = vadd.f32 %v2069_v50, %v4929_v51  ;;  %v4932_v24 = vld [vmem:[#allocation16_spill] sm:$0xff]  ;;  %v4177_v59 = vpack.c.bf16 %v2215_v34, %v2211_v52 }
 0x27b   : > { %v1878_v3 = vpop.f32.mrf.mxu0  ;;  %v2071_v63 = vpop.f32.mrf.mxu1 }
 0x27d   : > { %v1880_v38 = vpop.f32.mrf.mxu0  ;;  %v2073_v56 = vpop.f32.mrf.mxu1 }
 0x27e   : > { %v4154_v42 = vadd.f32 %v1880_v38, %v4930_v5  ;;  %v4159_v41 = vadd.f32 %v2073_v56, %v4930_v5  ;;  %v4169_v38 = vadd.f32 %v2067_v11, %v4929_v51  ;;  %v4185_v11 = vadd.f32 %v1878_v3, %v4930_v5 }
 0x27f   : > { %v1884_v58 = vpop.f32.mrf.mxu0  ;;  %v2077_v0 = vpop.f32.mrf.mxu1 }
 0x280   : > { %v4162_v20 = vadd.f32 %v1884_v58, %v4932_v24 }
 0x281   : > { %v1886_v48 = vpop.f32.mrf.mxu0  ;;  %v2079_v44 = vpop.f32.mrf.mxu1 }
 0x282   : > { %v1887_v50 = vadd.f32 %v1886_v48, %v4932_v24  ;;  %v4194_v48 = vadd.f32 %v2077_v0, %v4932_v24  ;;  %v4934_v0 = vld [vmem:[#allocation14_spill] sm:$0xff] }
 0x283   : > { %v1888_v47 = vpop.f32.mrf.mxu0  ;;  %v2081_v10 = vpop.f32.mrf.mxu1 }
 0x284   : > { %v4175_v45 = vadd.f32 %v1888_v47, %v4931_v39  ;;  %v4182_v15 = vadd.f32 %v2081_v10, %v4931_v39  ;;  %v2227_v10 = vmax.f32 %v1887_v50, 0.0 }
 0x285   : > { %v1890_v30 = vpop.f32.mrf.mxu0  ;;  %v2083_v33 = vpop.f32.mrf.mxu1 }
 0x286   : > { %v1891_v6 = vadd.f32 %v1890_v30, %v4931_v39  ;;  %v4172_v30 = vadd.f32 %v2079_v44, %v4932_v24  ;;  %v4188_v44 = vadd.f32 %v2071_v63, %v4930_v5  ;;  %v4202_v52 = vadd.f32 %v2083_v33, %v4931_v39 }
 0x287   : > { %v1894_v25 = vpop.f32.mrf.mxu0  ;;  %v2087_v7 = vpop.f32.mrf.mxu1 }
 0x288   : > { %v2231_v51 = vmax.f32 %v1891_v6, 0.0  ;;  %v4205_v34 = vadd.f32 %v1894_v25, %v4933_v31  ;;  %v4211_v3 = vadd.f32 %v2087_v7, %v4933_v31  ;;  %v4936_v25 = vld [vmem:[#allocation13_spill] sm:$0xff] }
 0x289   : > { %v1896_v23 = vpop.f32.mrf.mxu0  ;;  %v2089_v54 = vpop.f32.mrf.mxu1 }
 0x28a   : > { %v1897_v63 = vadd.f32 %v1896_v23, %v4933_v31  ;;  %v2090_v5 = vadd.f32 %v2089_v54, %v4933_v31  ;;  %v4208_v50 = vpack.c.bf16 %v2231_v51, %v2227_v10 }
 0x28b   : > { %v1898_v55 = vpop.f32.mrf.mxu0  ;;  %v2091_v18 = vpop.f32.mrf.mxu1 }
 0x28c   : > { %v4214_v23 = vadd.f32 %v1898_v55, %v4934_v0  ;;  %v2235_v51 = vmax.f32 %v1897_v63, 0.0  ;;  %v2237_v10 = vmax.f32 %v2090_v5, 0.0 }
 0x28d   : > { %v1900_v35 = vpop.f32.mrf.mxu0  ;;  %v2093_v56 = vpop.f32.mrf.mxu1 }
 0x28e   : > { %v1901_v24 = vadd.f32 %v1900_v35, %v4934_v0  ;;  %v2094_v54 = vadd.f32 %v2093_v56, %v4934_v0  ;;  %v2092_v56 = vadd.f32 %v2091_v18, %v4934_v0 }
 0x28f   : > { %v1904_v46 = vpop.f32.mrf.mxu0  ;;  %v2097_v19 = vpop.f32.mrf.mxu1 }
 0x290   : > { %v1905_v31 = vadd.f32 %v1904_v46, %v4935_v26  ;;  %v2098_v7 = vadd.f32 %v2097_v19, %v4935_v26  ;;  %v2239_v60 = vmax.f32 %v1901_v24, 0.0 }
 0x291   : > { %v1906_v47 = vpop.f32.mrf.mxu0  ;;  %v2099_v6 = vpop.f32.mrf.mxu1 }
 0x292   : > { %v1907_v33 = vadd.f32 %v1906_v47, %v4935_v26  ;;  %v2100_v39 = vadd.f32 %v2099_v6, %v4935_v26  ;;  %v2238_v6 = vmax.f32 %v4214_v23, 0.0  ;;  %v2242_v26 = vmax.f32 %v1905_v31, 0.0 }
 0x293   : > { %v1908_v58 = vpop.f32.mrf.mxu0  ;;  %v2101_v53 = vpop.f32.mrf.mxu1  ;;  %v2244_v40 = vmax.f32 %v2098_v7, 0.0  ;;  %v2233_v31 = vmax.f32 %v4202_v52, 0.0 }
 0x294   : > { %v1909_v57 = vadd.f32 %v1908_v58, %v4936_v25  ;;  %v2102_v35 = vadd.f32 %v2101_v53, %v4936_v25  ;;  %v2241_v58 = vmax.f32 %v2094_v54, 0.0  ;;  %v2243_v27 = vmax.f32 %v1907_v33, 0.0 }
 0x295   : > { %v1910_v55 = vpop.f32.mrf.mxu0  ;;  %v2103_v61 = vpop.f32.mrf.mxu1  ;;  %v2245_v46 = vmax.f32 %v2100_v39, 0.0 }
 0x296   : > { %v1911_v49 = vadd.f32 %v1910_v55, %v4936_v25  ;;  %v2104_v47 = vadd.f32 %v2103_v61, %v4936_v25  ;;  %v2246_v32 = vmax.f32 %v1909_v57, 0.0  ;;  %v2248_v53 = vmax.f32 %v2102_v35, 0.0 }
 0x297   : > { %v1914_v63 = vpop.f32.mrf.mxu0  ;;  %v2107_v5 = vpop.f32.mrf.mxu1  ;;  %v2240_v61 = vmax.f32 %v2092_v56, 0.0  ;;  %v2340_v25 = vpack.c.bf16 %v2239_v60, %v2235_v51  ;;  %v2342_v7 = vpack.c.bf16 %v2241_v58, %v2237_v10  ;;  %v2234_v60 = vmax.f32 %v4205_v34, 0.0 }
 0x298   : > { %v2247_v37 = vmax.f32 %v1911_v49, 0.0  ;;  %v2249_v19 = vmax.f32 %v2104_v47, 0.0  ;;  %v1915_v18 = vadd.f32 %v1914_v63, %v4937_v9  ;;  %v2108_v0 = vadd.f32 %v2107_v5, %v4937_v9  ;;  %v4938_v47 = vld [vmem:[#allocation58_spill] sm:$0xff] }
 0x299   : > { %v1916_v24 = vpop.f32.mrf.mxu0  ;;  %v2109_v55 = vpop.f32.mrf.mxu1  ;;  %v2343_v57 = vpack.c.bf16 %v2246_v32, %v2242_v26  ;;  %v2345_v35 = vpack.c.bf16 %v2248_v53, %v2244_v40  ;;  %v2339_v58 = vpack.c.bf16 %v2238_v6, %v2234_v60  ;;  %v4948_v60 = vmax.f32 %v4146_v22, 0.0 }
 0x29a   : > { %v2344_v23 = vpack.c.bf16 %v2247_v37, %v2243_v27  ;;  %v2346_v54 = vpack.c.bf16 %v2249_v19, %v2245_v46  ;;  %v1917_v14 = vadd.f32 %v1916_v24, %v4937_v9  ;;  %v2110_v33 = vadd.f32 %v2109_v55, %v4937_v9 }
 0x29b   : > { %v1918_v49 = vpop.f32.mrf.mxu0  ;;  %v2111_v39 = vpop.f32.mrf.mxu1  ;;  %v2236_v27 = vmax.f32 %v4211_v3, 0.0  ;;  %v2250_v32 = vmax.f32 %v1915_v18, 0.0  ;;  %v2252_v40 = vmax.f32 %v2108_v0, 0.0  ;;  %v2228_v55 = vmax.f32 %v4194_v48, 0.0 }
 0x29c   : > { %v1919_v63 = vadd.f32 %v1918_v49, %v4938_v47  ;;  %v2112_v5 = vadd.f32 %v2111_v39, %v4938_v47  ;;  %2394 = vmatprep.subr.bf16.mxu0 %v2344_v23  ;;  %2435 = vmatprep.subr.bf16.mxu1 %v2346_v54  ;;  %v2251_v46 = vmax.f32 %v1917_v14, 0.0  ;;  %v2253_v34 = vmax.f32 %v2110_v33, 0.0 }
 0x29d   : > { %v1920_v37 = vpop.f32.mrf.mxu0  ;;  %v2113_v51 = vpop.f32.mrf.mxu1  ;;  %2395 = vmatpush1.bf16.msra.mxu0 %v2343_v57  ;;  %2436 = vmatpush1.bf16.msra.mxu1 %v2345_v35  ;;  %v2341_v53 = vpack.c.bf16 %v2240_v61, %v2236_v27  ;;  %v4941_v23 = vmax.f32 %v4172_v30, 0.0  ;;  %v4942_v57 = vld [vmem:[#allocation57_spill] sm:$0xff]  ;;  %v2222_v35 = vmax.f32 %v4185_v11, 0.0  ;;  %v2224_v33 = vmax.f32 %v4188_v44, 0.0 }
 0x29e   : > { %v2254_v9 = vmax.f32 %v1919_v63, 0.0  ;;  %v2256_v56 = vmax.f32 %v2112_v5, 0.0  ;;  %v1921_v52 = vadd.f32 %v1920_v37, %v4938_v47  ;;  %v2114_v10 = vadd.f32 %v2113_v51, %v4938_v47  ;;  %2396 = vmatprep.subr.bf16.mxu0 %v2340_v25  ;;  %2437 = vmatprep.subr.bf16.mxu1 %v2342_v7 }
 0x29f   : > { %v1924_v19 = vpop.f32.mrf.mxu0  ;;  %v2117_v3 = vpop.f32.mrf.mxu1  ;;  %v2338_v54 = vpack.c.bf16 %v2233_v31, %v4941_v23  ;;  %v4945_v30 = vmax.f32 %v4162_v20, 0.0  ;;  %v4946_v48 = vmax.f32 %v4175_v45, 0.0  ;;  %v4947_v7 = vmax.f32 %v4182_v15, 0.0 }
 0x2a0   : > { %v4238_v26 = vpack.c.bf16 %v2254_v9, %v2250_v32  ;;  %v4240_v18 = vpack.c.bf16 %v2256_v56, %v2252_v40  ;;  %v2255_v0 = vmax.f32 %v1921_v52, 0.0  ;;  %v2257_v24 = vmax.f32 %v2114_v10, 0.0  ;;  %v4952_v40 = vld [vmem:[#allocation56_spill] sm:$0xff] }
 0x2a1   : > { %v1925_v25 = vadd.f32 %v1924_v19, %v4942_v57  ;;  %v2118_v6 = vadd.f32 %v2117_v3, %v4942_v57  ;;  %v1926_v61 = vpop.f32.mrf.mxu0  ;;  %v2119_v14 = vpop.f32.mrf.mxu1  ;;  %2397 = vmatpush1.bf16.msra.mxu0 %v2339_v58  ;;  %2438 = vmatpush1.bf16.msra.mxu1 %v2341_v53  ;;  %v2335_v31 = vpack.c.bf16 %v4946_v48, %v4945_v30  ;;  %v4949_v27 = vmax.f32 %v4154_v42, 0.0 }
 0x2a2   : > { %4939 = vst [vmem:[#allocation39_spill] sm:$0xff] %v4238_v26  ;;  %4940 = vst [vmem:[#allocation40_spill] sm:$0xff] %v4240_v18  ;;  %v4249_v49 = vpack.c.bf16 %v2255_v0, %v2251_v46  ;;  %v4251_v39 = vpack.c.bf16 %v2257_v24, %v2253_v34  ;;  %2398 = vmatprep.subr.bf16.mxu0 %v4208_v50  ;;  %v2337_v47 = vpack.c.bf16 %v4947_v7, %v2228_v55  ;;  %v4989_v18 = vld [vmem:[#allocation46_spill] sm:$0xff]  ;;  %v4990_v26 = vld [vmem:[#allocation45_spill] sm:$0xff] }
 0x2a3   : > { %v1927_v63 = vadd.f32 %v1926_v61, %v4942_v57  ;;  %v2120_v11 = vadd.f32 %v2119_v14, %v4942_v57  ;;  %2439 = vmatprep.subr.bf16.mxu1 %v2338_v54  ;;  %v1928_v44 = vpop.f32.mrf.mxu0  ;;  %v2121_v5 = vpop.f32.mrf.mxu1  ;;  %v2332_v50 = vpack.c.bf16 %v4949_v27, %v4948_v60  ;;  %v4950_v20 = vmax.f32 %v4149_v13, 0.0 }
 0x2a4   : > { %4943 = vst [vmem:[#allocation29_spill] sm:$0xff] %v4249_v49  ;;  %4944 = vst [vmem:[#allocation30_spill] sm:$0xff] %v4251_v39  ;;  %v4951_v45 = vmax.f32 %v4159_v41, 0.0  ;;  %v1929_v15 = vadd.f32 %v1928_v44, %v4952_v40  ;;  %v2122_v37 = vadd.f32 %v2121_v5, %v4952_v40  ;;  %v2218_v51 = vmax.f32 %v4166_v28, 0.0  ;;  %v4991_v39 = vld [vmem:[#allocation42_spill] sm:$0xff] }
 0x2a5   : > { %v2220_v9 = vmax.f32 %v4169_v38, 0.0  ;;  %v2258_v56 = vmax.f32 %v1925_v25, 0.0  ;;  %v2260_v52 = vmax.f32 %v2118_v6, 0.0  ;;  %v1930_v10 = vpop.f32.mrf.mxu0  ;;  %v2123_v22 = vpop.f32.mrf.mxu1  ;;  %2399 = vmatpush1.bf16.msra.mxu0 %v2335_v31  ;;  %2440 = vmatpush1.bf16.msra.mxu1 %v2337_v47  ;;  %v2259_v34 = vmax.f32 %v1927_v63, 0.0 }
 0x2a6   : > { %v2334_v32 = vpack.c.bf16 %v4951_v45, %v4950_v20  ;;  %v2262_v42 = vmax.f32 %v1929_v15, 0.0  ;;  %v2264_v58 = vmax.f32 %v2122_v37, 0.0  ;;  %v1931_v13 = vadd.f32 %v1930_v10, %v4952_v40  ;;  %2400 = vmatprep.subr.bf16.mxu0 %v2332_v50  ;;  %v4969_v45 = vld [vmem:[#allocation34_spill] sm:$0xff]  ;;  %v4974_v10 = vld [vmem:[#allocation48_spill] sm:$0xff] }
 0x2a7   : > { %v2124_v41 = vadd.f32 %v2123_v22, %v4952_v40  ;;  %v2331_v53 = vpack.c.bf16 %v2222_v35, %v2218_v51  ;;  %v2333_v46 = vpack.c.bf16 %v2224_v33, %v2220_v9  ;;  %v2261_v28 = vmax.f32 %v2120_v11, 0.0  ;;  %v4276_v19 = vpop.f32.mrf.mxu0  ;;  %v4278_v38 = vpop.f32.mrf.mxu1  ;;  %v4966_v11 = vld [vmem:[#allocation23_spill] sm:$0xff]  ;;  %v4971_v9 = vld [vmem:[#allocation41_spill] sm:$0xff] }
 0x2a8   : > { %2441 = vmatprep.subr.bf16.mxu1 %v2334_v32  ;;  %4953 = vst [vmem:[#allocation44_spill] sm:$0xff] %v4276_v19  ;;  %4954 = vst [vmem:[#allocation73_spill] sm:$0xff] %v4278_v38  ;;  %v4280_v3 = vpack.c.bf16 %v2262_v42, %v2258_v56  ;;  %v4282_v0 = vpack.c.bf16 %v2264_v58, %v2260_v52  ;;  %v2263_v24 = vmax.f32 %v1931_v13, 0.0  ;;  %v2204_v23 = vmax.f32 %v4109_v4, 0.0  ;;  %v4970_v32 = vld [vmem:[#allocation27_spill] sm:$0xff]  ;;  %v4972_v56 = vld [vmem:[#allocation33_spill] sm:$0xff] }
 0x2a9   : > { %v2265_v55 = vmax.f32 %v2124_v41, 0.0  ;;  %v2210_v54 = vmax.f32 %v4139_v16, 0.0  ;;  %v2212_v57 = vmax.f32 %v4142_v17, 0.0  ;;  %v4957_v25 = vmax.f32 %v4112_v1, 0.0  ;;  %v4291_v14 = vpop.f32.mrf.mxu0  ;;  %v4293_v35 = vpop.f32.mrf.mxu1  ;;  %2401 = vmatpush1.bf16.msra.mxu0 %v2331_v53  ;;  %2442 = vmatpush1.bf16.msra.mxu1 %v2333_v46  ;;  %v4973_v52 = vld [vmem:[#allocation47_spill] sm:$0xff]  ;;  %v4975_v41 = vld [vmem:[#allocation37_spill] sm:$0xff] }
 0x2aa   : > { %4955 = vst [vmem:[#allocation74_spill] sm:$0xff] %v4280_v3  ;;  %4956 = vst [vmem:[#allocation75_spill] sm:$0xff] %v4282_v0  ;;  %v4958_v6 = vmax.f32 %v4135_v12, 0.0  ;;  %v2203_v33 = vmax.f32 %v4116_v43, 0.0  ;;  %v2205_v30 = vmax.f32 %v4119_v62, 0.0  ;;  %v4297_v4 = vpack.c.bf16 %v2263_v24, %v2259_v34  ;;  %2402 = vmatprep.subr.bf16.mxu0 %v4177_v59  ;;  %v4976_v53 = vld [vmem:[#allocation38_spill] sm:$0xff] }
 0x2ab   : > { %v4299_v16 = vpack.c.bf16 %v2265_v55, %v2261_v28  ;;  %v2206_v1 = vmax.f32 %v4128_v36, 0.0  ;;  %v2208_v12 = vmax.f32 %v4131_v29, 0.0  ;;  %v4961_v17 = vmax.f32 %v4122_v2, 0.0  ;;  %v4308_v43 = vpop.f32.mrf.mxu0  ;;  %v4310_v62 = vpop.f32.mrf.mxu1  ;;  %v4968_v36 = vld [vmem:[#allocation24_spill] sm:$0xff] }
 0x2ac   : > { %v2330_v61 = vpack.c.bf16 %v4958_v6, %v4957_v25  ;;  %4959 = vst [vmem:[#allocation71_spill] sm:$0xff] %v4297_v4  ;;  %v4962_v31 = vmax.f32 %v4125_v8, 0.0  ;;  %4963 = vst [vmem:[#allocation69_spill] sm:$0xff] %v4308_v43  ;;  %v4965_v47 = vmax.f32 %v4099_v21, 0.0  ;;  %v4967_v59 = vmax.f32 %v4966_v11, 0.0  ;;  %v4993_v4 = vld [vmem:[#allocation35_spill] sm:$0xff] }
 0x2ad   : > { %4960 = vst [vmem:[#allocation72_spill] sm:$0xff] %v4299_v16  ;;  %v2327_v48 = vpack.c.bf16 %v4961_v17, %v2210_v54  ;;  %4964 = vst [vmem:[#allocation70_spill] sm:$0xff] %v4310_v62  ;;  %v2202_v5 = vmax.f32 %v4968_v36, 0.0  ;;  %v1940_v29 = vpop.f32.mrf.mxu0  ;;  %v2133_v60 = vpop.f32.mrf.mxu1  ;;  %v2325_v8 = vpack.c.bf16 %v2208_v12, %v2204_v23 }
 0x2ae   : > { %v2329_v7 = vpack.c.bf16 %v4962_v31, %v2212_v57  ;;  %2443 = vmatprep.subr.bf16.mxu1 %v2330_v61  ;;  %v2324_v63 = vpack.c.bf16 %v4965_v47, %v2203_v33  ;;  %v2326_v44 = vpack.c.bf16 %v4967_v59, %v2205_v30 }
 0x2af   : > { %2403 = vmatpush1.bf16.msra.mxu0 %v2327_v48  ;;  %v2323_v2 = vpack.c.bf16 %v2206_v1, %v2202_v5  ;;  %v4317_v27 = vpop.f32.mrf.mxu0  ;;  %v4319_v50 = vpop.f32.mrf.mxu1 }
 0x2b0   : > { %2444 = vmatpush1.bf16.msra.mxu1 %v2329_v7  ;;  %2404 = vmatprep.subr.bf16.mxu0 %v2324_v63  ;;  %v4977_v63 = vld [vmem:[#allocation55_spill] sm:$0xff] }
 0x2b1   : > { %2445 = vmatprep.subr.bf16.mxu1 %v2326_v44  ;;  %v1946_v20 = vpop.f32.mrf.mxu0  ;;  %v2139_v21 = vpop.f32.mrf.mxu1  ;;  %v4347_v11 = vadd.f32 %v4291_v14, %v4977_v63  ;;  %v4351_v59 = vadd.f32 %v4293_v35, %v4977_v63  ;;  %v4980_v44 = vld [vmem:[#allocation54_spill] sm:$0xff]  ;;  %v4986_v14 = vld [vmem:[#allocation52_spill] sm:$0xff] }
 0x2b2   : > { %v4354_v36 = vadd.f32 %v1940_v29, %v4980_v44  ;;  %v4357_v5 = vadd.f32 %v2133_v60, %v4980_v44 }
 0x2b3   : > { %2405 = vmatpush1.bf16.msra.mxu0 %v2323_v2  ;;  %v4323_v40 = vpop.f32.mrf.mxu0  ;;  %v4325_v15 = vpop.f32.mrf.mxu1  ;;  %4978 = vst [vmem:[#allocation67_spill] sm:$0xff] %v4347_v11  ;;  %4979 = vst [vmem:[#allocation68_spill] sm:$0xff] %v4351_v59  ;;  %v4994_v11 = vld [vmem:[#allocation43_spill] sm:$0xff] }
 0x2b4   : > { %2446 = vmatpush1.bf16.msra.mxu1 %v2325_v8  ;;  %2406 = vmatprep.subr.bf16.mxu0 %v4969_v45  ;;  %4981 = vst [vmem:[#allocation66_spill] sm:$0xff] %v4354_v36  ;;  %4982 = vst [vmem:[#allocation32_spill] sm:$0xff] %v4357_v5  ;;  %v4983_v45 = vld [vmem:[#allocation53_spill] sm:$0xff] }
 0x2b5   : > { %2447 = vmatprep.subr.bf16.mxu1 %v4970_v32  ;;  %v1950_v37 = vpop.f32.mrf.mxu0  ;;  %v2143_v51 = vpop.f32.mrf.mxu1  ;;  %v4360_v32 = vadd.f32 %v1946_v20, %v4983_v45 }
 0x2b6   : > { %v4369_v35 = vadd.f32 %v2143_v51, %v4986_v14 }
 0x2b7   : > { %2407 = vmatpush1.bf16.msra.mxu0 %v4971_v9  ;;  %v4331_v22 = vpop.f32.mrf.mxu0  ;;  %v4333_v42 = vpop.f32.mrf.mxu1  ;;  %4984 = vst [vmem:[#allocation31_spill] sm:$0xff] %v4360_v32  ;;  %v4363_v9 = vadd.f32 %v2139_v21, %v4983_v45 }
 0x2b8   : > { %2448 = vmatpush1.bf16.msra.mxu1 %v4972_v56  ;;  %2408 = vmatprep.subr.bf16.mxu0 %v4973_v52  ;;  %v4366_v56 = vadd.f32 %v1950_v37, %v4986_v14  ;;  %v4987_v52 = vld [vmem:[#allocation51_spill] sm:$0xff] }
 0x2b9   : > { %2449 = vmatprep.subr.bf16.mxu1 %v4974_v10  ;;  %v1956_v58 = vpop.f32.mrf.mxu0  ;;  %v2149_v13 = vpop.f32.mrf.mxu1  ;;  %4985 = vst [vmem:[#allocation26_spill] sm:$0xff] %v4363_v9  ;;  %v4988_v10 = vld [vmem:[#allocation50_spill] sm:$0xff] }
 0x2ba   : > { %v4372_v29 = vadd.f32 %v1956_v58, %v4987_v52  ;;  %v4375_v60 = vadd.f32 %v2149_v13, %v4987_v52 }
 0x2bb   : > { %2409 = vmatpush1.bf16.msra.mxu0 %v4975_v41  ;;  %v4337_v46 = vpop.f32.mrf.mxu0  ;;  %v4339_v34 = vpop.f32.mrf.mxu1 }
 0x2bc   : > { %2450 = vmatpush1.bf16.msra.mxu1 %v4976_v53 }
 0x2bd   : > { %v1960_v28 = vpop.f32.mrf.mxu0  ;;  %v2153_v24 = vpop.f32.mrf.mxu1 }
 0x2be   : > { %v4378_v41 = vadd.f32 %v1960_v28, %v4988_v10  ;;  %v4381_v20 = vadd.f32 %v2153_v24, %v4988_v10 }
 0x2bf   : > { %v4341_v55 = vpop.f32.mrf.mxu0  ;;  %v4343_v23 = vpop.f32.mrf.mxu1 }
 0x2c1   : > { %v1966_v54 = vpop.f32.mrf.mxu0  ;;  %v2159_v57 = vpop.f32.mrf.mxu1 }
 0x2c2   : > { %v4384_v37 = vadd.f32 %v1966_v54, %v4989_v18  ;;  %v4387_v51 = vadd.f32 %v2159_v57, %v4989_v18  ;;  %v4992_v57 = vld [vmem:[#allocation36_spill] sm:$0xff] }
 0x2c3   : > { %v1968_v25 = vpop.f32.mrf.mxu0  ;;  %v2161_v6 = vpop.f32.mrf.mxu1 }
 0x2c4   : > { %v4390_v58 = vadd.f32 %v1968_v25, %v4990_v26  ;;  %v4393_v13 = vadd.f32 %v2161_v6, %v4990_v26 }
 0x2c5   : > { %v1970_v61 = vpop.f32.mrf.mxu0  ;;  %v2163_v33 = vpop.f32.mrf.mxu1 }
 0x2c6   : > { %v4396_v28 = vadd.f32 %v1970_v61, %v4990_v26  ;;  %v4399_v24 = vadd.f32 %v2163_v33, %v4990_v26 }
 0x2c7   : > { %v1974_v30 = vpop.f32.mrf.mxu0  ;;  %v2167_v1 = vpop.f32.mrf.mxu1 }
 0x2c9   : > { %v1976_v12 = vpop.f32.mrf.mxu0  ;;  %v2169_v17 = vpop.f32.mrf.mxu1 }
 0x2ca   : > { %v1977_v61 = vadd.f32 %v1976_v12, %v4994_v11  ;;  %v2170_v38 = vadd.f32 %v2169_v17, %v4994_v11 }
 0x2cb   : > { %v1978_v48 = vpop.f32.mrf.mxu0  ;;  %v2171_v31 = vpop.f32.mrf.mxu1 }
 0x2cc   : > { %v1979_v19 = vadd.f32 %v1978_v48, %v4991_v39  ;;  %v2299_v62 = vmax.f32 %v1977_v61, 0.0  ;;  %v2281_v61 = vmax.f32 %v4369_v35, 0.0 }
 0x2cd   : > { %v1980_v7 = vpop.f32.mrf.mxu0  ;;  %v2173_v47 = vpop.f32.mrf.mxu1 }
 0x2ce   : > { %v1981_v49 = vadd.f32 %v1980_v7, %v4991_v39  ;;  %v2174_v54 = vadd.f32 %v2173_v47, %v4991_v39  ;;  %v2302_v43 = vmax.f32 %v1979_v19, 0.0  ;;  %v1959_v19 = vadd.f32 %v4337_v46, %v4988_v10 }
 0x2cf   : > { %v1984_v2 = vpop.f32.mrf.mxu0  ;;  %v2177_v8 = vpop.f32.mrf.mxu1 }
 0x2d0   : > { %v1985_v26 = vadd.f32 %v1984_v2, %v4992_v57  ;;  %v2178_v33 = vadd.f32 %v2177_v8, %v4992_v57  ;;  %v2303_v63 = vmax.f32 %v1981_v49, 0.0  ;;  %v1975_v8 = vadd.f32 %v1974_v30, %v4994_v11 }
 0x2d1   : > { %v1986_v21 = vpop.f32.mrf.mxu0  ;;  %v2179_v53 = vpop.f32.mrf.mxu1  ;;  %v1965_v30 = vadd.f32 %v4341_v55, %v4989_v18  ;;  %v2294_v55 = vmax.f32 %v4390_v58, 0.0  ;;  %v2285_v58 = vmax.f32 %v4375_v60, 0.0  ;;  %v4995_v60 = vld [vmem:[#allocation69_spill] sm:$0xff] }
 0x2d2   : > { %v1987_v16 = vadd.f32 %v1986_v21, %v4992_v57  ;;  %v2180_v25 = vadd.f32 %v2179_v53, %v4992_v57  ;;  %v2172_v21 = vadd.f32 %v2171_v31, %v4991_v39  ;;  %v2168_v57 = vadd.f32 %v2167_v1, %v4994_v11 }
 0x2d3   : > { %v1988_v0 = vpop.f32.mrf.mxu0  ;;  %v2181_v3 = vpop.f32.mrf.mxu1  ;;  %v2306_v32 = vmax.f32 %v1985_v26, 0.0  ;;  %v2308_v48 = vmax.f32 %v2178_v33, 0.0  ;;  %v2301_v39 = vmax.f32 %v2170_v38, 0.0  ;;  %v2158_v38 = vadd.f32 %v4343_v23, %v4989_v18 }
 0x2d4   : > { %v1989_v59 = vadd.f32 %v1988_v0, %v4993_v4  ;;  %v2182_v6 = vadd.f32 %v2181_v3, %v4993_v4  ;;  %v2305_v3 = vmax.f32 %v2174_v54, 0.0  ;;  %v2307_v36 = vmax.f32 %v1987_v16, 0.0 }
 0x2d5   : > { %v1990_v7 = vpop.f32.mrf.mxu0  ;;  %v2183_v47 = vpop.f32.mrf.mxu1  ;;  %v2309_v17 = vmax.f32 %v2180_v25, 0.0  ;;  %v2297_v16 = vmax.f32 %v4399_v24, 0.0  ;;  %v2372_v25 = vpack.c.bf16 %v2303_v63, %v2299_v62  ;;  %v2298_v1 = vmax.f32 %v1975_v8, 0.0  ;;  %v5000_v8 = vld [vmem:[#allocation32_spill] sm:$0xff] }
 0x2d6   : > { %v1991_v53 = vadd.f32 %v1990_v7, %v4993_v4  ;;  %v2184_v0 = vadd.f32 %v2183_v47, %v4993_v4  ;;  %v2310_v5 = vmax.f32 %v1989_v59, 0.0  ;;  %v2312_v12 = vmax.f32 %v2182_v6, 0.0 }
 0x2d7   : > { %v2304_v4 = vmax.f32 %v2172_v21, 0.0  ;;  %v2295_v59 = vmax.f32 %v4396_v28, 0.0  ;;  %v2374_v6 = vpack.c.bf16 %v2305_v3, %v2301_v39  ;;  %v2300_v11 = vmax.f32 %v2168_v57, 0.0  ;;  %v4996_v21 = vld [vmem:[#allocation70_spill] sm:$0xff] }
 0x2d8   : > { %v2311_v9 = vmax.f32 %v1991_v53, 0.0  ;;  %v2313_v2 = vmax.f32 %v2184_v0, 0.0  ;;  %v2375_v49 = vpack.c.bf16 %v2310_v5, %v2306_v32  ;;  %v2377_v54 = vpack.c.bf16 %v2312_v12, %v2308_v48  ;;  %v4997_v53 = vld [vmem:[#allocation31_spill] sm:$0xff]  ;;  %v4998_v0 = vld [vmem:[#allocation26_spill] sm:$0xff] }
 0x2d9   : > { %v2291_v62 = vmax.f32 %v4384_v37, 0.0  ;;  %v2293_v63 = vmax.f32 %v4387_v51, 0.0  ;;  %v2296_v18 = vmax.f32 %v4393_v13, 0.0  ;;  %v2371_v23 = vpack.c.bf16 %v2302_v43, %v2298_v1 }
 0x2da   : > { %v2376_v31 = vpack.c.bf16 %v2311_v9, %v2307_v36  ;;  %v2378_v7 = vpack.c.bf16 %v2313_v2, %v2309_v17  ;;  %v2152_v36 = vadd.f32 %v4339_v34, %v4988_v10  ;;  %v2373_v5 = vpack.c.bf16 %v2304_v4, %v2300_v11 }
 0x2db   : > { %v2287_v32 = vmax.f32 %v4378_v41, 0.0  ;;  %v2289_v9 = vmax.f32 %v4381_v20, 0.0  ;;  %v2368_v46 = vpack.c.bf16 %v2295_v59, %v2291_v62  ;;  %v2370_v28 = vpack.c.bf16 %v2297_v16, %v2293_v63  ;;  %v5004_v16 = vld [vmem:[#allocation67_spill] sm:$0xff] }
 0x2dc   : > { %2410 = vmatprep.subr.bf16.mxu0 %v2376_v31  ;;  %2451 = vmatprep.subr.bf16.mxu1 %v2378_v7  ;;  %v1955_v34 = vadd.f32 %v4331_v22, %v4987_v52  ;;  %v2148_v10 = vadd.f32 %v4333_v42, %v4987_v52  ;;  %v2290_v37 = vmax.f32 %v1965_v30, 0.0  ;;  %v2292_v51 = vmax.f32 %v2158_v38, 0.0  ;;  %v5001_v31 = vld [vmem:[#allocation55_spill] sm:$0xff]  ;;  %v5002_v7 = vld [vmem:[#allocation44_spill] sm:$0xff] }
 0x2dd   : > { %2411 = vmatpush2.bf16.msra.mxu0 %v2375_v49  ;;  %2452 = vmatpush2.bf16.msra.mxu1 %v2377_v54  ;;  %v1949_v43 = vadd.f32 %v4323_v40, %v4986_v14  ;;  %v2142_v41 = vadd.f32 %v4325_v15, %v4986_v14  ;;  %v2283_v20 = vmax.f32 %v4372_v29, 0.0  ;;  %v2286_v22 = vmax.f32 %v1959_v19, 0.0 }
 0x2de   : > { %2412 = vmatprep.subr.bf16.mxu0 %v2372_v25  ;;  %2453 = vmatprep.subr.bf16.mxu1 %v2374_v6  ;;  %v2288_v13 = vmax.f32 %v2152_v36, 0.0  ;;  %v2367_v24 = vpack.c.bf16 %v2294_v55, %v2290_v37  ;;  %v2369_v42 = vpack.c.bf16 %v2296_v18, %v2292_v51  ;;  %v2279_v52 = vmax.f32 %v4366_v56, 0.0  ;;  %v5005_v6 = vld [vmem:[#allocation68_spill] sm:$0xff] }
 0x2df   : > { %v2364_v26 = vpack.c.bf16 %v2287_v32, %v2283_v20  ;;  %v2366_v33 = vpack.c.bf16 %v2289_v9, %v2285_v58  ;;  %v1945_v40 = vadd.f32 %v4317_v27, %v4983_v45  ;;  %v2138_v15 = vadd.f32 %v4319_v50, %v4983_v45  ;;  %v4999_v45 = vld [vmem:[#allocation66_spill] sm:$0xff]  ;;  %v5007_v32 = vld [vmem:[#allocation72_spill] sm:$0xff]  ;;  %v2381_v20 = vpop.permute.xlu0 %2380 }
 0x2e0   : > { %v2282_v14 = vmax.f32 %v1955_v34, 0.0  ;;  %v2284_v29 = vmax.f32 %v2148_v10, 0.0  ;;  %v1939_v47 = vadd.f32 %v4995_v60, %v4980_v44  ;;  %v2132_v56 = vadd.f32 %v4996_v21, %v4980_v44  ;;  %v5003_v44 = vld [vmem:[#allocation73_spill] sm:$0xff]  ;;  %v5008_v9 = vld [vmem:[#allocation74_spill] sm:$0xff]  ;;  %v5012_v10 = vld [vmem:[#allocation39_spill] sm:$0xff] }
 0x2e1   : > { %2413 = vmatpush2.bf16.msra.mxu0 %v2371_v23  ;;  %2454 = vmatpush2.bf16.msra.mxu1 %v2373_v5  ;;  %v2275_v35 = vmax.f32 %v4997_v53, 0.0  ;;  %v2277_v3 = vmax.f32 %v4998_v0, 0.0  ;;  %v2278_v27 = vmax.f32 %v1949_v43, 0.0  ;;  %v2280_v12 = vmax.f32 %v2142_v41, 0.0  ;;  %v5006_v5 = vld [vmem:[#allocation71_spill] sm:$0xff]  ;;  %v5011_v34 = vld [vmem:[#allocation30_spill] sm:$0xff]  ;;  %v552_v43 = vpop.permute.xlu1 %551 }
 0x2e2   : > { %2414 = vmatprep.subr.bf16.mxu0 %v2368_v46  ;;  %2455 = vmatprep.subr.bf16.mxu1 %v2370_v28  ;;  %v2363_v17 = vpack.c.bf16 %v2286_v22, %v2282_v14  ;;  %v2365_v50 = vpack.c.bf16 %v2288_v13, %v2284_v29  ;;  %v2271_v2 = vmax.f32 %v4999_v45, 0.0  ;;  %v2273_v57 = vmax.f32 %v5000_v8, 0.0  ;;  %v5009_v46 = vld [vmem:[#allocation75_spill] sm:$0xff]  ;;  %v5010_v28 = vld [vmem:[#allocation29_spill] sm:$0xff]  ;;  %v5013_v37 = vld [vmem:[#allocation40_spill] sm:$0xff] }
 0x2e3   : > { %v2360_v48 = vpack.c.bf16 %v2279_v52, %v2275_v35  ;;  %v2362_v39 = vpack.c.bf16 %v2281_v61, %v2277_v3  ;;  %v1935_v4 = vadd.f32 %v5002_v7, %v5001_v31  ;;  %v2128_v49 = vadd.f32 %v5003_v44, %v5001_v31  ;;  %v5014_v51 = vld [vmem:[#allocation28_spill] sm:$0xff]  ;;  %v556_v13 = vpop.permute.xlu0 %555  ;;  %v5018_v52 = vld [vmem:[#allocation63_spill] sm:$0xff]  ;;  %v5020_v53 = vld [vmem:[#allocation65_spill] sm:$0xff] }
 0x2e4   : > { %v2274_v54 = vmax.f32 %v1945_v40, 0.0  ;;  %v2276_v59 = vmax.f32 %v2138_v15, 0.0  ;;  %v2267_v25 = vmax.f32 %v5004_v16, 0.0  ;;  %v2269_v30 = vmax.f32 %v5005_v6, 0.0  ;;  %v5015_v58 = vld [vmem:[#allocation60_spill] sm:$0xff] }
 0x2e5   : > { %2415 = vmatpush2.bf16.msra.mxu0 %v2367_v24  ;;  %2456 = vmatpush2.bf16.msra.mxu1 %v2369_v42  ;;  %v2270_v38 = vmax.f32 %v1939_v47, 0.0  ;;  %v2272_v1 = vmax.f32 %v2132_v56, 0.0  ;;  %v2266_v63 = vmax.f32 %v1935_v4, 0.0  ;;  %v2268_v55 = vmax.f32 %v2128_v49, 0.0  ;;  %v554_v41 = vpop.permute.xlu1 %553  ;;  %v5016_v24 = vld [vmem:[#allocation61_spill] sm:$0xff]  ;;  %v5017_v42 = vld [vmem:[#allocation62_spill] sm:$0xff] }
 0x2e6   : > { %2416 = vmatprep.subr.bf16.mxu0 %v2364_v26  ;;  %2457 = vmatprep.subr.bf16.mxu1 %v2366_v33  ;;  %v2359_v11 = vpack.c.bf16 %v2278_v27, %v2274_v54  ;;  %v2361_v19 = vpack.c.bf16 %v2280_v12, %v2276_v59  ;;  %v2356_v36 = vpack.c.bf16 %v2271_v2, %v2267_v25  ;;  %vm4785_vm13 = vcmp.lt.s32.totalorder %v5015_v58, 4  ;;  %v5019_v61 = vld [vmem:[#allocation64_spill] sm:$0xff]  ;;  %v5021_v12 = vld [vmem:[#allocation49_spill] sm:$0xff] }
 0x2e7   : > { %v2358_v62 = vpack.c.bf16 %v2273_v57, %v2269_v30  ;;  %v2355_v18 = vpack.c.bf16 %v2270_v38, %v2266_v63  ;;  %v2357_v23 = vpack.c.bf16 %v2272_v1, %v2268_v55  ;;  %vm4784_vm14 = vcmp.ge.s32.totalorder %v5016_v24, 4 }
 0x2e8   : > { %vm4783_vm15 = vcmp.ge.s32.totalorder %v5017_v42, 4  ;;  %vm4782_vm1 = vcmp.ge.s32.totalorder %v5018_v52, 4  ;;  %vm4781_vm2 = vcmp.ge.s32.totalorder %v5019_v61, 4  ;;  %v562_v26 = vsel %vm4785_vm13, %v552_v43, %v554_v41 }
 0x2e9   : > { %2417 = vmatpush2.bf16.msra.mxu0 %v2363_v17  ;;  %2458 = vmatpush2.bf16.msra.mxu1 %v2365_v50  ;;  %v558_v22 = vpop.permute.xlu1 %557  ;;  %v561_v15 = vsel %vm4785_vm13, %v554_v41, %v556_v13  ;;  %v565_v14 = vsel %vm4784_vm14, %v562_v26, 0.0  ;;  %v5022_v50 = vld [vmem:[#allocation7_spill] sm:$0xff]  ;;  %v2520_v1 = vcvt.s32.f32 %v5016_v24 }
 0x2ea   : > { %2418 = vmatprep.subr.bf16.mxu0 %v2360_v48  ;;  %2459 = vmatprep.subr.bf16.mxu1 %v2362_v39  ;;  %v563_v33 = vsel %vm4785_vm13, %v558_v22, %v552_v43  ;;  %v560_v40 = vsel %vm4785_vm13, %v556_v13, %v558_v22  ;;  %v566_v60 = vsel %vm4782_vm1, %v561_v15, 0.0  ;;  %v5023_v43 = vld [vmem:[#allocation10_spill] sm:$0xff]  ;;  %v5025_v15 = vld [vmem:[#allocation5_spill] sm:$0xff] }
 0x2eb   : > { %v564_v29 = vsel %vm4783_vm15, %v563_v33, 0.0  ;;  %v567_v47 = vsel %vm4781_vm2, %v560_v40, 0.0  ;;  %v5024_v22 = vld [vmem:[#allocation6_spill] sm:$0xff]  ;;  %vm2745_vm2 = vcmask 1040384  }
 0x2ec   : > { %v572_v21 = vcombine.low %v564_v29, %v565_v14  ;;  %v573_v56 = vcombine.low %v566_v60, %v567_v47  ;;  %v2716_v33 = vrot.slane %v5023_v43, %v5024_v22  ;;  %v2720_v29 = vrot.slane %v5023_v43, %v5025_v15  ;;  %v5026_v47 = vld [vmem:[#allocation9_spill] sm:$0xff] }
 0x2ed   : > { %2419 = vmatpush2.bf16.msra.mxu0 %v2359_v11  ;;  %2460 = vmatpush2.bf16.msra.mxu1 %v2361_v19  ;;  %v2519_v11 = vcvt.s32.f32 %v5017_v42  ;;  %v2521_v19 = vcvt.s32.f32 %v5018_v52 }
 0x2ee   : > { %2420 = vmatprep.subr.bf16.mxu0 %v2356_v36  ;;  %2461 = vmatprep.subr.bf16.mxu1 %v2358_v62  ;;  %v580_v35 = vrot.slane %v572_v21, %v5020_v53  ;;  %v587_v0 = vrot.slane %v573_v56, %v5020_v53  ;;  %v2522_v36 = vcvt.s32.f32 %v5019_v61  ;;  %v2724_v21 = vrot.slane %v5023_v43, %v5026_v47  ;;  %v5027_v56 = vld [vmem:[#allocation8_spill] sm:$0xff] }
 0x2ef   : > { %v2552_v62 = vcombine.low %v2519_v11, %v2520_v1 }
 0x2f0   : > { %v588_v3 = vcombine.low %v580_v35, %v587_v0  ;;  %v2553_v63 = vcombine.low %v2521_v19, %v2522_v36  ;;  %v5028_v35 = vld [vmem:[#allocation4_spill] sm:$0xff] }
 0x2f1   : > { %2421 = vmatpush2.bf16.msra.mxu0 %v2355_v18  ;;  %2462 = vmatpush2.bf16.msra.mxu1 %v2357_v23  ;;  %v2560_v55 = vrot.slane %v2552_v62, %v5020_v53  ;;  %vm2478_vm14 = vcmp.lt.s32.totalorder %v5028_v35, 3 }
 0x2f2   : > { %2422 = vmatprep.subr.bf16.mxu0 %v5006_v5  ;;  %2463 = vmatprep.subr.bf16.mxu1 %v5007_v32  ;;  %v595_v27 = vrot.slane %v588_v3, %v5020_v53  ;;  %v2567_v18 = vrot.slane %v2553_v63, %v5020_v53 }
 0x2f4   : > { %v4498_v17 = vadd.f32 %v595_v27, %v5021_v12 }
 0x2f5   : > { %2423 = vmatpush2.bf16.msra.mxu0 %v5008_v9  ;;  %2464 = vmatpush2.bf16.msra.mxu1 %v5009_v46 }
 0x2f6   : > { %2424 = vmatprep.subr.bf16.mxu0 %v5010_v28  ;;  %2465 = vmatprep.subr.bf16.mxu1 %v5011_v34  ;;  %v598_v45 = vsub.f32 %v4498_v17, %v5022_v50  ;;  %v2568_v34 = vcombine.low %v2560_v55, %v2567_v18 }
 0x2f8   : > { %v599_v7 = vmul.f32 1.442695, %v598_v45 }
 0x2f9   : > { %2425 = vmatpush2.bf16.msra.mxu0 %v5012_v10  ;;  %2466 = vmatpush2.bf16.msra.mxu1 %v5013_v37 }
 0x2fc   : > { %2427 = vmatmul.mubr.bf16.vlgmr.msra.gmra.mxu0 %v5014_v51  ;;  %2468 = vmatmul.mubr.bf16.vlgmr.msra.gmra.mxu1 %v5014_v51 }
 0x3bc   : > { %v2428_v2 = vpop.f32.mrf.mxu0  ;;  %v2469_v8 = vpop.f32.mrf.mxu1 }
 0x3bd   : > { %v4502_v57 = vadd.f32 %v2428_v2, %v2381_v20  ;;  %v4504_v48 = vadd.f32 %v2469_v8, %v2381_v20 }
 0x3be   : > { %v2430_v39 = vpop.f32.mrf.mxu0  ;;  %v2471_v31 = vpop.f32.mrf.mxu1 }
 0x3bf   : > { %v3005_v4 = vmul.f32 -1.442695, %v4502_v57  ;;  %v3007_v44 = vmul.f32 -1.442695, %v4504_v48  ;;  %v4508_v49 = vadd.f32 %v2430_v39, %v2381_v20  ;;  %v4510_v54 = vadd.f32 %v2471_v31, %v2381_v20 }
 0x3c0   : > { %v2432_v59 = vpop.f32.mrf.mxu0  ;;  %v2473_v16 = vpop.f32.mrf.mxu1  ;;  %v2575_v20 = vrot.slane %v2568_v34, %v5020_v53  ;;  %v2507_v40 = vmul.f32 0.01, %v4502_v57  ;;  %vm2503_vm1 = vcmp.ge.f32.partialorder %v4502_v57, 0.0  ;;  %v2509_v60 = vmul.f32 0.01, %v4504_v48 }
 0x3c1   : > { %3137 = vpow2.f32 %v3005_v4  ;;  %v3006_v25 = vmul.f32 -1.442695, %v4508_v49  ;;  %v3008_v38 = vmul.f32 -1.442695, %v4510_v54  ;;  %v2728_v53 = vrot.slane %v5023_v43, %v5027_v56 }
 0x3c2   : > { %3139 = vpow2.f32 %v3007_v44  ;;  %v2433_v6 = vpop.f32.mrf.mxu0  ;;  %v2474_v30 = vpop.f32.mrf.mxu1  ;;  %vm2505_vm15 = vcmp.ge.f32.partialorder %v4504_v48, 0.0  ;;  %v2508_v27 = vmul.f32 0.01, %v4508_v49  ;;  %v2511_v8 = vsel %vm2503_vm1, %v4502_v57, %v2507_v40 }
 0x3c3   : > { %3141 = vpow2.f32 %v599_v7  ;;  %vm2504_vm13 = vcmp.ge.f32.partialorder %v4508_v49, 0.0  ;;  %v2513_v7 = vsel %vm2505_vm15, %v4504_v48, %v2509_v60  ;;  %v2510_v4 = vmul.f32 0.01, %v4510_v54 }
 0x3c4   : > { %3143 = vpow2.f32 %v3006_v25  ;;  %vm2506_vm9 = vcmp.ge.f32.partialorder %v4510_v54, 0.0  ;;  %v2512_v6 = vsel %vm2504_vm13, %v4508_v49, %v2508_v27  ;;  %vm2760_vm1 = vcmask 1046528  }
 0x3c5   : > { %3145 = vpow2.f32 %v3008_v38  ;;  %v2514_v62 = vsel %vm2506_vm9, %v4510_v54, %v2510_v4  ;;  %vm5037_vm13 = vcmp.ge.s32.totalorder %v5017_v42, 4  ;;  %vm5039_vm15 = vcmp.ge.s32.totalorder %v5019_v61, 4 }
 0x3ce   : > { %v3138_v23 = vpop.eup %3137 }
 0x3cf   : > { %v3140_v5 = vpop.eup %3139  ;;  %v2491_v32 = vadd.f32 1.0, %v3138_v23 }
 0x3d0   : > { %v3142_v9 = vpop.eup %3141  ;;  %v2493_v46 = vadd.f32 1.0, %v3140_v5 }
 0x3d1   : > { %v3144_v28 = vpop.eup %3143  ;;  %3147 = vrcp.f32 %v2491_v32  ;;  %v601_v41 = vmul.f32 %v3142_v9, %v5023_v43 }
 0x3d2   : > { %v3146_v10 = vpop.eup %3145  ;;  %3149 = vrcp.f32 %v2493_v46  ;;  %v2492_v37 = vadd.f32 1.0, %v3144_v28 }
 0x3d3   : > { %v2494_v51 = vadd.f32 1.0, %v3146_v10  ;;  %v2527_v13 = vrot.slane %v601_v41, %v5024_v22  ;;  %v4523_v26 = vmul.f32 %v2575_v20, %v601_v41  ;;  %v2531_v14 = vrot.slane %v601_v41, %v5025_v15 }
 0x3d4   : > { %3151 = vrcp.f32 %v2492_v37  ;;  %v2535_v0 = vrot.slane %v601_v41, %v5026_v47  ;;  %v2539_v3 = vrot.slane %v601_v41, %v5027_v56 }
 0x3d5   : > { %3153 = vrcp.f32 %v2494_v51  ;;  %v2582_v12 = vrot.slane %v4523_v26, %v5024_v22  ;;  %v2746_v50 = vsel %vm2745_vm2, %v2527_v13, %v2716_v33  ;;  %v2586_v45 = vrot.slane %v4523_v26, %v5025_v15 }
 0x3d6   : > { %v2747_v39 = vsel %vm2745_vm2, %v2531_v14, %v2720_v29  ;;  %v2748_v48 = vsel %vm2745_vm2, %v2535_v0, %v2724_v21  ;;  %v2590_v23 = vrot.slane %v4523_v26, %v5026_v47  ;;  %v2594_v41 = vrot.slane %v4523_v26, %v5027_v56 }
 0x3d7   : > { %v2749_v20 = vsel %vm2745_vm2, %v2539_v3, %v2728_v53 }
 0x3de   : > { %v3148_v2 = vpop.eup %3147 }
 0x3df   : > { %v3150_v31 = vpop.eup %3149  ;;  %v2515_v44 = vsel %vm2478_vm14, %v3148_v2, %v2511_v8 }
 0x3e0   : > { %v2544_v59 = vmul.f32 %v2527_v13, %v2515_v44  ;;  %v2737_v57 = vrot.slane %v2515_v44, 6  ;;  %v2517_v16 = vsel %vm2478_vm14, %v3150_v31, %v2513_v7 }
 0x3e1   : > { %v3152_v25 = vpop.eup %3151  ;;  %v2739_v30 = vrot.slane %v2517_v16, 6  ;;  %v2546_v36 = vmul.f32 %v2535_v0, %v2517_v16 }
 0x3e2   : > { %v3154_v38 = vpop.eup %3153  ;;  %v2599_v1 = vsel %vm857_vm0, %v2544_v59, %v2582_v12  ;;  %v2751_v11 = vsel %vm2750_vm12, %v2746_v50, %v2737_v57  ;;  %v2516_v19 = vsel %vm2478_vm14, %v3152_v25, %v2512_v6 }
 0x3e3   : > { %v2756_v63 = vsel %vm2755_vm11, %v2751_v11, 0.0  ;;  %2603 = vrot.lane.b32.xlu0 %v2599_v1, %s3183_s17  ;;  %v2545_v49 = vmul.f32 %v2531_v14, %v2516_v19  ;;  %v2738_v55 = vrot.slane %v2516_v19, 6  ;;  %v2753_v5 = vsel %vm2750_vm12, %v2748_v48, %v2739_v30 }
 0x3e4   : > { %v2761_v18 = vsel %vm2760_vm1, %v2756_v63, 0.0  ;;  %v2518_v32 = vsel %vm2478_vm14, %v3154_v38, %v2514_v62  ;;  %v2758_v46 = vsel %vm2755_vm11, %v2753_v5, 0.0  ;;  %v2601_v10 = vsel %vm857_vm0, %v2546_v36, %v2590_v23 }
 0x3e5   : > { %2782 = vst [vmem:[%s4574_s21] sm:$0xff] %v2761_v18  ;;  %v2600_v54 = vsel %vm857_vm0, %v2545_v49, %v2586_v45  ;;  %v2752_v9 = vsel %vm2750_vm12, %v2747_v39, %v2738_v55  ;;  %v2547_v28 = vmul.f32 %v2539_v3, %v2518_v32  ;;  %v2763_v37 = vsel %vm2760_vm1, %v2758_v46, 0.0 }
 0x3e6   : > { %v2757_v34 = vsel %vm2755_vm11, %v2752_v9, 0.0  ;;  %2605 = vrot.lane.b32.xlu1 %v2600_v54, %s3183_s17  ;;  %v2740_v51 = vrot.slane %v2518_v32, 6  ;;  %2784 = vst [vmem:[%s4574_s21 + $0x10] sm:$0xff] %v2763_v37  ;;  %v602_v63 = vmul.f32 1.442695, %v4498_v17  ;;  %vm5038_vm14 = vcmp.ge.s32.totalorder %v5018_v52, 4 }
 0x3e7   : > { %v2762_v43 = vsel %vm2760_vm1, %v2757_v34, 0.0  ;;  %2607 = vrot.lane.b32.xlu0 %v2601_v10, %s3183_s17  ;;  %v2602_v33 = vsel %vm857_vm0, %v2547_v28, %v2594_v41 }
 0x3e8   : > { %2783 = vst [vmem:[%s4574_s21 + $0x8] sm:$0xff] %v2762_v43  ;;  %v2754_v13 = vsel %vm2750_vm12, %v2749_v20, %v2740_v51  ;;  %3155 = vpow2.f32 %v602_v63 }
 0x3e9   : > { %v2759_v40 = vsel %vm2755_vm11, %v2754_v13, 0.0 }
 0x3ea   : > { %v2764_v14 = vsel %vm2760_vm1, %v2759_v40, 0.0  ;;  %2609 = vrot.lane.b32.xlu1 %v2602_v33, %s3183_s17 }
 0x3eb   : > { %2785 = vst [vmem:[%s4574_s21 + $0x18] sm:$0xff] %v2764_v14 }
 0x3f5   : > { %v3156_v49 = vpop.eup %3155 }
 0x3f6   : > { %v2695_v32 = vrot.slane %v3156_v49, %v5025_v15  ;;  %v2691_v9 = vrot.slane %v3156_v49, %v5024_v22  ;;  %v2699_v28 = vrot.slane %v3156_v49, %v5026_v47  ;;  %v2703_v22 = vrot.slane %v3156_v49, %v5027_v56 }
 0x455   : > { %v2604_v29 = vpop.permute.xlu0 %2603 }
 0x458   : > { %v2606_v60 = vpop.permute.xlu1 %2605 }
 0x459   : > { %v2613_v21 = vsel %vm415_vm4, %v2604_v29, %v2606_v60  ;;  %v2608_v53 = vpop.permute.xlu0 %2607 }
 0x45a   : > { %v2624_v26 = vsel %vm383_vm3, %v2613_v21, 0.0  ;;  %v2612_v3 = vsel %vm415_vm4, %v2606_v60, %v2608_v53  ;;  %vm5029_vm3 = vcmp.ge.s32.totalorder %v5016_v24, 2 }
 0x45b   : > { %v2628_v35 = vadd.f32 %v2624_v26, %v2600_v54  ;;  %v2625_v39 = vsel %vm384_vm6, %v2612_v3, 0.0  ;;  %vm5032_vm6 = vcmp.lt.s32.totalorder %v5015_v58, 4 }
 0x45c   : > { %v2610_v0 = vpop.permute.xlu1 %2609  ;;  %v2629_v31 = vadd.f32 %v2625_v39, %v2601_v10  ;;  %vm5034_vm9 = vmmov %vm5032_vm6 }
 0x45d   : > { %v2611_v27 = vsel %vm415_vm4, %v2608_v53, %v2610_v0  ;;  %v2614_v12 = vsel %vm415_vm4, %v2610_v0, %v2604_v29  ;;  %2633 = vrot.lane.b32.xlu1 %v2628_v35, %s3185_s20  ;;  %vm5030_vm4 = vcmp.ge.s32.totalorder %v5018_v52, 2  ;;  %vm5036_vm12 = vmmov %vm5032_vm6 }
 0x45e   : > { %v2623_v50 = vsel %vm382_vm5, %v2614_v12, 0.0  ;;  %v2626_v45 = vsel %vm385_vm7, %v2611_v27, 0.0  ;;  %vm5031_vm5 = vcmp.ge.s32.totalorder %v5019_v61, 2  ;;  %vm5033_vm7 = vcmp.ge.s32.totalorder %v5016_v24, 4 }
 0x45f   : > { %v2627_v2 = vadd.f32 %v2623_v50, %v2599_v1  ;;  %v2630_v8 = vadd.f32 %v2626_v45, %v2602_v33  ;;  %v2812_v50 = vld [vmem:[%s4574_s21] sm:$0xff] (%p3254_p5)  ;;  %v2814_v45 = vld [vmem:[%s4574_s21 + $0x8] sm:$0xff] (%p3254_p5) }
 0x461   : > { %2631 = vrot.lane.b32.xlu0 %v2627_v2, %s3185_s20  ;;  %2637 = vrot.lane.b32.xlu1 %v2630_v8, %s3185_s20 }
 0x465   : > { %2635 = vrot.lane.b32.xlu0 %v2629_v31, %s3185_s20 }
 0x4cf   : > { %v2634_v7 = vpop.permute.xlu1 %2633 }
 0x4d3   : > { %v2638_v4 = vpop.permute.xlu1 %2637  ;;  %v2632_v44 = vpop.permute.xlu0 %2631 }
 0x4d4   : > { %v2641_v59 = vsel %vm487_vm8, %v2632_v44, %v2634_v7  ;;  %v2642_v57 = vsel %vm487_vm8, %v2638_v4, %v2632_v44 }
 0x4d5   : > { %v2651_v16 = vsel %vm454_vm10, %v2642_v57, 0.0  ;;  %v2652_v25 = vsel %vm5029_vm3, %v2641_v59, 0.0  ;;  %vm5035_vm10 = vmmov %vm5032_vm6 }
 0x4d6   : > { %v2655_v6 = vadd.f32 %v2651_v16, %v2627_v2  ;;  %v2656_v30 = vadd.f32 %v2652_v25, %v2628_v35  ;;  %v2816_v2 = vld [vmem:[%s4574_s21 + $0x10] sm:$0xff] (%p3254_p5) }
 0x4d7   : > { %v2636_v48 = vpop.permute.xlu0 %2635 }
 0x4d8   : > { %v2639_v38 = vsel %vm487_vm8, %v2636_v48, %v2638_v4  ;;  %v2640_v1 = vsel %vm487_vm8, %v2634_v7, %v2636_v48  ;;  %2659 = vrot.lane.b32.xlu0 %v2655_v6, %s3187_s12  ;;  %2661 = vrot.lane.b32.xlu1 %v2656_v30, %s3187_s12  ;;  %vm2769_vm8 = vcmask 1044480  }
 0x4d9   : > { %v2653_v11 = vsel %vm5030_vm4, %v2640_v1, 0.0  ;;  %v2654_v19 = vsel %vm5031_vm5, %v2639_v38, 0.0 }
 0x4da   : > { %v2657_v36 = vadd.f32 %v2653_v11, %v2629_v31  ;;  %v2658_v62 = vadd.f32 %v2654_v19, %v2630_v8  ;;  %v2818_v8 = vld [vmem:[%s4574_s21 + $0x18] sm:$0xff] (%p3254_p5) }
 0x4dc   : > { %2663 = vrot.lane.b32.xlu0 %v2657_v36, %s3187_s12  ;;  %2665 = vrot.lane.b32.xlu1 %v2658_v62, %s3187_s12  ;;  %s2799_s12 = scalar_lea.vmem (%p3254_p5), %s4708_s6, %s3015_s13 }
 0x4dd   : > { %2813 = vst [vmem:[%s2799_s12] sm:$0xff] (%p3254_p5), %v2812_v50  ;;  %2815 = vst [vmem:[%s2799_s12 + $0x8] sm:$0xff] (%p3254_p5), %v2814_v45 }
 0x4de   : > { %2817 = vst [vmem:[%s2799_s12 + $0x10] sm:$0xff] (%p3254_p5), %v2816_v2  ;;  %2819 = vst [vmem:[%s2799_s12 + $0x18] sm:$0xff] (%p3254_p5), %v2818_v8 }
 0x54a   : > { %v2662_v55 = vpop.permute.xlu1 %2661  ;;  %v2660_v18 = vpop.permute.xlu0 %2659 }
 0x54b   : > { %v2669_v23 = vsel %vm5032_vm6, %v2660_v18, %v2662_v55 }
 0x54c   : > { %v2680_v5 = vsel %vm5033_vm7, %v2669_v23, 0.0 }
 0x54d   : > { %v2684_v54 = vadd.f32 %v2680_v5, %v2656_v30 }
 0x54e   : > { %v2666_v46 = vpop.permute.xlu1 %2665  ;;  %v2664_v17 = vpop.permute.xlu0 %2663 }
 0x54f   : > { %v2709_v34 = vadd.f32 %v2695_v32, %v2684_v54  ;;  %v2670_v10 = vsel %vm5034_vm9, %v2666_v46, %v2660_v18  ;;  %v2667_v37 = vsel %vm5035_vm10, %v2664_v17, %v2666_v46  ;;  %v2668_v24 = vsel %vm5036_vm12, %v2662_v55, %v2664_v17 }
 0x550   : > { %v2679_v15 = vsel %vm5037_vm13, %v2670_v10, 0.0  ;;  %v2681_v47 = vsel %vm5038_vm14, %v2668_v24, 0.0  ;;  %v2682_v51 = vsel %vm5039_vm15, %v2667_v37, 0.0 }
 0x551   : > { %v2766_v43 = vsel %vm857_vm0, %v2709_v34, %v2684_v54  ;;  %v2683_v41 = vadd.f32 %v2679_v15, %v2655_v6  ;;  %v2685_v20 = vadd.f32 %v2681_v47, %v2657_v36  ;;  %v2686_v13 = vadd.f32 %v2682_v51, %v2658_v62 }
 0x552   : > { %v2771_v58 = vsel %vm2769_vm8, %v2766_v43, %v2695_v32 }
 0x553   : > { %v2775_v33 = vsel %vm2755_vm11, %v2771_v58, 0.0  ;;  %v2708_v40 = vadd.f32 %v2691_v9, %v2683_v41  ;;  %v2710_v42 = vadd.f32 %v2699_v28, %v2685_v20  ;;  %v2711_v14 = vadd.f32 %v2703_v22, %v2686_v13 }
 0x554   : > { %v2779_v52 = vsel %vm2760_vm1, %v2775_v33, 0.0 }
 0x555   : > { %2787 = vst [vmem:[%s4574_s21 + $0x28] sm:$0xff] %v2779_v52  ;;  %v2765_v61 = vsel %vm857_vm0, %v2708_v40, %v2683_v41  ;;  %v2767_v56 = vsel %vm857_vm0, %v2710_v42, %v2685_v20  ;;  %v2768_v29 = vsel %vm857_vm0, %v2711_v14, %v2686_v13 }
 0x556   : > { %v2770_v60 = vsel %vm2769_vm8, %v2765_v61, %v2691_v9  ;;  %v2772_v21 = vsel %vm2769_vm8, %v2767_v56, %v2699_v28  ;;  %v2773_v26 = vsel %vm2769_vm8, %v2768_v29, %v2703_v22  ;;  %2796 = sbr.rel (!%p3254_p5) target bundleno = 1379 (0x563), region = 71 }
 0x557   : > { %v2774_v53 = vsel %vm2755_vm11, %v2770_v60, 0.0  ;;  %v2776_v35 = vsel %vm2755_vm11, %v2772_v21, 0.0  ;;  %v2777_v0 = vsel %vm2755_vm11, %v2773_v26, 0.0 }
 0x558   : > { %v2778_v3 = vsel %vm2760_vm1, %v2774_v53, 0.0  ;;  %v2780_v27 = vsel %vm2760_vm1, %v2776_v35, 0.0  ;;  %v2781_v12 = vsel %vm2760_vm1, %v2777_v0, 0.0 }
 0x559   : > { %2786 = vst [vmem:[%s4574_s21 + $0x20] sm:$0xff] %v2778_v3  ;;  %2788 = vst [vmem:[%s4574_s21 + $0x30] sm:$0xff] %v2780_v27 }
 0x55a   : > { %2789 = vst [vmem:[%s4574_s21 + $0x38] sm:$0xff] %v2781_v12 }
 0x55c   : > { %v2822_v31 = vld [vmem:[%s4574_s21 + $0x28] sm:$0xff] }
 0x55d   : > { %2823 = vst [vmem:[%s2799_s12 + $0x48] sm:$0xff] %v2822_v31 }
 0x560   : > { %v2820_v39 = vld [vmem:[%s4574_s21 + $0x20] sm:$0xff]  ;;  %v2824_v7 = vld [vmem:[%s4574_s21 + $0x30] sm:$0xff] }
 0x561   : > { %2821 = vst [vmem:[%s2799_s12 + $0x40] sm:$0xff] %v2820_v39  ;;  %v2826_v4 = vld [vmem:[%s4574_s21 + $0x38] sm:$0xff]  ;;  %2825 = vst [vmem:[%s2799_s12 + $0x50] sm:$0xff] %v2824_v7 }
 0x562   : > { %2827 = vst [vmem:[%s2799_s12 + $0x58] sm:$0xff] %v2826_v4 }
 0x563 PF: > { %p13_p11 = scmp.ge.s32.totalorder %s3242_s25, 4   ;;  %s5040_s21 = smov %s3176_s22 }
 0x564   : > { %s5041_s22 = smov %s3252_s28  ;;  %s5042_s23 = smov %s3242_s25 }
 0x565   :  { %15 = sbr.rel (!%p13_p11) target bundleno = 2 (0x2), region = 129 }

</bundles_post_ra>
